<compile_context>
chip_gen: v7x
topology: tpu7x:2x2x1
jax: 0.10.0
libtpu: 0.0.40
codegen_flags: <defaults>
</compile_context>

<pallas_src>
import math
import numpy as np
import jax
import jax.numpy as jnp
from jax.experimental import pallas as pl
from jax.experimental.pallas import tpu as pltpu

# ---- stand-ins for the repo-level `config`, `constants`, `EPS` -------------------
THETA_CUT = 0.5
EPS = 1e-4
NBINS = 24                                  # theta histogram bins (pred_theta: NBINS+1 channels)
STEP = 15.0 * math.pi / 180.0               # 15 degree bin width
INV_STEP = 1.0 / STEP
CUT0 = -math.pi + 0.5 * STEP                # cutoffs[0]
TWO_PI = 2.0 * math.pi
BG_THETA = np.full((NBINS,), 1.0 / NBINS)   # uniform background distribution


def periodic_cubic_spline(x, y):
    """x: (n+1,) uniform knots; y: (..., n+1) with y[..., n] == y[..., 0].
    Returns per-interval coefficients (..., n, 4) = (a, b, c, d):
        S_i(t) = a + b*(t-x_i) + c*(t-x_i)^2 + d*(t-x_i)^3  on [x_i, x_{i+1}]."""
    n = x.shape[0] - 1
    h = float(x[1] - x[0])
    A = np.zeros((n, n))
    for i in range(n):
        A[i, i] += 2.0 * h / 3.0
        A[i, (i - 1) % n] += h / 6.0
        A[i, (i + 1) % n] += h / 6.0
    yk = y[..., :n]
    rhs = (np.roll(yk, -1, axis=-1) - 2.0 * yk + np.roll(yk, 1, axis=-1)) / h
    M = np.linalg.solve(A, rhs.reshape(-1, n).T).T.reshape(rhs.shape)   # second derivatives
    Mi, Mip1 = M, np.roll(M, -1, axis=-1)
    yi, yip1 = yk, np.roll(yk, -1, axis=-1)
    a = yi
    b = (yip1 - yi) / h - h * (2.0 * Mi + Mip1) / 6.0
    c = Mi / 2.0
    d = (Mip1 - Mi) / (6.0 * h)
    return np.stack([a, b, c, d], axis=-1)


# ---- in-kernel atan2 (Cephes atanf-style); divides routed to the EUP -------------
def _atan_core(z):
    z2 = z * z
    p = ((8.05374449538e-2 * z2 - 1.38776856032e-1) * z2 + 1.99777106478e-1) * z2 - 3.33329491539e-1
    return p * z2 * z + z


def _atan(x):
    ax = jnp.abs(x)
    big = ax > 2.414213562373095            # tan(3*pi/8)
    mid = ax > 0.4142135623730951           # tan(pi/8)
    safe = jnp.maximum(ax, 1e-30)
    inv_safe = pl.reciprocal(safe, approx=True)          # EUP, off the VALU slot
    inv_ap1 = pl.reciprocal(ax + 1.0, approx=True)       # EUP
    z = jnp.where(big, -inv_safe, jnp.where(mid, (ax - 1.0) * inv_ap1, ax))
    r = _atan_core(z)
    r = r + jnp.where(big, 0.5 * math.pi, jnp.where(mid, 0.25 * math.pi, 0.0))
    return jnp.where(x < 0.0, -r, r)


def _atan2(y, x):
    safe_x = jnp.where(x == 0.0, 1.0, x)
    base = _atan(y * pl.reciprocal(safe_x, approx=True))  # EUP
    corr = jnp.where(y >= 0.0, math.pi, -math.pi)
    r = jnp.where(x < 0.0, base + corr, base)
    r = jnp.where(x == 0.0,
                  jnp.where(y > 0.0, 0.5 * math.pi,
                            jnp.where(y < 0.0, -0.5 * math.pi, 0.0)),
                  r)
    return r


# ---- the Pallas kernel ------------------------------------------------------------
def theta_kernel(cnt_ref, geom_ref, cbT_ref, coeff_ref, mask_ref, out_ref, acc_ref):
    i_id = pl.program_id(0)     # i-tile   (parallel -> both TCs where available)
    j_id = pl.program_id(1)     # j-tile   (arbitrary)
    b_id = pl.program_id(2)     # batch    (arbitrary, innermost -> coeff tile reused)

    @pl.when((j_id == 0) & (b_id == 0))
    def _init():
        acc_ref[...] = jnp.zeros_like(acc_ref)

    @pl.when(cnt_ref[i_id, j_id] > 0)       # skip fully-masked pair tiles (incl. padding)
    def _body():
        g = geom_ref[0]                     # (TI, 8): [v(3), cr(3), v.CB_i, cr.CB_i]
        cbT = cbT_ref[0]                    # (3, TJ): CB_j components (lane-dense)

        cbx = cbT[0:1, :]
        cby = cbT[1:2, :]
        cbz = cbT[2:3, :]
        # x_ij = v_i.CB_j - v_i.CB_i ;  y_ij = cr_i.CB_j - cr_i.CB_i   (exact: v,cr ⟂ b1h)
        x = (g[:, 0:1] * cbx + g[:, 1:2] * cby + g[:, 2:3] * cbz) - g[:, 6:7]
        y = (g[:, 3:4] * cbx + g[:, 4:5] * cby + g[:, 5:6] * cbz) - g[:, 7:8]

        theta = _atan2(y, x)                # (TI, TJ) dihedral

        # periodic cubic-spline bin / local coordinate
        th = jnp.where(theta < CUT0, theta + TWO_PI, theta)
        kf = jnp.clip(jnp.floor((th - CUT0) * INV_STEP), 0.0, NBINS - 1.0)
        dt = th - (CUT0 + kf * STEP)

        # select the 4 (bf16) coefficient tiles for each element's bin, then one f32 Horner
        cz = jnp.zeros(th.shape, coeff_ref.dtype)
        s0 = cz
        s1 = cz
        s2 = cz
        s3 = cz
        for idx in range(NBINS):            # static unroll, VPU selects (float bin compare)
            m = kf == float(idx)
            s0 = jnp.where(m, coeff_ref[4 * idx + 0], s0)
            s1 = jnp.where(m, coeff_ref[4 * idx + 1], s1)
            s2 = jnp.where(m, coeff_ref[4 * idx + 2], s2)
            s3 = jnp.where(m, coeff_ref[4 * idx + 3], s3)
        val = s0.astype(jnp.float32) + dt * (
            s1.astype(jnp.float32) + dt * (
                s2.astype(jnp.float32) + dt * s3.astype(jnp.float32)))

        val = jnp.where(mask_ref[...] != 0.0, val, 0.0)
        acc_ref[...] += val                 # pure VPU add; no per-step reduce / scalar RMW

    @pl.when((j_id == pl.num_programs(1) - 1) & (b_id == pl.num_programs(2) - 1))
    def _fin():
        # single amortized cross-lane/sublane reduce + lane-dense (8,128) store per i-tile
        out_ref[...] = jnp.zeros(out_ref.shape, out_ref.dtype) + jnp.sum(acc_ref[...])


def _pick_tile(L, target, quantum):
    """Largest divisor of L that is a multiple of `quantum` and <= target, else L."""
    best = None
    for t in range(quantum, min(L, target) + 1, quantum):
        if L % t == 0:
            best = t
    return best if best is not None else L


@jax.jit
def theta_restraint_forward(N, CA, CB, mask_f, coeff_lin):
    """N, CA, CB: (B, L, 3) f32; mask_f: (L, L) f32; coeff_lin: (NBINS*4, L, L) bf16/f32."""
    B, L, _ = N.shape

    # ---- pad residue axes to a multiple of 128: lane-dense tiles for any L ---------
    # Padded residues are zero-coordinate / zero-mask; their pair tiles have cnt==0
    # and are skipped inside the kernel.
    L_pad = ((L + 127) // 128) * 128
    pad = L_pad - L
    if pad:
        N = jnp.pad(N, ((0, 0), (0, pad), (0, 0)))
        CA = jnp.pad(CA, ((0, 0), (0, pad), (0, 0)))
        CB = jnp.pad(CB, ((0, 0), (0, pad), (0, 0)))
        mask_f = jnp.pad(mask_f, ((0, pad), (0, pad)))
        coeff_lin = jnp.pad(coeff_lin, ((0, 0), (0, pad), (0, pad)))

    TI = _pick_tile(L_pad, 32, 8)        # small-sublane slab -> bounded vreg pressure
    TJ = _pick_tile(L_pad, 256, 128)     # lane-dense (L_pad % 128 == 0 by construction)
    nI, nJ = L_pad // TI, L_pad // TJ

    # ---- O(B*L) per-residue geometry hoisted out of the kernel (plain XLA) --------
    b0 = N - CA
    b1 = CB - CA
    inv_n = jax.lax.rsqrt(jnp.maximum(jnp.sum(b1 * b1, -1, keepdims=True), 1e-12))
    b1h = b1 * inv_n
    v = b0 - jnp.sum(b0 * b1h, -1, keepdims=True) * b1h
    cr = jnp.cross(b1h, v)
    vdot = jnp.sum(v * CB, -1, keepdims=True)
    crdot = jnp.sum(cr * CB, -1, keepdims=True)
    geom = jnp.concatenate([v, cr, vdot, crdot], axis=-1).astype(jnp.float32)   # (B, L_pad, 8)
    cbT = jnp.transpose(CB, (0, 2, 1)).astype(jnp.float32)                      # (B, 3, L_pad)

    # per-(i,j)-tile mask occupancy -> scalar-prefetched tile skipping
    counts = jnp.sum(mask_f.reshape(nI, TI, nJ, TJ), axis=(1, 3)).astype(jnp.int32)

    out = pl.pallas_call(
        theta_kernel,
        out_shape=jax.ShapeDtypeStruct((nI, 8, 128), jnp.float32),
        grid_spec=pltpu.PrefetchScalarGridSpec(
            num_scalar_prefetch=1,
            grid=(nI, nJ, B),
            in_specs=[
                pl.BlockSpec((1, TI, 8), lambda i, j, b, cnt: (b, i, 0)),            # geom
                pl.BlockSpec((1, 3, TJ), lambda i, j, b, cnt: (b, 0, j)),            # CB^T
                pl.BlockSpec((NBINS * 4, TI, TJ), lambda i, j, b, cnt: (0, i, j)),   # coeff (bf16)
                pl.BlockSpec((TI, TJ), lambda i, j, b, cnt: (i, j)),                 # mask
            ],
            out_specs=pl.BlockSpec((1, 8, 128), lambda i, j, b, cnt: (i, 0, 0)),     # per-i partials
            scratch_shapes=[pltpu.VMEM((TI, TJ), jnp.float32)],                      # accumulator
        ),
        compiler_params=pltpu.CompilerParams(
            dimension_semantics=("parallel", "arbitrary", "arbitrary")),
    )(counts, geom, cbT, coeff_lin, mask_f)

    return {"pairwise_theta": jnp.sum(out[:, 0, 0])}


# ---- pure-JAX reference (for verification only) -----------------------------------
def reference_forward(N, CA, CB, mask_b, coeff4, cutoffs):
    b0 = N - CA
    b1 = CB - CA
    b1h = b1 / jnp.linalg.norm(b1, axis=-1, keepdims=True)
    v = b0 - jnp.sum(b0 * b1h, -1, keepdims=True) * b1h
    cr = jnp.cross(b1h, v)
    b2 = CB[:, None, :, :] - CB[:, :, None, :]                  # [b,i,j] = CB_j - CB_i
    w = b2 - jnp.sum(b2 * b1h[:, :, None, :], -1, keepdims=True) * b1h[:, :, None, :]
    x = jnp.sum(v[:, :, None, :] * w, -1)
    y = jnp.sum(cr[:, :, None, :] * w, -1)
    theta = jnp.arctan2(y, x)
    step = cutoffs[1] - cutoffs[0]
    th = jnp.where(theta < cutoffs[0], theta + TWO_PI, theta)
    k = jnp.clip(jnp.floor((th - cutoffs[0]) / step), 0, NBINS - 1).astype(jnp.int32)
    dt = th - (cutoffs[0] + k.astype(jnp.float32) * step)
    oh = jax.nn.one_hot(k, NBINS, dtype=jnp.float32)            # (B,L,L,NBINS)
    csel = jnp.einsum("bijn,ijnm->bijm", oh, coeff4)            # (B,L,L,4)
    val = csel[..., 0] + dt * (csel[..., 1] + dt * (csel[..., 2] + dt * csel[..., 3]))
    val = jnp.where(mask_b[None], val, 0.0)
    return jnp.sum(val)


if __name__ == "__main__":
    B, L = 2, 16
    key = jax.random.PRNGKey(0)
    k_pred, k_ca, k_n, k_cb = jax.random.split(key, 4)

    # synthetic predicted theta distribution: (L, L, NBINS + 1), last channel = "no contact"
    pred_theta = np.asarray(jax.nn.softmax(
        2.0 * jax.random.normal(k_pred, (L, L, NBINS + 1)), axis=-1), dtype=np.float64)

    # __init__ semantics
    mask_np = (np.eye(L) == 0) & (pred_theta[:, :, -1] < THETA_CUT)
    cutoffs = np.linspace(-math.pi + 0.5 * STEP, math.pi + 0.5 * STEP, NBINS + 1)
    ref_bg = -np.log(BG_THETA)
    y = -np.log(pred_theta[:, :, :-1] + EPS) - ref_bg
    y = np.concatenate([y, y[:, :, :1]], axis=-1)               # periodic closure
    coeff4 = periodic_cubic_spline(cutoffs, y)                  # (L, L, NBINS, 4)
    coeff_lin = np.ascontiguousarray(
        np.transpose(coeff4, (2, 3, 0, 1)).reshape(NBINS * 4, L, L)).astype(np.float32)

    # synthetic coordinates (B, L, 3)
    CA = 3.0 * jax.random.normal(k_ca, (B, L, 3), dtype=jnp.float32)
    N = CA + 1.5 * jax.random.normal(k_n, (B, L, 3), dtype=jnp.float32)
    CB = CA + 1.5 * jax.random.normal(k_cb, (B, L, 3), dtype=jnp.float32)

    mask_f = jnp.asarray(mask_np.astype(np.float32))
    coeff_lin_bf16 = jnp.asarray(coeff_lin, dtype=jnp.bfloat16)   # bf16 coeff storage

    out = theta_restraint_forward(N, CA, CB, mask_f, coeff_lin_bf16)
    got = jax.block_until_ready(out["pairwise_theta"])

    ref = reference_forward(N, CA, CB, jnp.asarray(mask_np),
                            jnp.asarray(coeff4, dtype=jnp.float32),
                            jnp.asarray(cutoffs, dtype=jnp.float32))
    ref = float(jax.block_until_ready(ref))

    assert abs(float(got) - ref) <= 2e-2 * (1.0 + abs(ref)), (float(got), ref)
    print("KERNEL_OK")
</pallas_src>

<mosaic_0001>
module attributes {stable_mosaic.version = 11 : i64} {
  func.func @theta_kernel(%arg0: i32, %arg1: i32, %arg2: i32, %arg3: memref<4x1xi32, #tpu.memory_space<smem>>, %arg4: memref<1x32x8xf32, #tpu.memory_space<vmem>>, %arg5: memref<1x3x128xf32, #tpu.memory_space<vmem>>, %arg6: memref<96x32x128xbf16, #tpu.memory_space<vmem>>, %arg7: memref<32x128xf32, #tpu.memory_space<vmem>>, %arg8: memref<1x8x128xf32, #tpu.memory_space<vmem>>, %arg9: memref<32x128xf32, #tpu.memory_space<vmem>>) attributes {dimension_semantics = [#tpu.dimension_semantics<parallel>, #tpu.dimension_semantics<arbitrary>, #tpu.dimension_semantics<arbitrary>], iteration_bounds = array<i64: 4, 1, 2>, scalar_prefetch = 1 : i64, scratch_operands = 1 : i64, tpu.core_type = #tpu.core_type<tc>, window_params = [{transform_indices = @transform_0, window_bounds = array<i64: 1, 32, 8>}, {transform_indices = @transform_1, window_bounds = array<i64: 1, 3, 128>}, {transform_indices = @transform_2, window_bounds = array<i64: 96, 32, 128>}, {transform_indices = @transform_3, window_bounds = array<i64: 32, 128>}, {transform_indices = @transform_4, window_bounds = array<i64: 1, 8, 128>}]} {
    %c0_i32 = arith.constant 0 : i32
    %0 = arith.cmpi eq, %arg1, %c0_i32 : i32
    %c0_i32_0 = arith.constant 0 : i32
    %1 = arith.cmpi eq, %arg2, %c0_i32_0 : i32
    %2 = arith.andi %0, %1 : i1
    %3 = arith.extui %2 : i1 to i32
    %c0_i32_1 = arith.constant 0 : i32
    %4 = arith.cmpi ne, %3, %c0_i32_1 : i32
    scf.if %4 {
      %cst = arith.constant 0.000000e+00 : f32
      %16 = vector.broadcast %cst : f32 to vector<32x128xf32>
      %c0 = arith.constant 0 : index
      %c0_6 = arith.constant 0 : index
      %17 = vector.load %arg9[%c0, %c0_6] : memref<32x128xf32, #tpu.memory_space<vmem>>, vector<32x128xf32>
      tpu.vector_store %arg9[%c0, %c0_6], %16 {strides = array<i32>} : memref<32x128xf32, #tpu.memory_space<vmem>>, vector<32x128xf32>,
    } else {
    }
    %5 = arith.index_cast %arg0 : i32 to index
    %6 = arith.index_cast %arg1 : i32 to index
    %7 = memref.load %arg3[%5, %6] : memref<4x1xi32, #tpu.memory_space<smem>>
    %c0_i32_2 = arith.constant 0 : i32
    %8 = arith.cmpi sgt, %7, %c0_i32_2 : i32
    %9 = arith.extui %8 : i1 to i32
    %c0_i32_3 = arith.constant 0 : i32
    %10 = arith.cmpi ne, %9, %c0_i32_3 : i32
    scf.if %10 {
      %c0 = arith.constant 0 : index
      %c0_6 = arith.constant 0 : index
      %c0_7 = arith.constant 0 : index
      %16 = vector.load %arg4[%c0, %c0_6, %c0_7] : memref<1x32x8xf32, #tpu.memory_space<vmem>>, vector<1x32x8xf32>
      %17 = vector.shape_cast %16 : vector<1x32x8xf32> to vector<32x8xf32>
      %c0_8 = arith.constant 0 : index
      %c0_9 = arith.constant 0 : index
      %c0_10 = arith.constant 0 : index
      %18 = vector.load %arg5[%c0_8, %c0_9, %c0_10] : memref<1x3x128xf32, #tpu.memory_space<vmem>>, vector<1x3x128xf32>
      %19 = vector.shape_cast %18 : vector<1x3x128xf32> to vector<3x128xf32>
      %20 = vector.extract_strided_slice %19 {offsets = [0, 0], sizes = [1, 128], strides = [1, 1]} : vector<3x128xf32> to vector<1x128xf32>
      %21 = vector.extract_strided_slice %19 {offsets = [1, 0], sizes = [1, 128], strides = [1, 1]} : vector<3x128xf32> to vector<1x128xf32>
      %22 = vector.extract_strided_slice %19 {offsets = [2, 0], sizes = [1, 128], strides = [1, 1]} : vector<3x128xf32> to vector<1x128xf32>
      %23 = vector.extract_strided_slice %17 {offsets = [0, 0], sizes = [32, 1], strides = [1, 1]} : vector<32x8xf32> to vector<32x1xf32>
      %24 = vector.broadcast %23 : vector<32x1xf32> to vector<32x128xf32>
      %25 = vector.broadcast %20 : vector<1x128xf32> to vector<32x128xf32>
      %26 = arith.mulf %24, %25 : vector<32x128xf32>
      %27 = vector.extract_strided_slice %17 {offsets = [0, 1], sizes = [32, 1], strides = [1, 1]} : vector<32x8xf32> to vector<32x1xf32>
      %28 = vector.broadcast %27 : vector<32x1xf32> to vector<32x128xf32>
      %29 = vector.broadcast %21 : vector<1x128xf32> to vector<32x128xf32>
      %30 = arith.mulf %28, %29 : vector<32x128xf32>
      %31 = arith.addf %26, %30 : vector<32x128xf32>
      %32 = vector.extract_strided_slice %17 {offsets = [0, 2], sizes = [32, 1], strides = [1, 1]} : vector<32x8xf32> to vector<32x1xf32>
      %33 = vector.broadcast %32 : vector<32x1xf32> to vector<32x128xf32>
      %34 = vector.broadcast %22 : vector<1x128xf32> to vector<32x128xf32>
      %35 = arith.mulf %33, %34 : vector<32x128xf32>
      %36 = arith.addf %31, %35 : vector<32x128xf32>
      %37 = vector.extract_strided_slice %17 {offsets = [0, 6], sizes = [32, 1], strides = [1, 1]} : vector<32x8xf32> to vector<32x1xf32>
      %38 = vector.broadcast %37 : vector<32x1xf32> to vector<32x128xf32>
      %39 = arith.subf %36, %38 : vector<32x128xf32>
      %40 = vector.extract_strided_slice %17 {offsets = [0, 3], sizes = [32, 1], strides = [1, 1]} : vector<32x8xf32> to vector<32x1xf32>
      %41 = vector.broadcast %40 : vector<32x1xf32> to vector<32x128xf32>
      %42 = vector.broadcast %20 : vector<1x128xf32> to vector<32x128xf32>
      %43 = arith.mulf %41, %42 : vector<32x128xf32>
      %44 = vector.extract_strided_slice %17 {offsets = [0, 4], sizes = [32, 1], strides = [1, 1]} : vector<32x8xf32> to vector<32x1xf32>
      %45 = vector.broadcast %44 : vector<32x1xf32> to vector<32x128xf32>
      %46 = vector.broadcast %21 : vector<1x128xf32> to vector<32x128xf32>
      %47 = arith.mulf %45, %46 : vector<32x128xf32>
      %48 = arith.addf %43, %47 : vector<32x128xf32>
      %49 = vector.extract_strided_slice %17 {offsets = [0, 5], sizes = [32, 1], strides = [1, 1]} : vector<32x8xf32> to vector<32x1xf32>
      %50 = vector.broadcast %49 : vector<32x1xf32> to vector<32x128xf32>
      %51 = vector.broadcast %22 : vector<1x128xf32> to vector<32x128xf32>
      %52 = arith.mulf %50, %51 : vector<32x128xf32>
      %53 = arith.addf %48, %52 : vector<32x128xf32>
      %54 = vector.extract_strided_slice %17 {offsets = [0, 7], sizes = [32, 1], strides = [1, 1]} : vector<32x8xf32> to vector<32x1xf32>
      %55 = vector.broadcast %54 : vector<32x1xf32> to vector<32x128xf32>
      %56 = arith.subf %53, %55 : vector<32x128xf32>
      %cst = arith.constant 0.000000e+00 : f32
      %57 = vector.broadcast %cst : f32 to vector<32x128xf32>
      %58 = arith.cmpf oeq, %39, %57 : vector<32x128xf32>
      %cst_11 = arith.constant 1.000000e+00 : f32
      %59 = vector.broadcast %cst_11 : f32 to vector<32x128xf32>
      %60 = arith.select %58, %59, %39 : vector<32x128xi1>, vector<32x128xf32>
      %61 = tpu.reciprocal %60 {approx = true} : vector<32x128xf32> -> vector<32x128xf32>
      %62 = arith.mulf %56, %61 : vector<32x128xf32>
      %63 = math.absf %62 : vector<32x128xf32>
      %cst_12 = arith.constant 2.41421366 : f32
      %64 = vector.broadcast %cst_12 : f32 to vector<32x128xf32>
      %65 = arith.cmpf ogt, %63, %64 : vector<32x128xf32>
      %cst_13 = arith.constant 0.414213568 : f32
      %66 = vector.broadcast %cst_13 : f32 to vector<32x128xf32>
      %67 = arith.cmpf ogt, %63, %66 : vector<32x128xf32>
      %cst_14 = arith.constant 1.000000e-30 : f32
      %68 = vector.broadcast %cst_14 : f32 to vector<32x128xf32>
      %69 = arith.maximumf %63, %68 : vector<32x128xf32>
      %70 = tpu.reciprocal %69 {approx = true} : vector<32x128xf32> -> vector<32x128xf32>
      %cst_15 = arith.constant 1.000000e+00 : f32
      %71 = vector.broadcast %cst_15 : f32 to vector<32x128xf32>
      %72 = arith.addf %63, %71 : vector<32x128xf32>
      %73 = tpu.reciprocal %72 {approx = true} : vector<32x128xf32> -> vector<32x128xf32>
      %cst_16 = arith.constant 0.000000e+00 : f32
      %74 = vector.broadcast %cst_16 : f32 to vector<32x128xf32>
      %75 = arith.subf %74, %70 : vector<32x128xf32>
      %cst_17 = arith.constant 1.000000e+00 : f32
      %76 = vector.broadcast %cst_17 : f32 to vector<32x128xf32>
      %77 = arith.subf %63, %76 : vector<32x128xf32>
      %78 = arith.mulf %77, %73 : vector<32x128xf32>
      %79 = arith.select %67, %78, %63 : vector<32x128xi1>, vector<32x128xf32>
      %80 = arith.select %65, %75, %79 : vector<32x128xi1>, vector<32x128xf32>
      %81 = arith.mulf %80, %80 : vector<32x128xf32>
      %cst_18 = arith.constant 0.0805374458 : f32
      %82 = vector.broadcast %cst_18 : f32 to vector<32x128xf32>
      %83 = arith.mulf %82, %81 : vector<32x128xf32>
      %cst_19 = arith.constant 0.138776854 : f32
      %84 = vector.broadcast %cst_19 : f32 to vector<32x128xf32>
      %85 = arith.subf %83, %84 : vector<32x128xf32>
      %86 = arith.mulf %85, %81 : vector<32x128xf32>
      %cst_20 = arith.constant 0.199777111 : f32
      %87 = vector.broadcast %cst_20 : f32 to vector<32x128xf32>
      %88 = arith.addf %86, %87 : vector<32x128xf32>
      %89 = arith.mulf %88, %81 : vector<32x128xf32>
      %cst_21 = arith.constant 0.333329499 : f32
      %90 = vector.broadcast %cst_21 : f32 to vector<32x128xf32>
      %91 = arith.subf %89, %90 : vector<32x128xf32>
      %92 = arith.mulf %91, %81 : vector<32x128xf32>
      %93 = arith.mulf %92, %80 : vector<32x128xf32>
      %94 = arith.addf %93, %80 : vector<32x128xf32>
      %cst_22 = arith.constant 0.785398185 : f32
      %cst_23 = arith.constant 0.000000e+00 : f32
      %95 = vector.broadcast %cst_22 : f32 to vector<32x128xf32>
      %96 = vector.broadcast %cst_23 : f32 to vector<32x128xf32>
      %97 = arith.select %67, %95, %96 : vector<32x128xi1>, vector<32x128xf32>
      %cst_24 = arith.constant 1.57079637 : f32
      %98 = vector.broadcast %cst_24 : f32 to vector<32x128xf32>
      %99 = arith.select %65, %98, %97 : vector<32x128xi1>, vector<32x128xf32>
      %100 = arith.addf %94, %99 : vector<32x128xf32>
      %cst_25 = arith.constant 0.000000e+00 : f32
      %101 = vector.broadcast %cst_25 : f32 to vector<32x128xf32>
      %102 = arith.cmpf olt, %62, %101 : vector<32x128xf32>
      %cst_26 = arith.constant 0.000000e+00 : f32
      %103 = vector.broadcast %cst_26 : f32 to vector<32x128xf32>
      %104 = arith.subf %103, %100 : vector<32x128xf32>
      %105 = arith.select %102, %104, %100 : vector<32x128xi1>, vector<32x128xf32>
      %cst_27 = arith.constant 0.000000e+00 : f32
      %106 = vector.broadcast %cst_27 : f32 to vector<32x128xf32>
      %107 = arith.cmpf oge, %56, %106 : vector<32x128xf32>
      %cst_28 = arith.constant 3.14159274 : f32
      %cst_29 = arith.constant -3.14159274 : f32
      %108 = vector.broadcast %cst_28 : f32 to vector<32x128xf32>
      %109 = vector.broadcast %cst_29 : f32 to vector<32x128xf32>
      %110 = arith.select %107, %108, %109 : vector<32x128xi1>, vector<32x128xf32>
      %cst_30 = arith.constant 0.000000e+00 : f32
      %111 = vector.broadcast %cst_30 : f32 to vector<32x128xf32>
      %112 = arith.cmpf olt, %39, %111 : vector<32x128xf32>
      %113 = arith.addf %105, %110 : vector<32x128xf32>
      %114 = arith.select %112, %113, %105 : vector<32x128xi1>, vector<32x128xf32>
      %cst_31 = arith.constant 0.000000e+00 : f32
      %115 = vector.broadcast %cst_31 : f32 to vector<32x128xf32>
      %116 = arith.cmpf oeq, %39, %115 : vector<32x128xf32>
      %cst_32 = arith.constant 0.000000e+00 : f32
      %117 = vector.broadcast %cst_32 : f32 to vector<32x128xf32>
      %118 = arith.cmpf ogt, %56, %117 : vector<32x128xf32>
      %cst_33 = arith.constant 0.000000e+00 : f32
      %119 = vector.broadcast %cst_33 : f32 to vector<32x128xf32>
      %120 = arith.cmpf olt, %56, %119 : vector<32x128xf32>
      %cst_34 = arith.constant -1.57079637 : f32
      %cst_35 = arith.constant 0.000000e+00 : f32
      %121 = vector.broadcast %cst_34 : f32 to vector<32x128xf32>
      %122 = vector.broadcast %cst_35 : f32 to vector<32x128xf32>
      %123 = arith.select %120, %121, %122 : vector<32x128xi1>, vector<32x128xf32>
      %cst_36 = arith.constant 1.57079637 : f32
      %124 = vector.broadcast %cst_36 : f32 to vector<32x128xf32>
      %125 = arith.select %118, %124, %123 : vector<32x128xi1>, vector<32x128xf32>
      %126 = arith.select %116, %125, %114 : vector<32x128xi1>, vector<32x128xf32>
      %cst_37 = arith.constant -3.01069307 : f32
      %127 = vector.broadcast %cst_37 : f32 to vector<32x128xf32>
      %128 = arith.cmpf olt, %126, %127 : vector<32x128xf32>
      %cst_38 = arith.constant 6.28318548 : f32
      %129 = vector.broadcast %cst_38 : f32 to vector<32x128xf32>
      %130 = arith.addf %126, %129 : vector<32x128xf32>
      %131 = arith.select %128, %130, %126 : vector<32x128xi1>, vector<32x128xf32>
      %cst_39 = arith.constant -3.01069307 : f32
      %132 = vector.broadcast %cst_39 : f32 to vector<32x128xf32>
      %133 = arith.subf %131, %132 : vector<32x128xf32>
      %cst_40 = arith.constant 3.8197186 : f32
      %134 = vector.broadcast %cst_40 : f32 to vector<32x128xf32>
      %135 = arith.mulf %133, %134 : vector<32x128xf32>
      %136 = math.floor %135 : vector<32x128xf32>
      %cst_41 = arith.constant 0.000000e+00 : f32
      %cst_42 = arith.constant 2.300000e+01 : f32
      %137 = vector.broadcast %cst_41 : f32 to vector<32x128xf32>
      %138 = arith.maximumf %137, %136 : vector<32x128xf32>
      %139 = vector.broadcast %cst_42 : f32 to vector<32x128xf32>
      %140 = arith.minimumf %139, %138 : vector<32x128xf32>
      %cst_43 = arith.constant 0.261799395 : f32
      %141 = vector.broadcast %cst_43 : f32 to vector<32x128xf32>
      %142 = arith.mulf %140, %141 : vector<32x128xf32>
      %cst_44 = arith.constant -3.01069307 : f32
      %143 = vector.broadcast %cst_44 : f32 to vector<32x128xf32>
      %144 = arith.addf %143, %142 : vector<32x128xf32>
      %145 = arith.subf %131, %144 : vector<32x128xf32>
      %cst_45 = arith.constant 0.000000e+00 : bf16
      %146 = vector.broadcast %cst_45 : bf16 to vector<32x128xbf16>
      %cst_46 = arith.constant 0.000000e+00 : f32
      %147 = vector.broadcast %cst_46 : f32 to vector<32x128xf32>
      %148 = arith.cmpf oeq, %140, %147 : vector<32x128xf32>
      %c0_47 = arith.constant 0 : index
      %c0_48 = arith.constant 0 : index
      %c0_49 = arith.constant 0 : index
      %149 = vector.load %arg6[%c0_47, %c0_48, %c0_49] : memref<96x32x128xbf16, #tpu.memory_space<vmem>>, vector<1x32x128xbf16>
      %150 = vector.shape_cast %149 : vector<1x32x128xbf16> to vector<32x128xbf16>
      %151 = arith.select %148, %150, %146 : vector<32x128xi1>, vector<32x128xbf16>
      %c1 = arith.constant 1 : index
      %c0_50 = arith.constant 0 : index
      %c0_51 = arith.constant 0 : index
      %152 = vector.load %arg6[%c1, %c0_50, %c0_51] : memref<96x32x128xbf16, #tpu.memory_space<vmem>>, vector<1x32x128xbf16>
      %153 = vector.shape_cast %152 : vector<1x32x128xbf16> to vector<32x128xbf16>
      %154 = arith.select %148, %153, %146 : vector<32x128xi1>, vector<32x128xbf16>
      %c2 = arith.constant 2 : index
      %c0_52 = arith.constant 0 : index
      %c0_53 = arith.constant 0 : index
      %155 = vector.load %arg6[%c2, %c0_52, %c0_53] : memref<96x32x128xbf16, #tpu.memory_space<vmem>>, vector<1x32x128xbf16>
      %156 = vector.shape_cast %155 : vector<1x32x128xbf16> to vector<32x128xbf16>
      %157 = arith.select %148, %156, %146 : vector<32x128xi1>, vector<32x128xbf16>
      %c3 = arith.constant 3 : index
      %c0_54 = arith.constant 0 : index
      %c0_55 = arith.constant 0 : index
      %158 = vector.load %arg6[%c3, %c0_54, %c0_55] : memref<96x32x128xbf16, #tpu.memory_space<vmem>>, vector<1x32x128xbf16>
      %159 = vector.shape_cast %158 : vector<1x32x128xbf16> to vector<32x128xbf16>
      %160 = arith.select %148, %159, %146 : vector<32x128xi1>, vector<32x128xbf16>
      %cst_56 = arith.constant 1.000000e+00 : f32
      %161 = vector.broadcast %cst_56 : f32 to vector<32x128xf32>
      %162 = arith.cmpf oeq, %140, %161 : vector<32x128xf32>
      %c4 = arith.constant 4 : index
      %c0_57 = arith.constant 0 : index
      %c0_58 = arith.constant 0 : index
      %163 = vector.load %arg6[%c4, %c0_57, %c0_58] : memref<96x32x128xbf16, #tpu.memory_space<vmem>>, vector<1x32x128xbf16>
      %164 = vector.shape_cast %163 : vector<1x32x128xbf16> to vector<32x128xbf16>
      %165 = arith.select %162, %164, %151 : vector<32x128xi1>, vector<32x128xbf16>
      %c5 = arith.constant 5 : index
      %c0_59 = arith.constant 0 : index
      %c0_60 = arith.constant 0 : index
      %166 = vector.load %arg6[%c5, %c0_59, %c0_60] : memref<96x32x128xbf16, #tpu.memory_space<vmem>>, vector<1x32x128xbf16>
      %167 = vector.shape_cast %166 : vector<1x32x128xbf16> to vector<32x128xbf16>
      %168 = arith.select %162, %167, %154 : vector<32x128xi1>, vector<32x128xbf16>
      %c6 = arith.constant 6 : index
      %c0_61 = arith.constant 0 : index
      %c0_62 = arith.constant 0 : index
      %169 = vector.load %arg6[%c6, %c0_61, %c0_62] : memref<96x32x128xbf16, #tpu.memory_space<vmem>>, vector<1x32x128xbf16>
      %170 = vector.shape_cast %169 : vector<1x32x128xbf16> to vector<32x128xbf16>
      %171 = arith.select %162, %170, %157 : vector<32x128xi1>, vector<32x128xbf16>
      %c7 = arith.constant 7 : index
      %c0_63 = arith.constant 0 : index
      %c0_64 = arith.constant 0 : index
      %172 = vector.load %arg6[%c7, %c0_63, %c0_64] : memref<96x32x128xbf16, #tpu.memory_space<vmem>>, vector<1x32x128xbf16>
      %173 = vector.shape_cast %172 : vector<1x32x128xbf16> to vector<32x128xbf16>
      %174 = arith.select %162, %173, %160 : vector<32x128xi1>, vector<32x128xbf16>
      %cst_65 = arith.constant 2.000000e+00 : f32
      %175 = vector.broadcast %cst_65 : f32 to vector<32x128xf32>
      %176 = arith.cmpf oeq, %140, %175 : vector<32x128xf32>
      %c8 = arith.constant 8 : index
      %c0_66 = arith.constant 0 : index
      %c0_67 = arith.constant 0 : index
      %177 = vector.load %arg6[%c8, %c0_66, %c0_67] : memref<96x32x128xbf16, #tpu.memory_space<vmem>>, vector<1x32x128xbf16>
      %178 = vector.shape_cast %177 : vector<1x32x128xbf16> to vector<32x128xbf16>
      %179 = arith.select %176, %178, %165 : vector<32x128xi1>, vector<32x128xbf16>
      %c9 = arith.constant 9 : index
      %c0_68 = arith.constant 0 : index
      %c0_69 = arith.constant 0 : index
      %180 = vector.load %arg6[%c9, %c0_68, %c0_69] : memref<96x32x128xbf16, #tpu.memory_space<vmem>>, vector<1x32x128xbf16>
      %181 = vector.shape_cast %180 : vector<1x32x128xbf16> to vector<32x128xbf16>
      %182 = arith.select %176, %181, %168 : vector<32x128xi1>, vector<32x128xbf16>
      %c10 = arith.constant 10 : index
      %c0_70 = arith.constant 0 : index
      %c0_71 = arith.constant 0 : index
      %183 = vector.load %arg6[%c10, %c0_70, %c0_71] : memref<96x32x128xbf16, #tpu.memory_space<vmem>>, vector<1x32x128xbf16>
      %184 = vector.shape_cast %183 : vector<1x32x128xbf16> to vector<32x128xbf16>
      %185 = arith.select %176, %184, %171 : vector<32x128xi1>, vector<32x128xbf16>
      %c11 = arith.constant 11 : index
      %c0_72 = arith.constant 0 : index
      %c0_73 = arith.constant 0 : index
      %186 = vector.load %arg6[%c11, %c0_72, %c0_73] : memref<96x32x128xbf16, #tpu.memory_space<vmem>>, vector<1x32x128xbf16>
      %187 = vector.shape_cast %186 : vector<1x32x128xbf16> to vector<32x128xbf16>
      %188 = arith.select %176, %187, %174 : vector<32x128xi1>, vector<32x128xbf16>
      %cst_74 = arith.constant 3.000000e+00 : f32
      %189 = vector.broadcast %cst_74 : f32 to vector<32x128xf32>
      %190 = arith.cmpf oeq, %140, %189 : vector<32x128xf32>
      %c12 = arith.constant 12 : index
      %c0_75 = arith.constant 0 : index
      %c0_76 = arith.constant 0 : index
      %191 = vector.load %arg6[%c12, %c0_75, %c0_76] : memref<96x32x128xbf16, #tpu.memory_space<vmem>>, vector<1x32x128xbf16>
      %192 = vector.shape_cast %191 : vector<1x32x128xbf16> to vector<32x128xbf16>
      %193 = arith.select %190, %192, %179 : vector<32x128xi1>, vector<32x128xbf16>
      %c13 = arith.constant 13 : index
      %c0_77 = arith.constant 0 : index
      %c0_78 = arith.constant 0 : index
      %194 = vector.load %arg6[%c13, %c0_77, %c0_78] : memref<96x32x128xbf16, #tpu.memory_space<vmem>>, vector<1x32x128xbf16>
      %195 = vector.shape_cast %194 : vector<1x32x128xbf16> to vector<32x128xbf16>
      %196 = arith.select %190, %195, %182 : vector<32x128xi1>, vector<32x128xbf16>
      %c14 = arith.constant 14 : index
      %c0_79 = arith.constant 0 : index
      %c0_80 = arith.constant 0 : index
      %197 = vector.load %arg6[%c14, %c0_79, %c0_80] : memref<96x32x128xbf16, #tpu.memory_space<vmem>>, vector<1x32x128xbf16>
      %198 = vector.shape_cast %197 : vector<1x32x128xbf16> to vector<32x128xbf16>
      %199 = arith.select %190, %198, %185 : vector<32x128xi1>, vector<32x128xbf16>
      %c15 = arith.constant 15 : index
      %c0_81 = arith.constant 0 : index
      %c0_82 = arith.constant 0 : index
      %200 = vector.load %arg6[%c15, %c0_81, %c0_82] : memref<96x32x128xbf16, #tpu.memory_space<vmem>>, vector<1x32x128xbf16>
      %201 = vector.shape_cast %200 : vector<1x32x128xbf16> to vector<32x128xbf16>
      %202 = arith.select %190, %201, %188 : vector<32x128xi1>, vector<32x128xbf16>
      %cst_83 = arith.constant 4.000000e+00 : f32
      %203 = vector.broadcast %cst_83 : f32 to vector<32x128xf32>
      %204 = arith.cmpf oeq, %140, %203 : vector<32x128xf32>
      %c16 = arith.constant 16 : index
      %c0_84 = arith.constant 0 : index
      %c0_85 = arith.constant 0 : index
      %205 = vector.load %arg6[%c16, %c0_84, %c0_85] : memref<96x32x128xbf16, #tpu.memory_space<vmem>>, vector<1x32x128xbf16>
      %206 = vector.shape_cast %205 : vector<1x32x128xbf16> to vector<32x128xbf16>
      %207 = arith.select %204, %206, %193 : vector<32x128xi1>, vector<32x128xbf16>
      %c17 = arith.constant 17 : index
      %c0_86 = arith.constant 0 : index
      %c0_87 = arith.constant 0 : index
      %208 = vector.load %arg6[%c17, %c0_86, %c0_87] : memref<96x32x128xbf16, #tpu.memory_space<vmem>>, vector<1x32x128xbf16>
      %209 = vector.shape_cast %208 : vector<1x32x128xbf16> to vector<32x128xbf16>
      %210 = arith.select %204, %209, %196 : vector<32x128xi1>, vector<32x128xbf16>
      %c18 = arith.constant 18 : index
      %c0_88 = arith.constant 0 : index
      %c0_89 = arith.constant 0 : index
      %211 = vector.load %arg6[%c18, %c0_88, %c0_89] : memref<96x32x128xbf16, #tpu.memory_space<vmem>>, vector<1x32x128xbf16>
      %212 = vector.shape_cast %211 : vector<1x32x128xbf16> to vector<32x128xbf16>
      %213 = arith.select %204, %212, %199 : vector<32x128xi1>, vector<32x128xbf16>
      %c19 = arith.constant 19 : index
      %c0_90 = arith.constant 0 : index
      %c0_91 = arith.constant 0 : index
      %214 = vector.load %arg6[%c19, %c0_90, %c0_91] : memref<96x32x128xbf16, #tpu.memory_space<vmem>>, vector<1x32x128xbf16>
      %215 = vector.shape_cast %214 : vector<1x32x128xbf16> to vector<32x128xbf16>
      %216 = arith.select %204, %215, %202 : vector<32x128xi1>, vector<32x128xbf16>
      %cst_92 = arith.constant 5.000000e+00 : f32
      %217 = vector.broadcast %cst_92 : f32 to vector<32x128xf32>
      %218 = arith.cmpf oeq, %140, %217 : vector<32x128xf32>
      %c20 = arith.constant 20 : index
      %c0_93 = arith.constant 0 : index
      %c0_94 = arith.constant 0 : index
      %219 = vector.load %arg6[%c20, %c0_93, %c0_94] : memref<96x32x128xbf16, #tpu.memory_space<vmem>>, vector<1x32x128xbf16>
      %220 = vector.shape_cast %219 : vector<1x32x128xbf16> to vector<32x128xbf16>
      %221 = arith.select %218, %220, %207 : vector<32x128xi1>, vector<32x128xbf16>
      %c21 = arith.constant 21 : index
      %c0_95 = arith.constant 0 : index
      %c0_96 = arith.constant 0 : index
      %222 = vector.load %arg6[%c21, %c0_95, %c0_96] : memref<96x32x128xbf16, #tpu.memory_space<vmem>>, vector<1x32x128xbf16>
      %223 = vector.shape_cast %222 : vector<1x32x128xbf16> to vector<32x128xbf16>
      %224 = arith.select %218, %223, %210 : vector<32x128xi1>, vector<32x128xbf16>
      %c22 = arith.constant 22 : index
      %c0_97 = arith.constant 0 : index
      %c0_98 = arith.constant 0 : index
      %225 = vector.load %arg6[%c22, %c0_97, %c0_98] : memref<96x32x128xbf16, #tpu.memory_space<vmem>>, vector<1x32x128xbf16>
      %226 = vector.shape_cast %225 : vector<1x32x128xbf16> to vector<32x128xbf16>
      %227 = arith.select %218, %226, %213 : vector<32x128xi1>, vector<32x128xbf16>
      %c23 = arith.constant 23 : index
      %c0_99 = arith.constant 0 : index
      %c0_100 = arith.constant 0 : index
      %228 = vector.load %arg6[%c23, %c0_99, %c0_100] : memref<96x32x128xbf16, #tpu.memory_space<vmem>>, vector<1x32x128xbf16>
      %229 = vector.shape_cast %228 : vector<1x32x128xbf16> to vector<32x128xbf16>
      %230 = arith.select %218, %229, %216 : vector<32x128xi1>, vector<32x128xbf16>
      %cst_101 = arith.constant 6.000000e+00 : f32
      %231 = vector.broadcast %cst_101 : f32 to vector<32x128xf32>
      %232 = arith.cmpf oeq, %140, %231 : vector<32x128xf32>
      %c24 = arith.constant 24 : index
      %c0_102 = arith.constant 0 : index
      %c0_103 = arith.constant 0 : index
      %233 = vector.load %arg6[%c24, %c0_102, %c0_103] : memref<96x32x128xbf16, #tpu.memory_space<vmem>>, vector<1x32x128xbf16>
      %234 = vector.shape_cast %233 : vector<1x32x128xbf16> to vector<32x128xbf16>
      %235 = arith.select %232, %234, %221 : vector<32x128xi1>, vector<32x128xbf16>
      %c25 = arith.constant 25 : index
      %c0_104 = arith.constant 0 : index
      %c0_105 = arith.constant 0 : index
      %236 = vector.load %arg6[%c25, %c0_104, %c0_105] : memref<96x32x128xbf16, #tpu.memory_space<vmem>>, vector<1x32x128xbf16>
      %237 = vector.shape_cast %236 : vector<1x32x128xbf16> to vector<32x128xbf16>
      %238 = arith.select %232, %237, %224 : vector<32x128xi1>, vector<32x128xbf16>
      %c26 = arith.constant 26 : index
      %c0_106 = arith.constant 0 : index
      %c0_107 = arith.constant 0 : index
      %239 = vector.load %arg6[%c26, %c0_106, %c0_107] : memref<96x32x128xbf16, #tpu.memory_space<vmem>>, vector<1x32x128xbf16>
      %240 = vector.shape_cast %239 : vector<1x32x128xbf16> to vector<32x128xbf16>
      %241 = arith.select %232, %240, %227 : vector<32x128xi1>, vector<32x128xbf16>
      %c27 = arith.constant 27 : index
      %c0_108 = arith.constant 0 : index
      %c0_109 = arith.constant 0 : index
      %242 = vector.load %arg6[%c27, %c0_108, %c0_109] : memref<96x32x128xbf16, #tpu.memory_space<vmem>>, vector<1x32x128xbf16>
      %243 = vector.shape_cast %242 : vector<1x32x128xbf16> to vector<32x128xbf16>
      %244 = arith.select %232, %243, %230 : vector<32x128xi1>, vector<32x128xbf16>
      %cst_110 = arith.constant 7.000000e+00 : f32
      %245 = vector.broadcast %cst_110 : f32 to vector<32x128xf32>
      %246 = arith.cmpf oeq, %140, %245 : vector<32x128xf32>
      %c28 = arith.constant 28 : index
      %c0_111 = arith.constant 0 : index
      %c0_112 = arith.constant 0 : index
      %247 = vector.load %arg6[%c28, %c0_111, %c0_112] : memref<96x32x128xbf16, #tpu.memory_space<vmem>>, vector<1x32x128xbf16>
      %248 = vector.shape_cast %247 : vector<1x32x128xbf16> to vector<32x128xbf16>
      %249 = arith.select %246, %248, %235 : vector<32x128xi1>, vector<32x128xbf16>
      %c29 = arith.constant 29 : index
      %c0_113 = arith.constant 0 : index
      %c0_114 = arith.constant 0 : index
      %250 = vector.load %arg6[%c29, %c0_113, %c0_114] : memref<96x32x128xbf16, #tpu.memory_space<vmem>>, vector<1x32x128xbf16>
      %251 = vector.shape_cast %250 : vector<1x32x128xbf16> to vector<32x128xbf16>
      %252 = arith.select %246, %251, %238 : vector<32x128xi1>, vector<32x128xbf16>
      %c30 = arith.constant 30 : index
      %c0_115 = arith.constant 0 : index
      %c0_116 = arith.constant 0 : index
      %253 = vector.load %arg6[%c30, %c0_115, %c0_116] : memref<96x32x128xbf16, #tpu.memory_space<vmem>>, vector<1x32x128xbf16>
      %254 = vector.shape_cast %253 : vector<1x32x128xbf16> to vector<32x128xbf16>
      %255 = arith.select %246, %254, %241 : vector<32x128xi1>, vector<32x128xbf16>
      %c31 = arith.constant 31 : index
      %c0_117 = arith.constant 0 : index
      %c0_118 = arith.constant 0 : index
      %256 = vector.load %arg6[%c31, %c0_117, %c0_118] : memref<96x32x128xbf16, #tpu.memory_space<vmem>>, vector<1x32x128xbf16>
      %257 = vector.shape_cast %256 : vector<1x32x128xbf16> to vector<32x128xbf16>
      %258 = arith.select %246, %257, %244 : vector<32x128xi1>, vector<32x128xbf16>
      %cst_119 = arith.constant 8.000000e+00 : f32
      %259 = vector.broadcast %cst_119 : f32 to vector<32x128xf32>
      %260 = arith.cmpf oeq, %140, %259 : vector<32x128xf32>
      %c32 = arith.constant 32 : index
      %c0_120 = arith.constant 0 : index
      %c0_121 = arith.constant 0 : index
      %261 = vector.load %arg6[%c32, %c0_120, %c0_121] : memref<96x32x128xbf16, #tpu.memory_space<vmem>>, vector<1x32x128xbf16>
      %262 = vector.shape_cast %261 : vector<1x32x128xbf16> to vector<32x128xbf16>
      %263 = arith.select %260, %262, %249 : vector<32x128xi1>, vector<32x128xbf16>
      %c33 = arith.constant 33 : index
      %c0_122 = arith.constant 0 : index
      %c0_123 = arith.constant 0 : index
      %264 = vector.load %arg6[%c33, %c0_122, %c0_123] : memref<96x32x128xbf16, #tpu.memory_space<vmem>>, vector<1x32x128xbf16>
      %265 = vector.shape_cast %264 : vector<1x32x128xbf16> to vector<32x128xbf16>
      %266 = arith.select %260, %265, %252 : vector<32x128xi1>, vector<32x128xbf16>
      %c34 = arith.constant 34 : index
      %c0_124 = arith.constant 0 : index
      %c0_125 = arith.constant 0 : index
      %267 = vector.load %arg6[%c34, %c0_124, %c0_125] : memref<96x32x128xbf16, #tpu.memory_space<vmem>>, vector<1x32x128xbf16>
      %268 = vector.shape_cast %267 : vector<1x32x128xbf16> to vector<32x128xbf16>
      %269 = arith.select %260, %268, %255 : vector<32x128xi1>, vector<32x128xbf16>
      %c35 = arith.constant 35 : index
      %c0_126 = arith.constant 0 : index
      %c0_127 = arith.constant 0 : index
      %270 = vector.load %arg6[%c35, %c0_126, %c0_127] : memref<96x32x128xbf16, #tpu.memory_space<vmem>>, vector<1x32x128xbf16>
      %271 = vector.shape_cast %270 : vector<1x32x128xbf16> to vector<32x128xbf16>
      %272 = arith.select %260, %271, %258 : vector<32x128xi1>, vector<32x128xbf16>
      %cst_128 = arith.constant 9.000000e+00 : f32
      %273 = vector.broadcast %cst_128 : f32 to vector<32x128xf32>
      %274 = arith.cmpf oeq, %140, %273 : vector<32x128xf32>
      %c36 = arith.constant 36 : index
      %c0_129 = arith.constant 0 : index
      %c0_130 = arith.constant 0 : index
      %275 = vector.load %arg6[%c36, %c0_129, %c0_130] : memref<96x32x128xbf16, #tpu.memory_space<vmem>>, vector<1x32x128xbf16>
      %276 = vector.shape_cast %275 : vector<1x32x128xbf16> to vector<32x128xbf16>
      %277 = arith.select %274, %276, %263 : vector<32x128xi1>, vector<32x128xbf16>
      %c37 = arith.constant 37 : index
      %c0_131 = arith.constant 0 : index
      %c0_132 = arith.constant 0 : index
      %278 = vector.load %arg6[%c37, %c0_131, %c0_132] : memref<96x32x128xbf16, #tpu.memory_space<vmem>>, vector<1x32x128xbf16>
      %279 = vector.shape_cast %278 : vector<1x32x128xbf16> to vector<32x128xbf16>
      %280 = arith.select %274, %279, %266 : vector<32x128xi1>, vector<32x128xbf16>
      %c38 = arith.constant 38 : index
      %c0_133 = arith.constant 0 : index
      %c0_134 = arith.constant 0 : index
      %281 = vector.load %arg6[%c38, %c0_133, %c0_134] : memref<96x32x128xbf16, #tpu.memory_space<vmem>>, vector<1x32x128xbf16>
      %282 = vector.shape_cast %281 : vector<1x32x128xbf16> to vector<32x128xbf16>
      %283 = arith.select %274, %282, %269 : vector<32x128xi1>, vector<32x128xbf16>
      %c39 = arith.constant 39 : index
      %c0_135 = arith.constant 0 : index
      %c0_136 = arith.constant 0 : index
      %284 = vector.load %arg6[%c39, %c0_135, %c0_136] : memref<96x32x128xbf16, #tpu.memory_space<vmem>>, vector<1x32x128xbf16>
      %285 = vector.shape_cast %284 : vector<1x32x128xbf16> to vector<32x128xbf16>
      %286 = arith.select %274, %285, %272 : vector<32x128xi1>, vector<32x128xbf16>
      %cst_137 = arith.constant 1.000000e+01 : f32
      %287 = vector.broadcast %cst_137 : f32 to vector<32x128xf32>
      %288 = arith.cmpf oeq, %140, %287 : vector<32x128xf32>
      %c40 = arith.constant 40 : index
      %c0_138 = arith.constant 0 : index
      %c0_139 = arith.constant 0 : index
      %289 = vector.load %arg6[%c40, %c0_138, %c0_139] : memref<96x32x128xbf16, #tpu.memory_space<vmem>>, vector<1x32x128xbf16>
      %290 = vector.shape_cast %289 : vector<1x32x128xbf16> to vector<32x128xbf16>
      %291 = arith.select %288, %290, %277 : vector<32x128xi1>, vector<32x128xbf16>
      %c41 = arith.constant 41 : index
      %c0_140 = arith.constant 0 : index
      %c0_141 = arith.constant 0 : index
      %292 = vector.load %arg6[%c41, %c0_140, %c0_141] : memref<96x32x128xbf16, #tpu.memory_space<vmem>>, vector<1x32x128xbf16>
      %293 = vector.shape_cast %292 : vector<1x32x128xbf16> to vector<32x128xbf16>
      %294 = arith.select %288, %293, %280 : vector<32x128xi1>, vector<32x128xbf16>
      %c42 = arith.constant 42 : index
      %c0_142 = arith.constant 0 : index
      %c0_143 = arith.constant 0 : index
      %295 = vector.load %arg6[%c42, %c0_142, %c0_143] : memref<96x32x128xbf16, #tpu.memory_space<vmem>>, vector<1x32x128xbf16>
      %296 = vector.shape_cast %295 : vector<1x32x128xbf16> to vector<32x128xbf16>
      %297 = arith.select %288, %296, %283 : vector<32x128xi1>, vector<32x128xbf16>
      %c43 = arith.constant 43 : index
      %c0_144 = arith.constant 0 : index
      %c0_145 = arith.constant 0 : index
      %298 = vector.load %arg6[%c43, %c0_144, %c0_145] : memref<96x32x128xbf16, #tpu.memory_space<vmem>>, vector<1x32x128xbf16>
      %299 = vector.shape_cast %298 : vector<1x32x128xbf16> to vector<32x128xbf16>
      %300 = arith.select %288, %299, %286 : vector<32x128xi1>, vector<32x128xbf16>
      %cst_146 = arith.constant 1.100000e+01 : f32
      %301 = vector.broadcast %cst_146 : f32 to vector<32x128xf32>
      %302 = arith.cmpf oeq, %140, %301 : vector<32x128xf32>
      %c44 = arith.constant 44 : index
      %c0_147 = arith.constant 0 : index
      %c0_148 = arith.constant 0 : index
      %303 = vector.load %arg6[%c44, %c0_147, %c0_148] : memref<96x32x128xbf16, #tpu.memory_space<vmem>>, vector<1x32x128xbf16>
      %304 = vector.shape_cast %303 : vector<1x32x128xbf16> to vector<32x128xbf16>
      %305 = arith.select %302, %304, %291 : vector<32x128xi1>, vector<32x128xbf16>
      %c45 = arith.constant 45 : index
      %c0_149 = arith.constant 0 : index
      %c0_150 = arith.constant 0 : index
      %306 = vector.load %arg6[%c45, %c0_149, %c0_150] : memref<96x32x128xbf16, #tpu.memory_space<vmem>>, vector<1x32x128xbf16>
      %307 = vector.shape_cast %306 : vector<1x32x128xbf16> to vector<32x128xbf16>
      %308 = arith.select %302, %307, %294 : vector<32x128xi1>, vector<32x128xbf16>
      %c46 = arith.constant 46 : index
      %c0_151 = arith.constant 0 : index
      %c0_152 = arith.constant 0 : index
      %309 = vector.load %arg6[%c46, %c0_151, %c0_152] : memref<96x32x128xbf16, #tpu.memory_space<vmem>>, vector<1x32x128xbf16>
      %310 = vector.shape_cast %309 : vector<1x32x128xbf16> to vector<32x128xbf16>
      %311 = arith.select %302, %310, %297 : vector<32x128xi1>, vector<32x128xbf16>
      %c47 = arith.constant 47 : index
      %c0_153 = arith.constant 0 : index
      %c0_154 = arith.constant 0 : index
      %312 = vector.load %arg6[%c47, %c0_153, %c0_154] : memref<96x32x128xbf16, #tpu.memory_space<vmem>>, vector<1x32x128xbf16>
      %313 = vector.shape_cast %312 : vector<1x32x128xbf16> to vector<32x128xbf16>
      %314 = arith.select %302, %313, %300 : vector<32x128xi1>, vector<32x128xbf16>
      %cst_155 = arith.constant 1.200000e+01 : f32
      %315 = vector.broadcast %cst_155 : f32 to vector<32x128xf32>
      %316 = arith.cmpf oeq, %140, %315 : vector<32x128xf32>
      %c48 = arith.constant 48 : index
      %c0_156 = arith.constant 0 : index
      %c0_157 = arith.constant 0 : index
      %317 = vector.load %arg6[%c48, %c0_156, %c0_157] : memref<96x32x128xbf16, #tpu.memory_space<vmem>>, vector<1x32x128xbf16>
      %318 = vector.shape_cast %317 : vector<1x32x128xbf16> to vector<32x128xbf16>
      %319 = arith.select %316, %318, %305 : vector<32x128xi1>, vector<32x128xbf16>
      %c49 = arith.constant 49 : index
      %c0_158 = arith.constant 0 : index
      %c0_159 = arith.constant 0 : index
      %320 = vector.load %arg6[%c49, %c0_158, %c0_159] : memref<96x32x128xbf16, #tpu.memory_space<vmem>>, vector<1x32x128xbf16>
      %321 = vector.shape_cast %320 : vector<1x32x128xbf16> to vector<32x128xbf16>
      %322 = arith.select %316, %321, %308 : vector<32x128xi1>, vector<32x128xbf16>
      %c50 = arith.constant 50 : index
      %c0_160 = arith.constant 0 : index
      %c0_161 = arith.constant 0 : index
      %323 = vector.load %arg6[%c50, %c0_160, %c0_161] : memref<96x32x128xbf16, #tpu.memory_space<vmem>>, vector<1x32x128xbf16>
      %324 = vector.shape_cast %323 : vector<1x32x128xbf16> to vector<32x128xbf16>
      %325 = arith.select %316, %324, %311 : vector<32x128xi1>, vector<32x128xbf16>
      %c51 = arith.constant 51 : index
      %c0_162 = arith.constant 0 : index
      %c0_163 = arith.constant 0 : index
      %326 = vector.load %arg6[%c51, %c0_162, %c0_163] : memref<96x32x128xbf16, #tpu.memory_space<vmem>>, vector<1x32x128xbf16>
      %327 = vector.shape_cast %326 : vector<1x32x128xbf16> to vector<32x128xbf16>
      %328 = arith.select %316, %327, %314 : vector<32x128xi1>, vector<32x128xbf16>
      %cst_164 = arith.constant 1.300000e+01 : f32
      %329 = vector.broadcast %cst_164 : f32 to vector<32x128xf32>
      %330 = arith.cmpf oeq, %140, %329 : vector<32x128xf32>
      %c52 = arith.constant 52 : index
      %c0_165 = arith.constant 0 : index
      %c0_166 = arith.constant 0 : index
      %331 = vector.load %arg6[%c52, %c0_165, %c0_166] : memref<96x32x128xbf16, #tpu.memory_space<vmem>>, vector<1x32x128xbf16>
      %332 = vector.shape_cast %331 : vector<1x32x128xbf16> to vector<32x128xbf16>
      %333 = arith.select %330, %332, %319 : vector<32x128xi1>, vector<32x128xbf16>
      %c53 = arith.constant 53 : index
      %c0_167 = arith.constant 0 : index
      %c0_168 = arith.constant 0 : index
      %334 = vector.load %arg6[%c53, %c0_167, %c0_168] : memref<96x32x128xbf16, #tpu.memory_space<vmem>>, vector<1x32x128xbf16>
      %335 = vector.shape_cast %334 : vector<1x32x128xbf16> to vector<32x128xbf16>
      %336 = arith.select %330, %335, %322 : vector<32x128xi1>, vector<32x128xbf16>
      %c54 = arith.constant 54 : index
      %c0_169 = arith.constant 0 : index
      %c0_170 = arith.constant 0 : index
      %337 = vector.load %arg6[%c54, %c0_169, %c0_170] : memref<96x32x128xbf16, #tpu.memory_space<vmem>>, vector<1x32x128xbf16>
      %338 = vector.shape_cast %337 : vector<1x32x128xbf16> to vector<32x128xbf16>
      %339 = arith.select %330, %338, %325 : vector<32x128xi1>, vector<32x128xbf16>
      %c55 = arith.constant 55 : index
      %c0_171 = arith.constant 0 : index
      %c0_172 = arith.constant 0 : index
      %340 = vector.load %arg6[%c55, %c0_171, %c0_172] : memref<96x32x128xbf16, #tpu.memory_space<vmem>>, vector<1x32x128xbf16>
      %341 = vector.shape_cast %340 : vector<1x32x128xbf16> to vector<32x128xbf16>
      %342 = arith.select %330, %341, %328 : vector<32x128xi1>, vector<32x128xbf16>
      %cst_173 = arith.constant 1.400000e+01 : f32
      %343 = vector.broadcast %cst_173 : f32 to vector<32x128xf32>
      %344 = arith.cmpf oeq, %140, %343 : vector<32x128xf32>
      %c56 = arith.constant 56 : index
      %c0_174 = arith.constant 0 : index
      %c0_175 = arith.constant 0 : index
      %345 = vector.load %arg6[%c56, %c0_174, %c0_175] : memref<96x32x128xbf16, #tpu.memory_space<vmem>>, vector<1x32x128xbf16>
      %346 = vector.shape_cast %345 : vector<1x32x128xbf16> to vector<32x128xbf16>
      %347 = arith.select %344, %346, %333 : vector<32x128xi1>, vector<32x128xbf16>
      %c57 = arith.constant 57 : index
      %c0_176 = arith.constant 0 : index
      %c0_177 = arith.constant 0 : index
      %348 = vector.load %arg6[%c57, %c0_176, %c0_177] : memref<96x32x128xbf16, #tpu.memory_space<vmem>>, vector<1x32x128xbf16>
      %349 = vector.shape_cast %348 : vector<1x32x128xbf16> to vector<32x128xbf16>
      %350 = arith.select %344, %349, %336 : vector<32x128xi1>, vector<32x128xbf16>
      %c58 = arith.constant 58 : index
      %c0_178 = arith.constant 0 : index
      %c0_179 = arith.constant 0 : index
      %351 = vector.load %arg6[%c58, %c0_178, %c0_179] : memref<96x32x128xbf16, #tpu.memory_space<vmem>>, vector<1x32x128xbf16>
      %352 = vector.shape_cast %351 : vector<1x32x128xbf16> to vector<32x128xbf16>
      %353 = arith.select %344, %352, %339 : vector<32x128xi1>, vector<32x128xbf16>
      %c59 = arith.constant 59 : index
      %c0_180 = arith.constant 0 : index
      %c0_181 = arith.constant 0 : index
      %354 = vector.load %arg6[%c59, %c0_180, %c0_181] : memref<96x32x128xbf16, #tpu.memory_space<vmem>>, vector<1x32x128xbf16>
      %355 = vector.shape_cast %354 : vector<1x32x128xbf16> to vector<32x128xbf16>
      %356 = arith.select %344, %355, %342 : vector<32x128xi1>, vector<32x128xbf16>
      %cst_182 = arith.constant 1.500000e+01 : f32
      %357 = vector.broadcast %cst_182 : f32 to vector<32x128xf32>
      %358 = arith.cmpf oeq, %140, %357 : vector<32x128xf32>
      %c60 = arith.constant 60 : index
      %c0_183 = arith.constant 0 : index
      %c0_184 = arith.constant 0 : index
      %359 = vector.load %arg6[%c60, %c0_183, %c0_184] : memref<96x32x128xbf16, #tpu.memory_space<vmem>>, vector<1x32x128xbf16>
      %360 = vector.shape_cast %359 : vector<1x32x128xbf16> to vector<32x128xbf16>
      %361 = arith.select %358, %360, %347 : vector<32x128xi1>, vector<32x128xbf16>
      %c61 = arith.constant 61 : index
      %c0_185 = arith.constant 0 : index
      %c0_186 = arith.constant 0 : index
      %362 = vector.load %arg6[%c61, %c0_185, %c0_186] : memref<96x32x128xbf16, #tpu.memory_space<vmem>>, vector<1x32x128xbf16>
      %363 = vector.shape_cast %362 : vector<1x32x128xbf16> to vector<32x128xbf16>
      %364 = arith.select %358, %363, %350 : vector<32x128xi1>, vector<32x128xbf16>
      %c62 = arith.constant 62 : index
      %c0_187 = arith.constant 0 : index
      %c0_188 = arith.constant 0 : index
      %365 = vector.load %arg6[%c62, %c0_187, %c0_188] : memref<96x32x128xbf16, #tpu.memory_space<vmem>>, vector<1x32x128xbf16>
      %366 = vector.shape_cast %365 : vector<1x32x128xbf16> to vector<32x128xbf16>
      %367 = arith.select %358, %366, %353 : vector<32x128xi1>, vector<32x128xbf16>
      %c63 = arith.constant 63 : index
      %c0_189 = arith.constant 0 : index
      %c0_190 = arith.constant 0 : index
      %368 = vector.load %arg6[%c63, %c0_189, %c0_190] : memref<96x32x128xbf16, #tpu.memory_space<vmem>>, vector<1x32x128xbf16>
      %369 = vector.shape_cast %368 : vector<1x32x128xbf16> to vector<32x128xbf16>
      %370 = arith.select %358, %369, %356 : vector<32x128xi1>, vector<32x128xbf16>
      %cst_191 = arith.constant 1.600000e+01 : f32
      %371 = vector.broadcast %cst_191 : f32 to vector<32x128xf32>
      %372 = arith.cmpf oeq, %140, %371 : vector<32x128xf32>
      %c64 = arith.constant 64 : index
      %c0_192 = arith.constant 0 : index
      %c0_193 = arith.constant 0 : index
      %373 = vector.load %arg6[%c64, %c0_192, %c0_193] : memref<96x32x128xbf16, #tpu.memory_space<vmem>>, vector<1x32x128xbf16>
      %374 = vector.shape_cast %373 : vector<1x32x128xbf16> to vector<32x128xbf16>
      %375 = arith.select %372, %374, %361 : vector<32x128xi1>, vector<32x128xbf16>
      %c65 = arith.constant 65 : index
      %c0_194 = arith.constant 0 : index
      %c0_195 = arith.constant 0 : index
      %376 = vector.load %arg6[%c65, %c0_194, %c0_195] : memref<96x32x128xbf16, #tpu.memory_space<vmem>>, vector<1x32x128xbf16>
      %377 = vector.shape_cast %376 : vector<1x32x128xbf16> to vector<32x128xbf16>
      %378 = arith.select %372, %377, %364 : vector<32x128xi1>, vector<32x128xbf16>
      %c66 = arith.constant 66 : index
      %c0_196 = arith.constant 0 : index
      %c0_197 = arith.constant 0 : index
      %379 = vector.load %arg6[%c66, %c0_196, %c0_197] : memref<96x32x128xbf16, #tpu.memory_space<vmem>>, vector<1x32x128xbf16>
      %380 = vector.shape_cast %379 : vector<1x32x128xbf16> to vector<32x128xbf16>
      %381 = arith.select %372, %380, %367 : vector<32x128xi1>, vector<32x128xbf16>
      %c67 = arith.constant 67 : index
      %c0_198 = arith.constant 0 : index
      %c0_199 = arith.constant 0 : index
      %382 = vector.load %arg6[%c67, %c0_198, %c0_199] : memref<96x32x128xbf16, #tpu.memory_space<vmem>>, vector<1x32x128xbf16>
      %383 = vector.shape_cast %382 : vector<1x32x128xbf16> to vector<32x128xbf16>
      %384 = arith.select %372, %383, %370 : vector<32x128xi1>, vector<32x128xbf16>
      %cst_200 = arith.constant 1.700000e+01 : f32
      %385 = vector.broadcast %cst_200 : f32 to vector<32x128xf32>
      %386 = arith.cmpf oeq, %140, %385 : vector<32x128xf32>
      %c68 = arith.constant 68 : index
      %c0_201 = arith.constant 0 : index
      %c0_202 = arith.constant 0 : index
      %387 = vector.load %arg6[%c68, %c0_201, %c0_202] : memref<96x32x128xbf16, #tpu.memory_space<vmem>>, vector<1x32x128xbf16>
      %388 = vector.shape_cast %387 : vector<1x32x128xbf16> to vector<32x128xbf16>
      %389 = arith.select %386, %388, %375 : vector<32x128xi1>, vector<32x128xbf16>
      %c69 = arith.constant 69 : index
      %c0_203 = arith.constant 0 : index
      %c0_204 = arith.constant 0 : index
      %390 = vector.load %arg6[%c69, %c0_203, %c0_204] : memref<96x32x128xbf16, #tpu.memory_space<vmem>>, vector<1x32x128xbf16>
      %391 = vector.shape_cast %390 : vector<1x32x128xbf16> to vector<32x128xbf16>
      %392 = arith.select %386, %391, %378 : vector<32x128xi1>, vector<32x128xbf16>
      %c70 = arith.constant 70 : index
      %c0_205 = arith.constant 0 : index
      %c0_206 = arith.constant 0 : index
      %393 = vector.load %arg6[%c70, %c0_205, %c0_206] : memref<96x32x128xbf16, #tpu.memory_space<vmem>>, vector<1x32x128xbf16>
      %394 = vector.shape_cast %393 : vector<1x32x128xbf16> to vector<32x128xbf16>
      %395 = arith.select %386, %394, %381 : vector<32x128xi1>, vector<32x128xbf16>
      %c71 = arith.constant 71 : index
      %c0_207 = arith.constant 0 : index
      %c0_208 = arith.constant 0 : index
      %396 = vector.load %arg6[%c71, %c0_207, %c0_208] : memref<96x32x128xbf16, #tpu.memory_space<vmem>>, vector<1x32x128xbf16>
      %397 = vector.shape_cast %396 : vector<1x32x128xbf16> to vector<32x128xbf16>
      %398 = arith.select %386, %397, %384 : vector<32x128xi1>, vector<32x128xbf16>
      %cst_209 = arith.constant 1.800000e+01 : f32
      %399 = vector.broadcast %cst_209 : f32 to vector<32x128xf32>
      %400 = arith.cmpf oeq, %140, %399 : vector<32x128xf32>
      %c72 = arith.constant 72 : index
      %c0_210 = arith.constant 0 : index
      %c0_211 = arith.constant 0 : index
      %401 = vector.load %arg6[%c72, %c0_210, %c0_211] : memref<96x32x128xbf16, #tpu.memory_space<vmem>>, vector<1x32x128xbf16>
      %402 = vector.shape_cast %401 : vector<1x32x128xbf16> to vector<32x128xbf16>
      %403 = arith.select %400, %402, %389 : vector<32x128xi1>, vector<32x128xbf16>
      %c73 = arith.constant 73 : index
      %c0_212 = arith.constant 0 : index
      %c0_213 = arith.constant 0 : index
      %404 = vector.load %arg6[%c73, %c0_212, %c0_213] : memref<96x32x128xbf16, #tpu.memory_space<vmem>>, vector<1x32x128xbf16>
      %405 = vector.shape_cast %404 : vector<1x32x128xbf16> to vector<32x128xbf16>
      %406 = arith.select %400, %405, %392 : vector<32x128xi1>, vector<32x128xbf16>
      %c74 = arith.constant 74 : index
      %c0_214 = arith.constant 0 : index
      %c0_215 = arith.constant 0 : index
      %407 = vector.load %arg6[%c74, %c0_214, %c0_215] : memref<96x32x128xbf16, #tpu.memory_space<vmem>>, vector<1x32x128xbf16>
      %408 = vector.shape_cast %407 : vector<1x32x128xbf16> to vector<32x128xbf16>
      %409 = arith.select %400, %408, %395 : vector<32x128xi1>, vector<32x128xbf16>
      %c75 = arith.constant 75 : index
      %c0_216 = arith.constant 0 : index
      %c0_217 = arith.constant 0 : index
      %410 = vector.load %arg6[%c75, %c0_216, %c0_217] : memref<96x32x128xbf16, #tpu.memory_space<vmem>>, vector<1x32x128xbf16>
      %411 = vector.shape_cast %410 : vector<1x32x128xbf16> to vector<32x128xbf16>
      %412 = arith.select %400, %411, %398 : vector<32x128xi1>, vector<32x128xbf16>
      %cst_218 = arith.constant 1.900000e+01 : f32
      %413 = vector.broadcast %cst_218 : f32 to vector<32x128xf32>
      %414 = arith.cmpf oeq, %140, %413 : vector<32x128xf32>
      %c76 = arith.constant 76 : index
      %c0_219 = arith.constant 0 : index
      %c0_220 = arith.constant 0 : index
      %415 = vector.load %arg6[%c76, %c0_219, %c0_220] : memref<96x32x128xbf16, #tpu.memory_space<vmem>>, vector<1x32x128xbf16>
      %416 = vector.shape_cast %415 : vector<1x32x128xbf16> to vector<32x128xbf16>
      %417 = arith.select %414, %416, %403 : vector<32x128xi1>, vector<32x128xbf16>
      %c77 = arith.constant 77 : index
      %c0_221 = arith.constant 0 : index
      %c0_222 = arith.constant 0 : index
      %418 = vector.load %arg6[%c77, %c0_221, %c0_222] : memref<96x32x128xbf16, #tpu.memory_space<vmem>>, vector<1x32x128xbf16>
      %419 = vector.shape_cast %418 : vector<1x32x128xbf16> to vector<32x128xbf16>
      %420 = arith.select %414, %419, %406 : vector<32x128xi1>, vector<32x128xbf16>
      %c78 = arith.constant 78 : index
      %c0_223 = arith.constant 0 : index
      %c0_224 = arith.constant 0 : index
      %421 = vector.load %arg6[%c78, %c0_223, %c0_224] : memref<96x32x128xbf16, #tpu.memory_space<vmem>>, vector<1x32x128xbf16>
      %422 = vector.shape_cast %421 : vector<1x32x128xbf16> to vector<32x128xbf16>
      %423 = arith.select %414, %422, %409 : vector<32x128xi1>, vector<32x128xbf16>
      %c79 = arith.constant 79 : index
      %c0_225 = arith.constant 0 : index
      %c0_226 = arith.constant 0 : index
      %424 = vector.load %arg6[%c79, %c0_225, %c0_226] : memref<96x32x128xbf16, #tpu.memory_space<vmem>>, vector<1x32x128xbf16>
      %425 = vector.shape_cast %424 : vector<1x32x128xbf16> to vector<32x128xbf16>
      %426 = arith.select %414, %425, %412 : vector<32x128xi1>, vector<32x128xbf16>
      %cst_227 = arith.constant 2.000000e+01 : f32
      %427 = vector.broadcast %cst_227 : f32 to vector<32x128xf32>
      %428 = arith.cmpf oeq, %140, %427 : vector<32x128xf32>
      %c80 = arith.constant 80 : index
      %c0_228 = arith.constant 0 : index
      %c0_229 = arith.constant 0 : index
      %429 = vector.load %arg6[%c80, %c0_228, %c0_229] : memref<96x32x128xbf16, #tpu.memory_space<vmem>>, vector<1x32x128xbf16>
      %430 = vector.shape_cast %429 : vector<1x32x128xbf16> to vector<32x128xbf16>
      %431 = arith.select %428, %430, %417 : vector<32x128xi1>, vector<32x128xbf16>
      %c81 = arith.constant 81 : index
      %c0_230 = arith.constant 0 : index
      %c0_231 = arith.constant 0 : index
      %432 = vector.load %arg6[%c81, %c0_230, %c0_231] : memref<96x32x128xbf16, #tpu.memory_space<vmem>>, vector<1x32x128xbf16>
      %433 = vector.shape_cast %432 : vector<1x32x128xbf16> to vector<32x128xbf16>
      %434 = arith.select %428, %433, %420 : vector<32x128xi1>, vector<32x128xbf16>
      %c82 = arith.constant 82 : index
      %c0_232 = arith.constant 0 : index
      %c0_233 = arith.constant 0 : index
      %435 = vector.load %arg6[%c82, %c0_232, %c0_233] : memref<96x32x128xbf16, #tpu.memory_space<vmem>>, vector<1x32x128xbf16>
      %436 = vector.shape_cast %435 : vector<1x32x128xbf16> to vector<32x128xbf16>
      %437 = arith.select %428, %436, %423 : vector<32x128xi1>, vector<32x128xbf16>
      %c83 = arith.constant 83 : index
      %c0_234 = arith.constant 0 : index
      %c0_235 = arith.constant 0 : index
      %438 = vector.load %arg6[%c83, %c0_234, %c0_235] : memref<96x32x128xbf16, #tpu.memory_space<vmem>>, vector<1x32x128xbf16>
      %439 = vector.shape_cast %438 : vector<1x32x128xbf16> to vector<32x128xbf16>
      %440 = arith.select %428, %439, %426 : vector<32x128xi1>, vector<32x128xbf16>
      %cst_236 = arith.constant 2.100000e+01 : f32
      %441 = vector.broadcast %cst_236 : f32 to vector<32x128xf32>
      %442 = arith.cmpf oeq, %140, %441 : vector<32x128xf32>
      %c84 = arith.constant 84 : index
      %c0_237 = arith.constant 0 : index
      %c0_238 = arith.constant 0 : index
      %443 = vector.load %arg6[%c84, %c0_237, %c0_238] : memref<96x32x128xbf16, #tpu.memory_space<vmem>>, vector<1x32x128xbf16>
      %444 = vector.shape_cast %443 : vector<1x32x128xbf16> to vector<32x128xbf16>
      %445 = arith.select %442, %444, %431 : vector<32x128xi1>, vector<32x128xbf16>
      %c85 = arith.constant 85 : index
      %c0_239 = arith.constant 0 : index
      %c0_240 = arith.constant 0 : index
      %446 = vector.load %arg6[%c85, %c0_239, %c0_240] : memref<96x32x128xbf16, #tpu.memory_space<vmem>>, vector<1x32x128xbf16>
      %447 = vector.shape_cast %446 : vector<1x32x128xbf16> to vector<32x128xbf16>
      %448 = arith.select %442, %447, %434 : vector<32x128xi1>, vector<32x128xbf16>
      %c86 = arith.constant 86 : index
      %c0_241 = arith.constant 0 : index
      %c0_242 = arith.constant 0 : index
      %449 = vector.load %arg6[%c86, %c0_241, %c0_242] : memref<96x32x128xbf16, #tpu.memory_space<vmem>>, vector<1x32x128xbf16>
      %450 = vector.shape_cast %449 : vector<1x32x128xbf16> to vector<32x128xbf16>
      %451 = arith.select %442, %450, %437 : vector<32x128xi1>, vector<32x128xbf16>
      %c87 = arith.constant 87 : index
      %c0_243 = arith.constant 0 : index
      %c0_244 = arith.constant 0 : index
      %452 = vector.load %arg6[%c87, %c0_243, %c0_244] : memref<96x32x128xbf16, #tpu.memory_space<vmem>>, vector<1x32x128xbf16>
      %453 = vector.shape_cast %452 : vector<1x32x128xbf16> to vector<32x128xbf16>
      %454 = arith.select %442, %453, %440 : vector<32x128xi1>, vector<32x128xbf16>
      %cst_245 = arith.constant 2.200000e+01 : f32
      %455 = vector.broadcast %cst_245 : f32 to vector<32x128xf32>
      %456 = arith.cmpf oeq, %140, %455 : vector<32x128xf32>
      %c88 = arith.constant 88 : index
      %c0_246 = arith.constant 0 : index
      %c0_247 = arith.constant 0 : index
      %457 = vector.load %arg6[%c88, %c0_246, %c0_247] : memref<96x32x128xbf16, #tpu.memory_space<vmem>>, vector<1x32x128xbf16>
      %458 = vector.shape_cast %457 : vector<1x32x128xbf16> to vector<32x128xbf16>
      %459 = arith.select %456, %458, %445 : vector<32x128xi1>, vector<32x128xbf16>
      %c89 = arith.constant 89 : index
      %c0_248 = arith.constant 0 : index
      %c0_249 = arith.constant 0 : index
      %460 = vector.load %arg6[%c89, %c0_248, %c0_249] : memref<96x32x128xbf16, #tpu.memory_space<vmem>>, vector<1x32x128xbf16>
      %461 = vector.shape_cast %460 : vector<1x32x128xbf16> to vector<32x128xbf16>
      %462 = arith.select %456, %461, %448 : vector<32x128xi1>, vector<32x128xbf16>
      %c90 = arith.constant 90 : index
      %c0_250 = arith.constant 0 : index
      %c0_251 = arith.constant 0 : index
      %463 = vector.load %arg6[%c90, %c0_250, %c0_251] : memref<96x32x128xbf16, #tpu.memory_space<vmem>>, vector<1x32x128xbf16>
      %464 = vector.shape_cast %463 : vector<1x32x128xbf16> to vector<32x128xbf16>
      %465 = arith.select %456, %464, %451 : vector<32x128xi1>, vector<32x128xbf16>
      %c91 = arith.constant 91 : index
      %c0_252 = arith.constant 0 : index
      %c0_253 = arith.constant 0 : index
      %466 = vector.load %arg6[%c91, %c0_252, %c0_253] : memref<96x32x128xbf16, #tpu.memory_space<vmem>>, vector<1x32x128xbf16>
      %467 = vector.shape_cast %466 : vector<1x32x128xbf16> to vector<32x128xbf16>
      %468 = arith.select %456, %467, %454 : vector<32x128xi1>, vector<32x128xbf16>
      %cst_254 = arith.constant 2.300000e+01 : f32
      %469 = vector.broadcast %cst_254 : f32 to vector<32x128xf32>
      %470 = arith.cmpf oeq, %140, %469 : vector<32x128xf32>
      %c92 = arith.constant 92 : index
      %c0_255 = arith.constant 0 : index
      %c0_256 = arith.constant 0 : index
      %471 = vector.load %arg6[%c92, %c0_255, %c0_256] : memref<96x32x128xbf16, #tpu.memory_space<vmem>>, vector<1x32x128xbf16>
      %472 = vector.shape_cast %471 : vector<1x32x128xbf16> to vector<32x128xbf16>
      %473 = arith.select %470, %472, %459 : vector<32x128xi1>, vector<32x128xbf16>
      %c93 = arith.constant 93 : index
      %c0_257 = arith.constant 0 : index
      %c0_258 = arith.constant 0 : index
      %474 = vector.load %arg6[%c93, %c0_257, %c0_258] : memref<96x32x128xbf16, #tpu.memory_space<vmem>>, vector<1x32x128xbf16>
      %475 = vector.shape_cast %474 : vector<1x32x128xbf16> to vector<32x128xbf16>
      %476 = arith.select %470, %475, %462 : vector<32x128xi1>, vector<32x128xbf16>
      %c94 = arith.constant 94 : index
      %c0_259 = arith.constant 0 : index
      %c0_260 = arith.constant 0 : index
      %477 = vector.load %arg6[%c94, %c0_259, %c0_260] : memref<96x32x128xbf16, #tpu.memory_space<vmem>>, vector<1x32x128xbf16>
      %478 = vector.shape_cast %477 : vector<1x32x128xbf16> to vector<32x128xbf16>
      %479 = arith.select %470, %478, %465 : vector<32x128xi1>, vector<32x128xbf16>
      %c95 = arith.constant 95 : index
      %c0_261 = arith.constant 0 : index
      %c0_262 = arith.constant 0 : index
      %480 = vector.load %arg6[%c95, %c0_261, %c0_262] : memref<96x32x128xbf16, #tpu.memory_space<vmem>>, vector<1x32x128xbf16>
      %481 = vector.shape_cast %480 : vector<1x32x128xbf16> to vector<32x128xbf16>
      %482 = arith.select %470, %481, %468 : vector<32x128xi1>, vector<32x128xbf16>
      %483 = arith.extf %473 : vector<32x128xbf16> to vector<32x128xf32>
      %484 = arith.extf %476 : vector<32x128xbf16> to vector<32x128xf32>
      %485 = arith.extf %479 : vector<32x128xbf16> to vector<32x128xf32>
      %486 = arith.extf %482 : vector<32x128xbf16> to vector<32x128xf32>
      %487 = arith.mulf %145, %486 : vector<32x128xf32>
      %488 = arith.addf %485, %487 : vector<32x128xf32>
      %489 = arith.mulf %145, %488 : vector<32x128xf32>
      %490 = arith.addf %484, %489 : vector<32x128xf32>
      %491 = arith.mulf %145, %490 : vector<32x128xf32>
      %492 = arith.addf %483, %491 : vector<32x128xf32>
      %c0_263 = arith.constant 0 : index
      %c0_264 = arith.constant 0 : index
      %493 = vector.load %arg7[%c0_263, %c0_264] : memref<32x128xf32, #tpu.memory_space<vmem>>, vector<32x128xf32>
      %cst_265 = arith.constant 0.000000e+00 : f32
      %494 = vector.broadcast %cst_265 : f32 to vector<32x128xf32>
      %495 = arith.cmpf one, %493, %494 : vector<32x128xf32>
      %cst_266 = arith.constant 0.000000e+00 : f32
      %496 = vector.broadcast %cst_266 : f32 to vector<32x128xf32>
      %497 = arith.select %495, %492, %496 : vector<32x128xi1>, vector<32x128xf32>
      %c0_267 = arith.constant 0 : index
      %c0_268 = arith.constant 0 : index
      %498 = vector.load %arg9[%c0_267, %c0_268] : memref<32x128xf32, #tpu.memory_space<vmem>>, vector<32x128xf32>
      %499 = arith.addf %498, %497 : vector<32x128xf32>
      %c0_269 = arith.constant 0 : index
      %c0_270 = arith.constant 0 : index
      %500 = vector.load %arg9[%c0_269, %c0_270] : memref<32x128xf32, #tpu.memory_space<vmem>>, vector<32x128xf32>
      tpu.vector_store %arg9[%c0_269, %c0_270], %499 {strides = array<i32>} : memref<32x128xf32, #tpu.memory_space<vmem>>, vector<32x128xf32>,
    } else {
    }
    %c0_i32_4 = arith.constant 0 : i32
    %11 = arith.cmpi eq, %arg1, %c0_i32_4 : i32
    %c1_i32 = arith.constant 1 : i32
    %12 = arith.cmpi eq, %arg2, %c1_i32 : i32
    %13 = arith.andi %11, %12 : i1
    %14 = arith.extui %13 : i1 to i32
    %c0_i32_5 = arith.constant 0 : i32
    %15 = arith.cmpi ne, %14, %c0_i32_5 : i32
    scf.if %15 {
      %cst = arith.constant 0.000000e+00 : f32
      %16 = vector.broadcast %cst : f32 to vector<1x8x128xf32>
      %c0 = arith.constant 0 : index
      %c0_6 = arith.constant 0 : index
      %17 = vector.load %arg9[%c0, %c0_6] : memref<32x128xf32, #tpu.memory_space<vmem>>, vector<32x128xf32>
      %18 = vector.shape_cast %17 : vector<32x128xf32> to vector<1x32x128xf32>
      %cst_7 = arith.constant dense<0.000000e+00> : vector<1xf32>
      %19 = vector.multi_reduction <add>, %18, %cst_7 [1, 2] : vector<1x32x128xf32> to vector<1xf32>
      %20 = vector.shape_cast %19 : vector<1xf32> to vector<1x1x1xf32>
      %21 = vector.extract %20[0, 0, 0] : f32 from vector<1x1x1xf32>
      %22 = vector.broadcast %21 : f32 to vector<1x8x128xf32>
      %23 = arith.addf %16, %22 : vector<1x8x128xf32>
      %c0_8 = arith.constant 0 : index
      %c0_9 = arith.constant 0 : index
      %c0_10 = arith.constant 0 : index
      %24 = vector.load %arg8[%c0_8, %c0_9, %c0_10] : memref<1x8x128xf32, #tpu.memory_space<vmem>>, vector<1x8x128xf32>
      tpu.vector_store %arg8[%c0_8, %c0_9, %c0_10], %23 {strides = array<i32>} : memref<1x8x128xf32, #tpu.memory_space<vmem>>, vector<1x8x128xf32>,
    } else {
    }
    return
  }
  func.func @transform_0(%arg0: i32, %arg1: i32, %arg2: i32, %arg3: memref<4x1xi32, #tpu.memory_space<smem>>) -> (i32, i32, i32) {
    %c0_i32 = arith.constant 0 : i32
    %c0_i32_0 = arith.constant 0 : i32
    return %arg2, %arg0, %c0_i32 : i32, i32, i32
  }
  func.func @transform_1(%arg0: i32, %arg1: i32, %arg2: i32, %arg3: memref<4x1xi32, #tpu.memory_space<smem>>) -> (i32, i32, i32) {
    %c0_i32 = arith.constant 0 : i32
    %c0_i32_0 = arith.constant 0 : i32
    return %arg2, %c0_i32, %arg1 : i32, i32, i32
  }
  func.func @transform_2(%arg0: i32, %arg1: i32, %arg2: i32, %arg3: memref<4x1xi32, #tpu.memory_space<smem>>) -> (i32, i32, i32) {
    %c0_i32 = arith.constant 0 : i32
    %c0_i32_0 = arith.constant 0 : i32
    return %c0_i32, %arg0, %arg1 : i32, i32, i32
  }
  func.func @transform_3(%arg0: i32, %arg1: i32, %arg2: i32, %arg3: memref<4x1xi32, #tpu.memory_space<smem>>) -> (i32, i32) {
    %c0_i32 = arith.constant 0 : i32
    return %arg0, %arg1 : i32, i32
  }
  func.func @transform_4(%arg0: i32, %arg1: i32, %arg2: i32, %arg3: memref<4x1xi32, #tpu.memory_space<smem>>) -> (i32, i32, i32) {
    %c0_i32 = arith.constant 0 : i32
    %c0_i32_0 = arith.constant 0 : i32
    %c0_i32_1 = arith.constant 0 : i32
    return %arg0, %c0_i32, %c0_i32_0 : i32, i32, i32
  }
}

</mosaic_0001>

<bundles_post_ra>
// kernel: theta_restraint_forward.1
= control target key start
LH: loop header
LB: loop body
LE: loop exit
PB: predicated region body
PF: predicated region fallthrough
CT: control target
= control target key end

     0   :  { %s6285_s0 = inlined_call_operand.vmem [shape: s32[4,1], index: 0, kind: input, shape index: {}]   ;;  %s6286_s1 = inlined_call_operand.vmem [shape: f32[2,128,8], index: 1, kind: input, shape index: {}]   ;;  %s6287_s2 = inlined_call_operand.vmem [shape: f32[2,3,128], index: 2, kind: input, shape index: {}]   ;;  %s6288_s3 = inlined_call_operand.vmem [shape: bf16[96,128,128], index: 3, kind: input, shape index: {}]   ;;  %s6289_s4 = inlined_call_operand.vmem [shape: f32[128,128], index: 4, kind: input, shape index: {}]   ;;  %s6290_s5 = inlined_call_operand.vmem [shape: f32[4,8,128], index: 5, kind: output, shape index: {}]  }
   0x1   :  { %6292 = sst [smem:[#allocation9_spill]] %s6288_s3  ;;  %s10_s20 = sshll.u32 %s6285_s0, 4  ;;  %s11_s20 = int_to_ptr.vmem [resolvable:$true] %s10_s20 }
   0x2   :  { %s4126_s21 = scalar_lea.vmem %s11_s20, 64  ;;  %p4131_p1 = scmp.lt.s32.totalorder %s11_s20, %s11_s20 }
   0x3   :  { %p4127_p0 = scmp.ne.s32.totalorder %s11_s20, %s4126_s21  ;;  %p4132_p2 = scmp.lt.s32.totalorder %s4126_s21, %s4126_s21 }
   0x5   :  { %p4133_p3 = por %p4132_p2, %p4131_p1 }
   0x7   :  { %p4134_p4 = pnand %p4133_p3, %p4127_p0 }
   0x9   :  { %4137 = shalt.err (!%p4134_p4)  }
   0xa   :  { %s4196_s22 = smov [#allocation4]  }
   0xb   :  { %13 = dma.vmem_to_smem %s11_s20, 64, %s4196_s22, [#allocation3] }
   0xc   :  { %4166 = dma.done.wait [#allocation3], 64 }
   0xd   :  { %4167 = vsyncadd [#allocation3], 4294967232 }
   0xe   :  { %15 = sfence }
   0xf   :  { %s4241_s23 = smov 0   ;;  %s4243_s24 = smov 0  }
  0x10   :  { %s4245_s25 = smov 0   ;;  %s4247_s0 = smov 0  }
  0x11   :  { %s4249_s26 = smov 0   ;;  %s4251_s27 = smov 0  }
  0x12   :  { %s4253_s28 = smov 0  }
  0x13 LB: > { %s33_s29 = sadd.s32 1, %s4186_s26  ;;  %s40_s30 = sadd.s32 1, %s4190_s27  ;;  %s4194_s28 = sphi %s4253_s28, %s21_s28   ;;  %s4190_s27 = sphi %s4251_s27, %s6391_s27   ;;  %s4186_s26 = sphi %s4249_s26, %s6390_s26   ;;  %s4182_s0 = sphi %s4247_s0, %s6389_s0   ;;  %s4178_s25 = sphi %s4245_s25, %s6388_s25   ;;  %s4174_s24 = sphi %s4243_s24, %s6387_s24   ;;  %s4170_s23 = sphi %s4241_s23, %s6386_s23  }
  0x14   : > { %p34_p5 = scmp.ge.s32.totalorder %s33_s29, 2  ;;  %p112_p6 = scmp.ne.s32.totalorder %s4174_s24, %s4170_s23 }
  0x15   : > { %p113_p7 = scmp.eq.s32.totalorder %s4194_s28, 0  ;;  %s105_s7 = sadd.s32 1, %s4174_s24 }
  0x16   : > { %s6393_s29 = smov (%p34_p5, %s33_s29), 0  ;;  %s6395_s30 = smov (!%p34_p5, %s40_s30), %s4190_s27 }
  0x17   : > { %6293 = sst [smem:[#allocation7_spill]] %s6393_s29  ;;  %p114_p8 = por %p113_p7, %p112_p6 }
  0x18   : > { %p42_p9 = scmp.ge.s32.totalorder %s6395_s30, 4  ;;  %p3598_p11 = scmp.ge.s32.totalorder %s4194_s28, 8 }
  0x1a   : > { %s6397_s30 = smov (%p42_p9, %s6395_s30), 0  ;;  %192 = sbr.rel (%p3598_p11) target bundleno = 139 (0x8b), region = 16 }
  0x1b   : > { %6294 = sst [smem:[#allocation8_spill]] %s6397_s30  ;;  %s100_s6 = ssub.s32 %s4190_s27, %s6397_s30 }
  0x1c   : > { %p103_p10 = scmp.eq.s32.totalorder %s100_s6, 0 }
  0x1e   : > { %s4290_s8 = scalar_select %p103_p10, %s4174_s24, %s105_s7  }
  0x21   : > { %218 = sbr.rel (!%p114_p8) target bundleno = 139 (0x8b), region = 28  ;;  %s220_s9 = sand.u32 (%p114_p8), 1, %s4174_s24  }
  0x22   : > { %s4011_s10 = sshll.u32 (%p114_p8), %s4190_s27, 4  ;;  %s4014_s11 = smul.u32 (%p114_p8), 1536, %s220_s9 }
  0x23   : > { %s6295_s3 = sld [smem:[#allocation9_spill]] (%p114_p8) }
  0x24   : > { %s4306_s15 = scalar_lea.vmem (%p114_p8), [#allocation5], %s4014_s11 }
  0x29   : > { %s4298_s14 = scalar_lea.vmem %s6295_s3, %s4011_s10 }
  0x2a   : > { %v242_v0 = vld [vmem:[%s4298_s14] sm:$0xff]   ;;  %v246_v1 = vld [vmem:[%s4298_s14 + $0x8] sm:$0xff]  }
  0x2b   : > { %v250_v2 = vld [vmem:[%s4298_s14 + $0x40] sm:$0xff]   ;;  %v254_v3 = vld [vmem:[%s4298_s14 + $0x48] sm:$0xff]   ;;  %243 = vst [vmem:[%s4306_s15] sm:$0xff] %v242_v0   ;;  %247 = vst [vmem:[%s4306_s15 + $0x8] sm:$0xff] %v246_v1  }
  0x2c   : > { %v258_v4 = vld [vmem:[%s4298_s14 + $0x80] sm:$0xff]   ;;  %v262_v5 = vld [vmem:[%s4298_s14 + $0x88] sm:$0xff]   ;;  %251 = vst [vmem:[%s4306_s15 + $0x10] sm:$0xff] %v250_v2   ;;  %255 = vst [vmem:[%s4306_s15 + $0x18] sm:$0xff] %v254_v3  }
  0x2d   : > { %259 = vst [vmem:[%s4306_s15 + $0x20] sm:$0xff] %v258_v4   ;;  %263 = vst [vmem:[%s4306_s15 + $0x28] sm:$0xff] %v262_v5   ;;  %v266_v6 = vld [vmem:[%s4298_s14 + $0xc0] sm:$0xff]   ;;  %v270_v7 = vld [vmem:[%s4298_s14 + $0xc8] sm:$0xff]  }
  0x2e   : > { %v274_v8 = vld [vmem:[%s4298_s14 + $0x100] sm:$0xff]   ;;  %267 = vst [vmem:[%s4306_s15 + $0x30] sm:$0xff] %v266_v6   ;;  %271 = vst [vmem:[%s4306_s15 + $0x38] sm:$0xff] %v270_v7   ;;  %v278_v9 = vld [vmem:[%s4298_s14 + $0x108] sm:$0xff]  }
  0x2f   : > { %275 = vst [vmem:[%s4306_s15 + $0x40] sm:$0xff] %v274_v8   ;;  %v282_v10 = vld [vmem:[%s4298_s14 + $0x140] sm:$0xff]   ;;  %v286_v11 = vld [vmem:[%s4298_s14 + $0x148] sm:$0xff]   ;;  %279 = vst [vmem:[%s4306_s15 + $0x48] sm:$0xff] %v278_v9  }
  0x30   : > { %283 = vst [vmem:[%s4306_s15 + $0x50] sm:$0xff] %v282_v10   ;;  %287 = vst [vmem:[%s4306_s15 + $0x58] sm:$0xff] %v286_v11   ;;  %v290_v12 = vld [vmem:[%s4298_s14 + $0x180] sm:$0xff]   ;;  %v294_v13 = vld [vmem:[%s4298_s14 + $0x188] sm:$0xff]  }
  0x31   : > { %v298_v14 = vld [vmem:[%s4298_s14 + $0x1c0] sm:$0xff]   ;;  %291 = vst [vmem:[%s4306_s15 + $0x60] sm:$0xff] %v290_v12   ;;  %295 = vst [vmem:[%s4306_s15 + $0x68] sm:$0xff] %v294_v13   ;;  %v302_v15 = vld [vmem:[%s4298_s14 + $0x1c8] sm:$0xff]  }
  0x32   : > { %299 = vst [vmem:[%s4306_s15 + $0x70] sm:$0xff] %v298_v14   ;;  %v306_v16 = vld [vmem:[%s4298_s14 + $0x200] sm:$0xff]   ;;  %v310_v17 = vld [vmem:[%s4298_s14 + $0x208] sm:$0xff]   ;;  %303 = vst [vmem:[%s4306_s15 + $0x78] sm:$0xff] %v302_v15  }
  0x33   : > { %307 = vst [vmem:[%s4306_s15 + $0x80] sm:$0xff] %v306_v16   ;;  %311 = vst [vmem:[%s4306_s15 + $0x88] sm:$0xff] %v310_v17   ;;  %v314_v18 = vld [vmem:[%s4298_s14 + $0x240] sm:$0xff]   ;;  %v318_v19 = vld [vmem:[%s4298_s14 + $0x248] sm:$0xff]  }
  0x34   : > { %v322_v20 = vld [vmem:[%s4298_s14 + $0x280] sm:$0xff]   ;;  %315 = vst [vmem:[%s4306_s15 + $0x90] sm:$0xff] %v314_v18   ;;  %319 = vst [vmem:[%s4306_s15 + $0x98] sm:$0xff] %v318_v19   ;;  %v326_v21 = vld [vmem:[%s4298_s14 + $0x288] sm:$0xff]  }
  0x35   : > { %323 = vst [vmem:[%s4306_s15 + $0xa0] sm:$0xff] %v322_v20   ;;  %v330_v22 = vld [vmem:[%s4298_s14 + $0x2c0] sm:$0xff]   ;;  %v334_v23 = vld [vmem:[%s4298_s14 + $0x2c8] sm:$0xff]   ;;  %327 = vst [vmem:[%s4306_s15 + $0xa8] sm:$0xff] %v326_v21  }
  0x36   : > { %331 = vst [vmem:[%s4306_s15 + $0xb0] sm:$0xff] %v330_v22   ;;  %335 = vst [vmem:[%s4306_s15 + $0xb8] sm:$0xff] %v334_v23   ;;  %v338_v24 = vld [vmem:[%s4298_s14 + $0x300] sm:$0xff]   ;;  %v342_v25 = vld [vmem:[%s4298_s14 + $0x308] sm:$0xff]  }
  0x37   : > { %v346_v26 = vld [vmem:[%s4298_s14 + $0x340] sm:$0xff]   ;;  %339 = vst [vmem:[%s4306_s15 + $0xc0] sm:$0xff] %v338_v24   ;;  %343 = vst [vmem:[%s4306_s15 + $0xc8] sm:$0xff] %v342_v25   ;;  %v350_v27 = vld [vmem:[%s4298_s14 + $0x348] sm:$0xff]  }
  0x38   : > { %347 = vst [vmem:[%s4306_s15 + $0xd0] sm:$0xff] %v346_v26   ;;  %v354_v28 = vld [vmem:[%s4298_s14 + $0x380] sm:$0xff]   ;;  %v358_v29 = vld [vmem:[%s4298_s14 + $0x388] sm:$0xff]   ;;  %351 = vst [vmem:[%s4306_s15 + $0xd8] sm:$0xff] %v350_v27  }
  0x39   : > { %355 = vst [vmem:[%s4306_s15 + $0xe0] sm:$0xff] %v354_v28   ;;  %359 = vst [vmem:[%s4306_s15 + $0xe8] sm:$0xff] %v358_v29   ;;  %v362_v30 = vld [vmem:[%s4298_s14 + $0x3c0] sm:$0xff]   ;;  %v366_v31 = vld [vmem:[%s4298_s14 + $0x3c8] sm:$0xff]  }
  0x3a   : > { %v370_v32 = vld [vmem:[%s4298_s14 + $0x400] sm:$0xff]   ;;  %363 = vst [vmem:[%s4306_s15 + $0xf0] sm:$0xff] %v362_v30   ;;  %367 = vst [vmem:[%s4306_s15 + $0xf8] sm:$0xff] %v366_v31   ;;  %v374_v33 = vld [vmem:[%s4298_s14 + $0x408] sm:$0xff]  }
  0x3b   : > { %371 = vst [vmem:[%s4306_s15 + $0x100] sm:$0xff] %v370_v32   ;;  %v378_v34 = vld [vmem:[%s4298_s14 + $0x440] sm:$0xff]   ;;  %v382_v35 = vld [vmem:[%s4298_s14 + $0x448] sm:$0xff]   ;;  %375 = vst [vmem:[%s4306_s15 + $0x108] sm:$0xff] %v374_v33  }
  0x3c   : > { %379 = vst [vmem:[%s4306_s15 + $0x110] sm:$0xff] %v378_v34   ;;  %383 = vst [vmem:[%s4306_s15 + $0x118] sm:$0xff] %v382_v35   ;;  %v386_v36 = vld [vmem:[%s4298_s14 + $0x480] sm:$0xff]   ;;  %v390_v37 = vld [vmem:[%s4298_s14 + $0x488] sm:$0xff]  }
  0x3d   : > { %v394_v38 = vld [vmem:[%s4298_s14 + $0x4c0] sm:$0xff]   ;;  %387 = vst [vmem:[%s4306_s15 + $0x120] sm:$0xff] %v386_v36   ;;  %391 = vst [vmem:[%s4306_s15 + $0x128] sm:$0xff] %v390_v37   ;;  %v398_v39 = vld [vmem:[%s4298_s14 + $0x4c8] sm:$0xff]  }
  0x3e   : > { %395 = vst [vmem:[%s4306_s15 + $0x130] sm:$0xff] %v394_v38   ;;  %v402_v40 = vld [vmem:[%s4298_s14 + $0x500] sm:$0xff]   ;;  %v406_v41 = vld [vmem:[%s4298_s14 + $0x508] sm:$0xff]   ;;  %399 = vst [vmem:[%s4306_s15 + $0x138] sm:$0xff] %v398_v39  }
  0x3f   : > { %403 = vst [vmem:[%s4306_s15 + $0x140] sm:$0xff] %v402_v40   ;;  %407 = vst [vmem:[%s4306_s15 + $0x148] sm:$0xff] %v406_v41   ;;  %v410_v42 = vld [vmem:[%s4298_s14 + $0x540] sm:$0xff]   ;;  %v414_v43 = vld [vmem:[%s4298_s14 + $0x548] sm:$0xff]  }
  0x40   : > { %v418_v44 = vld [vmem:[%s4298_s14 + $0x580] sm:$0xff]   ;;  %411 = vst [vmem:[%s4306_s15 + $0x150] sm:$0xff] %v410_v42   ;;  %415 = vst [vmem:[%s4306_s15 + $0x158] sm:$0xff] %v414_v43   ;;  %v422_v45 = vld [vmem:[%s4298_s14 + $0x588] sm:$0xff]  }
  0x41   : > { %419 = vst [vmem:[%s4306_s15 + $0x160] sm:$0xff] %v418_v44   ;;  %v426_v46 = vld [vmem:[%s4298_s14 + $0x5c0] sm:$0xff]   ;;  %v430_v47 = vld [vmem:[%s4298_s14 + $0x5c8] sm:$0xff]   ;;  %423 = vst [vmem:[%s4306_s15 + $0x168] sm:$0xff] %v422_v45  }
  0x42   : > { %427 = vst [vmem:[%s4306_s15 + $0x170] sm:$0xff] %v426_v46   ;;  %431 = vst [vmem:[%s4306_s15 + $0x178] sm:$0xff] %v430_v47   ;;  %v434_v48 = vld [vmem:[%s4298_s14 + $0x600] sm:$0xff]   ;;  %v438_v49 = vld [vmem:[%s4298_s14 + $0x608] sm:$0xff]  }
  0x43   : > { %v442_v50 = vld [vmem:[%s4298_s14 + $0x640] sm:$0xff]   ;;  %435 = vst [vmem:[%s4306_s15 + $0x180] sm:$0xff] %v434_v48   ;;  %439 = vst [vmem:[%s4306_s15 + $0x188] sm:$0xff] %v438_v49   ;;  %v446_v51 = vld [vmem:[%s4298_s14 + $0x648] sm:$0xff]  }
  0x44   : > { %443 = vst [vmem:[%s4306_s15 + $0x190] sm:$0xff] %v442_v50   ;;  %v450_v52 = vld [vmem:[%s4298_s14 + $0x680] sm:$0xff]   ;;  %v454_v53 = vld [vmem:[%s4298_s14 + $0x688] sm:$0xff]   ;;  %447 = vst [vmem:[%s4306_s15 + $0x198] sm:$0xff] %v446_v51  }
  0x45   : > { %451 = vst [vmem:[%s4306_s15 + $0x1a0] sm:$0xff] %v450_v52   ;;  %455 = vst [vmem:[%s4306_s15 + $0x1a8] sm:$0xff] %v454_v53   ;;  %v458_v54 = vld [vmem:[%s4298_s14 + $0x6c0] sm:$0xff]   ;;  %v462_v55 = vld [vmem:[%s4298_s14 + $0x6c8] sm:$0xff]  }
  0x46   : > { %v466_v56 = vld [vmem:[%s4298_s14 + $0x700] sm:$0xff]   ;;  %459 = vst [vmem:[%s4306_s15 + $0x1b0] sm:$0xff] %v458_v54   ;;  %463 = vst [vmem:[%s4306_s15 + $0x1b8] sm:$0xff] %v462_v55   ;;  %v470_v57 = vld [vmem:[%s4298_s14 + $0x708] sm:$0xff]  }
  0x47   : > { %467 = vst [vmem:[%s4306_s15 + $0x1c0] sm:$0xff] %v466_v56   ;;  %v474_v58 = vld [vmem:[%s4298_s14 + $0x740] sm:$0xff]   ;;  %v478_v59 = vld [vmem:[%s4298_s14 + $0x748] sm:$0xff]   ;;  %471 = vst [vmem:[%s4306_s15 + $0x1c8] sm:$0xff] %v470_v57  }
  0x48   : > { %475 = vst [vmem:[%s4306_s15 + $0x1d0] sm:$0xff] %v474_v58   ;;  %479 = vst [vmem:[%s4306_s15 + $0x1d8] sm:$0xff] %v478_v59   ;;  %v482_v60 = vld [vmem:[%s4298_s14 + $0x780] sm:$0xff]   ;;  %v486_v61 = vld [vmem:[%s4298_s14 + $0x788] sm:$0xff]  }
  0x49   : > { %v490_v62 = vld [vmem:[%s4298_s14 + $0x7c0] sm:$0xff]   ;;  %483 = vst [vmem:[%s4306_s15 + $0x1e0] sm:$0xff] %v482_v60   ;;  %487 = vst [vmem:[%s4306_s15 + $0x1e8] sm:$0xff] %v486_v61   ;;  %v494_v63 = vld [vmem:[%s4298_s14 + $0x7c8] sm:$0xff]  }
  0x4a   : > { %491 = vst [vmem:[%s4306_s15 + $0x1f0] sm:$0xff] %v490_v62   ;;  %v498_v0 = vld [vmem:[%s4298_s14 + $0x800] sm:$0xff]   ;;  %v502_v1 = vld [vmem:[%s4298_s14 + $0x808] sm:$0xff]   ;;  %495 = vst [vmem:[%s4306_s15 + $0x1f8] sm:$0xff] %v494_v63  }
  0x4b   : > { %499 = vst [vmem:[%s4306_s15 + $0x200] sm:$0xff] %v498_v0   ;;  %503 = vst [vmem:[%s4306_s15 + $0x208] sm:$0xff] %v502_v1   ;;  %v506_v2 = vld [vmem:[%s4298_s14 + $0x840] sm:$0xff]   ;;  %v510_v3 = vld [vmem:[%s4298_s14 + $0x848] sm:$0xff]  }
  0x4c   : > { %v514_v4 = vld [vmem:[%s4298_s14 + $0x880] sm:$0xff]   ;;  %507 = vst [vmem:[%s4306_s15 + $0x210] sm:$0xff] %v506_v2   ;;  %511 = vst [vmem:[%s4306_s15 + $0x218] sm:$0xff] %v510_v3   ;;  %v518_v5 = vld [vmem:[%s4298_s14 + $0x888] sm:$0xff]  }
  0x4d   : > { %515 = vst [vmem:[%s4306_s15 + $0x220] sm:$0xff] %v514_v4   ;;  %v522_v6 = vld [vmem:[%s4298_s14 + $0x8c0] sm:$0xff]   ;;  %v526_v7 = vld [vmem:[%s4298_s14 + $0x8c8] sm:$0xff]   ;;  %519 = vst [vmem:[%s4306_s15 + $0x228] sm:$0xff] %v518_v5  }
  0x4e   : > { %523 = vst [vmem:[%s4306_s15 + $0x230] sm:$0xff] %v522_v6   ;;  %527 = vst [vmem:[%s4306_s15 + $0x238] sm:$0xff] %v526_v7   ;;  %v530_v8 = vld [vmem:[%s4298_s14 + $0x900] sm:$0xff]   ;;  %v534_v9 = vld [vmem:[%s4298_s14 + $0x908] sm:$0xff]  }
  0x4f   : > { %v538_v10 = vld [vmem:[%s4298_s14 + $0x940] sm:$0xff]   ;;  %531 = vst [vmem:[%s4306_s15 + $0x240] sm:$0xff] %v530_v8   ;;  %535 = vst [vmem:[%s4306_s15 + $0x248] sm:$0xff] %v534_v9   ;;  %v542_v11 = vld [vmem:[%s4298_s14 + $0x948] sm:$0xff]  }
  0x50   : > { %539 = vst [vmem:[%s4306_s15 + $0x250] sm:$0xff] %v538_v10   ;;  %v546_v12 = vld [vmem:[%s4298_s14 + $0x980] sm:$0xff]   ;;  %v550_v13 = vld [vmem:[%s4298_s14 + $0x988] sm:$0xff]   ;;  %543 = vst [vmem:[%s4306_s15 + $0x258] sm:$0xff] %v542_v11  }
  0x51   : > { %547 = vst [vmem:[%s4306_s15 + $0x260] sm:$0xff] %v546_v12   ;;  %551 = vst [vmem:[%s4306_s15 + $0x268] sm:$0xff] %v550_v13   ;;  %v554_v14 = vld [vmem:[%s4298_s14 + $0x9c0] sm:$0xff]   ;;  %v558_v15 = vld [vmem:[%s4298_s14 + $0x9c8] sm:$0xff]  }
  0x52   : > { %v562_v16 = vld [vmem:[%s4298_s14 + $0xa00] sm:$0xff]   ;;  %555 = vst [vmem:[%s4306_s15 + $0x270] sm:$0xff] %v554_v14   ;;  %559 = vst [vmem:[%s4306_s15 + $0x278] sm:$0xff] %v558_v15   ;;  %v566_v17 = vld [vmem:[%s4298_s14 + $0xa08] sm:$0xff]  }
  0x53   : > { %563 = vst [vmem:[%s4306_s15 + $0x280] sm:$0xff] %v562_v16   ;;  %v570_v18 = vld [vmem:[%s4298_s14 + $0xa40] sm:$0xff]   ;;  %v574_v19 = vld [vmem:[%s4298_s14 + $0xa48] sm:$0xff]   ;;  %567 = vst [vmem:[%s4306_s15 + $0x288] sm:$0xff] %v566_v17  }
  0x54   : > { %571 = vst [vmem:[%s4306_s15 + $0x290] sm:$0xff] %v570_v18   ;;  %575 = vst [vmem:[%s4306_s15 + $0x298] sm:$0xff] %v574_v19   ;;  %v578_v20 = vld [vmem:[%s4298_s14 + $0xa80] sm:$0xff]   ;;  %v582_v21 = vld [vmem:[%s4298_s14 + $0xa88] sm:$0xff]  }
  0x55   : > { %v586_v22 = vld [vmem:[%s4298_s14 + $0xac0] sm:$0xff]   ;;  %579 = vst [vmem:[%s4306_s15 + $0x2a0] sm:$0xff] %v578_v20   ;;  %583 = vst [vmem:[%s4306_s15 + $0x2a8] sm:$0xff] %v582_v21   ;;  %v590_v23 = vld [vmem:[%s4298_s14 + $0xac8] sm:$0xff]  }
  0x56   : > { %587 = vst [vmem:[%s4306_s15 + $0x2b0] sm:$0xff] %v586_v22   ;;  %v594_v24 = vld [vmem:[%s4298_s14 + $0xb00] sm:$0xff]   ;;  %v598_v25 = vld [vmem:[%s4298_s14 + $0xb08] sm:$0xff]   ;;  %591 = vst [vmem:[%s4306_s15 + $0x2b8] sm:$0xff] %v590_v23  }
  0x57   : > { %595 = vst [vmem:[%s4306_s15 + $0x2c0] sm:$0xff] %v594_v24   ;;  %599 = vst [vmem:[%s4306_s15 + $0x2c8] sm:$0xff] %v598_v25   ;;  %v602_v26 = vld [vmem:[%s4298_s14 + $0xb40] sm:$0xff]   ;;  %v606_v27 = vld [vmem:[%s4298_s14 + $0xb48] sm:$0xff]  }
  0x58   : > { %v610_v28 = vld [vmem:[%s4298_s14 + $0xb80] sm:$0xff]   ;;  %603 = vst [vmem:[%s4306_s15 + $0x2d0] sm:$0xff] %v602_v26   ;;  %607 = vst [vmem:[%s4306_s15 + $0x2d8] sm:$0xff] %v606_v27   ;;  %v614_v29 = vld [vmem:[%s4298_s14 + $0xb88] sm:$0xff]  }
  0x59   : > { %611 = vst [vmem:[%s4306_s15 + $0x2e0] sm:$0xff] %v610_v28   ;;  %v618_v30 = vld [vmem:[%s4298_s14 + $0xbc0] sm:$0xff]   ;;  %v622_v31 = vld [vmem:[%s4298_s14 + $0xbc8] sm:$0xff]   ;;  %615 = vst [vmem:[%s4306_s15 + $0x2e8] sm:$0xff] %v614_v29  }
  0x5a   : > { %619 = vst [vmem:[%s4306_s15 + $0x2f0] sm:$0xff] %v618_v30   ;;  %623 = vst [vmem:[%s4306_s15 + $0x2f8] sm:$0xff] %v622_v31   ;;  %v626_v32 = vld [vmem:[%s4298_s14 + $0xc00] sm:$0xff]   ;;  %v630_v33 = vld [vmem:[%s4298_s14 + $0xc08] sm:$0xff]  }
  0x5b   : > { %v634_v34 = vld [vmem:[%s4298_s14 + $0xc40] sm:$0xff]   ;;  %627 = vst [vmem:[%s4306_s15 + $0x300] sm:$0xff] %v626_v32   ;;  %631 = vst [vmem:[%s4306_s15 + $0x308] sm:$0xff] %v630_v33   ;;  %v638_v35 = vld [vmem:[%s4298_s14 + $0xc48] sm:$0xff]  }
  0x5c   : > { %635 = vst [vmem:[%s4306_s15 + $0x310] sm:$0xff] %v634_v34   ;;  %v642_v36 = vld [vmem:[%s4298_s14 + $0xc80] sm:$0xff]   ;;  %v646_v37 = vld [vmem:[%s4298_s14 + $0xc88] sm:$0xff]   ;;  %639 = vst [vmem:[%s4306_s15 + $0x318] sm:$0xff] %v638_v35  }
  0x5d   : > { %643 = vst [vmem:[%s4306_s15 + $0x320] sm:$0xff] %v642_v36   ;;  %647 = vst [vmem:[%s4306_s15 + $0x328] sm:$0xff] %v646_v37   ;;  %v650_v38 = vld [vmem:[%s4298_s14 + $0xcc0] sm:$0xff]   ;;  %v654_v39 = vld [vmem:[%s4298_s14 + $0xcc8] sm:$0xff]  }
  0x5e   : > { %v658_v40 = vld [vmem:[%s4298_s14 + $0xd00] sm:$0xff]   ;;  %651 = vst [vmem:[%s4306_s15 + $0x330] sm:$0xff] %v650_v38   ;;  %655 = vst [vmem:[%s4306_s15 + $0x338] sm:$0xff] %v654_v39   ;;  %v662_v41 = vld [vmem:[%s4298_s14 + $0xd08] sm:$0xff]  }
  0x5f   : > { %659 = vst [vmem:[%s4306_s15 + $0x340] sm:$0xff] %v658_v40   ;;  %v666_v42 = vld [vmem:[%s4298_s14 + $0xd40] sm:$0xff]   ;;  %v670_v43 = vld [vmem:[%s4298_s14 + $0xd48] sm:$0xff]   ;;  %663 = vst [vmem:[%s4306_s15 + $0x348] sm:$0xff] %v662_v41  }
  0x60   : > { %667 = vst [vmem:[%s4306_s15 + $0x350] sm:$0xff] %v666_v42   ;;  %671 = vst [vmem:[%s4306_s15 + $0x358] sm:$0xff] %v670_v43   ;;  %v674_v44 = vld [vmem:[%s4298_s14 + $0xd80] sm:$0xff]   ;;  %v678_v45 = vld [vmem:[%s4298_s14 + $0xd88] sm:$0xff]  }
  0x61   : > { %v682_v46 = vld [vmem:[%s4298_s14 + $0xdc0] sm:$0xff]   ;;  %675 = vst [vmem:[%s4306_s15 + $0x360] sm:$0xff] %v674_v44   ;;  %679 = vst [vmem:[%s4306_s15 + $0x368] sm:$0xff] %v678_v45   ;;  %v686_v47 = vld [vmem:[%s4298_s14 + $0xdc8] sm:$0xff]  }
  0x62   : > { %683 = vst [vmem:[%s4306_s15 + $0x370] sm:$0xff] %v682_v46   ;;  %v690_v48 = vld [vmem:[%s4298_s14 + $0xe00] sm:$0xff]   ;;  %v694_v49 = vld [vmem:[%s4298_s14 + $0xe08] sm:$0xff]   ;;  %687 = vst [vmem:[%s4306_s15 + $0x378] sm:$0xff] %v686_v47  }
  0x63   : > { %691 = vst [vmem:[%s4306_s15 + $0x380] sm:$0xff] %v690_v48   ;;  %695 = vst [vmem:[%s4306_s15 + $0x388] sm:$0xff] %v694_v49   ;;  %v698_v50 = vld [vmem:[%s4298_s14 + $0xe40] sm:$0xff]   ;;  %v702_v51 = vld [vmem:[%s4298_s14 + $0xe48] sm:$0xff]  }
  0x64   : > { %v706_v52 = vld [vmem:[%s4298_s14 + $0xe80] sm:$0xff]   ;;  %699 = vst [vmem:[%s4306_s15 + $0x390] sm:$0xff] %v698_v50   ;;  %703 = vst [vmem:[%s4306_s15 + $0x398] sm:$0xff] %v702_v51   ;;  %v710_v53 = vld [vmem:[%s4298_s14 + $0xe88] sm:$0xff]  }
  0x65   : > { %707 = vst [vmem:[%s4306_s15 + $0x3a0] sm:$0xff] %v706_v52   ;;  %v714_v54 = vld [vmem:[%s4298_s14 + $0xec0] sm:$0xff]   ;;  %v718_v55 = vld [vmem:[%s4298_s14 + $0xec8] sm:$0xff]   ;;  %711 = vst [vmem:[%s4306_s15 + $0x3a8] sm:$0xff] %v710_v53  }
  0x66   : > { %715 = vst [vmem:[%s4306_s15 + $0x3b0] sm:$0xff] %v714_v54   ;;  %719 = vst [vmem:[%s4306_s15 + $0x3b8] sm:$0xff] %v718_v55   ;;  %v722_v56 = vld [vmem:[%s4298_s14 + $0xf00] sm:$0xff]   ;;  %v726_v57 = vld [vmem:[%s4298_s14 + $0xf08] sm:$0xff]  }
  0x67   : > { %v730_v58 = vld [vmem:[%s4298_s14 + $0xf40] sm:$0xff]   ;;  %723 = vst [vmem:[%s4306_s15 + $0x3c0] sm:$0xff] %v722_v56   ;;  %727 = vst [vmem:[%s4306_s15 + $0x3c8] sm:$0xff] %v726_v57   ;;  %v734_v59 = vld [vmem:[%s4298_s14 + $0xf48] sm:$0xff]  }
  0x68   : > { %731 = vst [vmem:[%s4306_s15 + $0x3d0] sm:$0xff] %v730_v58   ;;  %v738_v60 = vld [vmem:[%s4298_s14 + $0xf80] sm:$0xff]   ;;  %v742_v61 = vld [vmem:[%s4298_s14 + $0xf88] sm:$0xff]   ;;  %735 = vst [vmem:[%s4306_s15 + $0x3d8] sm:$0xff] %v734_v59  }
  0x69   : > { %739 = vst [vmem:[%s4306_s15 + $0x3e0] sm:$0xff] %v738_v60   ;;  %743 = vst [vmem:[%s4306_s15 + $0x3e8] sm:$0xff] %v742_v61   ;;  %v746_v62 = vld [vmem:[%s4298_s14 + $0xfc0] sm:$0xff]   ;;  %v750_v63 = vld [vmem:[%s4298_s14 + $0xfc8] sm:$0xff]  }
  0x6a   : > { %v754_v0 = vld [vmem:[%s4298_s14 + $0x1000] sm:$0xff]   ;;  %747 = vst [vmem:[%s4306_s15 + $0x3f0] sm:$0xff] %v746_v62   ;;  %751 = vst [vmem:[%s4306_s15 + $0x3f8] sm:$0xff] %v750_v63   ;;  %v758_v1 = vld [vmem:[%s4298_s14 + $0x1008] sm:$0xff]  }
  0x6b   : > { %755 = vst [vmem:[%s4306_s15 + $0x400] sm:$0xff] %v754_v0   ;;  %v762_v2 = vld [vmem:[%s4298_s14 + $0x1040] sm:$0xff]   ;;  %v766_v3 = vld [vmem:[%s4298_s14 + $0x1048] sm:$0xff]   ;;  %759 = vst [vmem:[%s4306_s15 + $0x408] sm:$0xff] %v758_v1  }
  0x6c   : > { %763 = vst [vmem:[%s4306_s15 + $0x410] sm:$0xff] %v762_v2   ;;  %767 = vst [vmem:[%s4306_s15 + $0x418] sm:$0xff] %v766_v3   ;;  %v770_v4 = vld [vmem:[%s4298_s14 + $0x1080] sm:$0xff]   ;;  %v774_v5 = vld [vmem:[%s4298_s14 + $0x1088] sm:$0xff]  }
  0x6d   : > { %v778_v6 = vld [vmem:[%s4298_s14 + $0x10c0] sm:$0xff]   ;;  %771 = vst [vmem:[%s4306_s15 + $0x420] sm:$0xff] %v770_v4   ;;  %775 = vst [vmem:[%s4306_s15 + $0x428] sm:$0xff] %v774_v5   ;;  %v782_v7 = vld [vmem:[%s4298_s14 + $0x10c8] sm:$0xff]  }
  0x6e   : > { %779 = vst [vmem:[%s4306_s15 + $0x430] sm:$0xff] %v778_v6   ;;  %v786_v8 = vld [vmem:[%s4298_s14 + $0x1100] sm:$0xff]   ;;  %v790_v9 = vld [vmem:[%s4298_s14 + $0x1108] sm:$0xff]   ;;  %783 = vst [vmem:[%s4306_s15 + $0x438] sm:$0xff] %v782_v7  }
  0x6f   : > { %787 = vst [vmem:[%s4306_s15 + $0x440] sm:$0xff] %v786_v8   ;;  %791 = vst [vmem:[%s4306_s15 + $0x448] sm:$0xff] %v790_v9   ;;  %v794_v10 = vld [vmem:[%s4298_s14 + $0x1140] sm:$0xff]   ;;  %v798_v11 = vld [vmem:[%s4298_s14 + $0x1148] sm:$0xff]  }
  0x70   : > { %v802_v12 = vld [vmem:[%s4298_s14 + $0x1180] sm:$0xff]   ;;  %795 = vst [vmem:[%s4306_s15 + $0x450] sm:$0xff] %v794_v10   ;;  %799 = vst [vmem:[%s4306_s15 + $0x458] sm:$0xff] %v798_v11   ;;  %v806_v13 = vld [vmem:[%s4298_s14 + $0x1188] sm:$0xff]  }
  0x71   : > { %803 = vst [vmem:[%s4306_s15 + $0x460] sm:$0xff] %v802_v12   ;;  %v810_v14 = vld [vmem:[%s4298_s14 + $0x11c0] sm:$0xff]   ;;  %v814_v15 = vld [vmem:[%s4298_s14 + $0x11c8] sm:$0xff]   ;;  %807 = vst [vmem:[%s4306_s15 + $0x468] sm:$0xff] %v806_v13  }
  0x72   : > { %811 = vst [vmem:[%s4306_s15 + $0x470] sm:$0xff] %v810_v14   ;;  %815 = vst [vmem:[%s4306_s15 + $0x478] sm:$0xff] %v814_v15   ;;  %v818_v16 = vld [vmem:[%s4298_s14 + $0x1200] sm:$0xff]   ;;  %v822_v17 = vld [vmem:[%s4298_s14 + $0x1208] sm:$0xff]  }
  0x73   : > { %v826_v18 = vld [vmem:[%s4298_s14 + $0x1240] sm:$0xff]   ;;  %819 = vst [vmem:[%s4306_s15 + $0x480] sm:$0xff] %v818_v16   ;;  %823 = vst [vmem:[%s4306_s15 + $0x488] sm:$0xff] %v822_v17   ;;  %v830_v19 = vld [vmem:[%s4298_s14 + $0x1248] sm:$0xff]  }
  0x74   : > { %827 = vst [vmem:[%s4306_s15 + $0x490] sm:$0xff] %v826_v18   ;;  %v834_v20 = vld [vmem:[%s4298_s14 + $0x1280] sm:$0xff]   ;;  %v838_v21 = vld [vmem:[%s4298_s14 + $0x1288] sm:$0xff]   ;;  %831 = vst [vmem:[%s4306_s15 + $0x498] sm:$0xff] %v830_v19  }
  0x75   : > { %835 = vst [vmem:[%s4306_s15 + $0x4a0] sm:$0xff] %v834_v20   ;;  %839 = vst [vmem:[%s4306_s15 + $0x4a8] sm:$0xff] %v838_v21   ;;  %v842_v22 = vld [vmem:[%s4298_s14 + $0x12c0] sm:$0xff]   ;;  %v846_v23 = vld [vmem:[%s4298_s14 + $0x12c8] sm:$0xff]  }
  0x76   : > { %v850_v24 = vld [vmem:[%s4298_s14 + $0x1300] sm:$0xff]   ;;  %843 = vst [vmem:[%s4306_s15 + $0x4b0] sm:$0xff] %v842_v22   ;;  %847 = vst [vmem:[%s4306_s15 + $0x4b8] sm:$0xff] %v846_v23   ;;  %v854_v25 = vld [vmem:[%s4298_s14 + $0x1308] sm:$0xff]  }
  0x77   : > { %851 = vst [vmem:[%s4306_s15 + $0x4c0] sm:$0xff] %v850_v24   ;;  %v858_v26 = vld [vmem:[%s4298_s14 + $0x1340] sm:$0xff]   ;;  %v862_v27 = vld [vmem:[%s4298_s14 + $0x1348] sm:$0xff]   ;;  %855 = vst [vmem:[%s4306_s15 + $0x4c8] sm:$0xff] %v854_v25  }
  0x78   : > { %859 = vst [vmem:[%s4306_s15 + $0x4d0] sm:$0xff] %v858_v26   ;;  %863 = vst [vmem:[%s4306_s15 + $0x4d8] sm:$0xff] %v862_v27   ;;  %v866_v28 = vld [vmem:[%s4298_s14 + $0x1380] sm:$0xff]   ;;  %v870_v29 = vld [vmem:[%s4298_s14 + $0x1388] sm:$0xff]  }
  0x79   : > { %v874_v30 = vld [vmem:[%s4298_s14 + $0x13c0] sm:$0xff]   ;;  %867 = vst [vmem:[%s4306_s15 + $0x4e0] sm:$0xff] %v866_v28   ;;  %871 = vst [vmem:[%s4306_s15 + $0x4e8] sm:$0xff] %v870_v29   ;;  %v878_v31 = vld [vmem:[%s4298_s14 + $0x13c8] sm:$0xff]  }
  0x7a   : > { %875 = vst [vmem:[%s4306_s15 + $0x4f0] sm:$0xff] %v874_v30   ;;  %v882_v32 = vld [vmem:[%s4298_s14 + $0x1400] sm:$0xff]   ;;  %v886_v33 = vld [vmem:[%s4298_s14 + $0x1408] sm:$0xff]   ;;  %879 = vst [vmem:[%s4306_s15 + $0x4f8] sm:$0xff] %v878_v31  }
  0x7b   : > { %883 = vst [vmem:[%s4306_s15 + $0x500] sm:$0xff] %v882_v32   ;;  %887 = vst [vmem:[%s4306_s15 + $0x508] sm:$0xff] %v886_v33   ;;  %v890_v34 = vld [vmem:[%s4298_s14 + $0x1440] sm:$0xff]   ;;  %v894_v35 = vld [vmem:[%s4298_s14 + $0x1448] sm:$0xff]  }
  0x7c   : > { %v898_v36 = vld [vmem:[%s4298_s14 + $0x1480] sm:$0xff]   ;;  %891 = vst [vmem:[%s4306_s15 + $0x510] sm:$0xff] %v890_v34   ;;  %895 = vst [vmem:[%s4306_s15 + $0x518] sm:$0xff] %v894_v35   ;;  %v902_v37 = vld [vmem:[%s4298_s14 + $0x1488] sm:$0xff]  }
  0x7d   : > { %899 = vst [vmem:[%s4306_s15 + $0x520] sm:$0xff] %v898_v36   ;;  %v906_v38 = vld [vmem:[%s4298_s14 + $0x14c0] sm:$0xff]   ;;  %v910_v39 = vld [vmem:[%s4298_s14 + $0x14c8] sm:$0xff]   ;;  %903 = vst [vmem:[%s4306_s15 + $0x528] sm:$0xff] %v902_v37  }
  0x7e   : > { %907 = vst [vmem:[%s4306_s15 + $0x530] sm:$0xff] %v906_v38   ;;  %911 = vst [vmem:[%s4306_s15 + $0x538] sm:$0xff] %v910_v39   ;;  %v914_v40 = vld [vmem:[%s4298_s14 + $0x1500] sm:$0xff]   ;;  %v918_v41 = vld [vmem:[%s4298_s14 + $0x1508] sm:$0xff]  }
  0x7f   : > { %v922_v42 = vld [vmem:[%s4298_s14 + $0x1540] sm:$0xff]   ;;  %915 = vst [vmem:[%s4306_s15 + $0x540] sm:$0xff] %v914_v40   ;;  %919 = vst [vmem:[%s4306_s15 + $0x548] sm:$0xff] %v918_v41   ;;  %v926_v43 = vld [vmem:[%s4298_s14 + $0x1548] sm:$0xff]  }
  0x80   : > { %923 = vst [vmem:[%s4306_s15 + $0x550] sm:$0xff] %v922_v42   ;;  %v930_v44 = vld [vmem:[%s4298_s14 + $0x1580] sm:$0xff]   ;;  %v934_v45 = vld [vmem:[%s4298_s14 + $0x1588] sm:$0xff]   ;;  %927 = vst [vmem:[%s4306_s15 + $0x558] sm:$0xff] %v926_v43  }
  0x81   : > { %931 = vst [vmem:[%s4306_s15 + $0x560] sm:$0xff] %v930_v44   ;;  %935 = vst [vmem:[%s4306_s15 + $0x568] sm:$0xff] %v934_v45   ;;  %v938_v46 = vld [vmem:[%s4298_s14 + $0x15c0] sm:$0xff]   ;;  %v942_v47 = vld [vmem:[%s4298_s14 + $0x15c8] sm:$0xff]  }
  0x82   : > { %v946_v48 = vld [vmem:[%s4298_s14 + $0x1600] sm:$0xff]   ;;  %939 = vst [vmem:[%s4306_s15 + $0x570] sm:$0xff] %v938_v46   ;;  %943 = vst [vmem:[%s4306_s15 + $0x578] sm:$0xff] %v942_v47   ;;  %v950_v49 = vld [vmem:[%s4298_s14 + $0x1608] sm:$0xff]  }
  0x83   : > { %947 = vst [vmem:[%s4306_s15 + $0x580] sm:$0xff] %v946_v48   ;;  %v954_v50 = vld [vmem:[%s4298_s14 + $0x1640] sm:$0xff]   ;;  %v958_v51 = vld [vmem:[%s4298_s14 + $0x1648] sm:$0xff]   ;;  %951 = vst [vmem:[%s4306_s15 + $0x588] sm:$0xff] %v950_v49  }
  0x84   : > { %955 = vst [vmem:[%s4306_s15 + $0x590] sm:$0xff] %v954_v50   ;;  %959 = vst [vmem:[%s4306_s15 + $0x598] sm:$0xff] %v958_v51   ;;  %v962_v52 = vld [vmem:[%s4298_s14 + $0x1680] sm:$0xff]   ;;  %v966_v53 = vld [vmem:[%s4298_s14 + $0x1688] sm:$0xff]  }
  0x85   : > { %v970_v54 = vld [vmem:[%s4298_s14 + $0x16c0] sm:$0xff]   ;;  %963 = vst [vmem:[%s4306_s15 + $0x5a0] sm:$0xff] %v962_v52   ;;  %967 = vst [vmem:[%s4306_s15 + $0x5a8] sm:$0xff] %v966_v53   ;;  %v974_v55 = vld [vmem:[%s4298_s14 + $0x16c8] sm:$0xff]  }
  0x86   : > { %971 = vst [vmem:[%s4306_s15 + $0x5b0] sm:$0xff] %v970_v54   ;;  %v978_v56 = vld [vmem:[%s4298_s14 + $0x1700] sm:$0xff]   ;;  %v982_v57 = vld [vmem:[%s4298_s14 + $0x1708] sm:$0xff]   ;;  %975 = vst [vmem:[%s4306_s15 + $0x5b8] sm:$0xff] %v974_v55  }
  0x87   : > { %979 = vst [vmem:[%s4306_s15 + $0x5c0] sm:$0xff] %v978_v56   ;;  %983 = vst [vmem:[%s4306_s15 + $0x5c8] sm:$0xff] %v982_v57   ;;  %v986_v58 = vld [vmem:[%s4298_s14 + $0x1740] sm:$0xff]   ;;  %v990_v59 = vld [vmem:[%s4298_s14 + $0x1748] sm:$0xff]  }
  0x88   : > { %v994_v60 = vld [vmem:[%s4298_s14 + $0x1780] sm:$0xff]   ;;  %987 = vst [vmem:[%s4306_s15 + $0x5d0] sm:$0xff] %v986_v58   ;;  %991 = vst [vmem:[%s4306_s15 + $0x5d8] sm:$0xff] %v990_v59   ;;  %v998_v61 = vld [vmem:[%s4298_s14 + $0x1788] sm:$0xff]  }
  0x89   : > { %995 = vst [vmem:[%s4306_s15 + $0x5e0] sm:$0xff] %v994_v60   ;;  %v1002_v62 = vld [vmem:[%s4298_s14 + $0x17c0] sm:$0xff]   ;;  %v1006_v63 = vld [vmem:[%s4298_s14 + $0x17c8] sm:$0xff]   ;;  %999 = vst [vmem:[%s4306_s15 + $0x5e8] sm:$0xff] %v998_v61  }
  0x8a   : > { %1003 = vst [vmem:[%s4306_s15 + $0x5f0] sm:$0xff] %v1002_v62   ;;  %1007 = vst [vmem:[%s4306_s15 + $0x5f8] sm:$0xff] %v1006_v63  }
  0x8b PF: > { %p3601_p12 = scmp.ge.s32.totalorder %s4194_s28, 1  ;;  %p1811_p13 = scmp.lt.s32.totalorder %s4194_s28, 9 }
  0x8d   : > { %p1812_p0 = pnand %p3601_p12, %p1811_p13 }
  0x8e   : > { %s1818_s16 = sand.u32 (!%p1812_p0), 1, %s4170_s23   ;;  %s3602_s17 = sshll.u32 (!%p1812_p0), %s4182_s0, 2 }
  0x8f   : > { %1815 = sbr.rel (%p1812_p0) target bundleno = 856 (0x358), region = 73  ;;  %p1867_p1 = scmp.lt.s32.totalorder (!%p1812_p0), %s4178_s25, 1 }
  0x90   : > { %s4015_s18 = smul.u32 (!%p1812_p0), 1536, %s1818_s16  ;;  %p1869_p2 = scmp.lt.s32.totalorder (!%p1812_p0), %s3602_s17, 15 }
  0x91   : > { %p1893_p3 = scmp.lt.s32.totalorder (!%p1812_p0), %s4182_s0, 3  ;;  %p1899_p4 = scmp.eq.s32.totalorder (!%p1812_p0), %s4178_s25, 0 }
  0x96   : > { %s1868_s19 = scalar_select %p1867_p1, %s4178_s25, 1 }
  0x97   : > { %s6399_s17 = smov (!%p1869_p2, %s3602_s17), 15  ;;  %v4197_v0 = vmov (%p1899_p4), 0.0  }
  0x98   : > { %s3603_s20 = sshll.u32 %s1868_s19, 4  ;;  %s3605_s21 = sshll.u32 %s1868_s19, 2  ;;  %1904 = vst [vmem:[#allocation2] sm:$0xff] (%p1899_p4), %v4197_v0  ;;  %1905 = vst [vmem:[#allocation2 + $0x8] sm:$0xff] (%p1899_p4), %v4197_v0 }
  0x99   : > { %s1872_s22 = sadd.s32 %s3603_s20, %s6399_s17  ;;  %s4697_s9 = scalar_lea.vmem %s6287_s2, %s3605_s21  ;;  %1906 = vst [vmem:[#allocation2 + $0x10] sm:$0xff] (%p1899_p4), %v4197_v0  ;;  %1907 = vst [vmem:[#allocation2 + $0x18] sm:$0xff] (%p1899_p4), %v4197_v0 }
  0x9a   : > { %s3604_s10 = sshll.u32 %s1872_s22, 3  ;;  %s3607_s11 = sshll.u32 %s6399_s17, 3 }
  0x9b   : > { %s1874_s13 = scalar_lea.vmem %s6286_s1, %s3604_s10  ;;  %s4705_s16 = scalar_lea.vmem %s6289_s4, %s3607_s11 }
  0x9c   : > { %s1894_s3 = scalar_select %p1893_p3, %s4182_s0, 3 }
  0x9d   : > { %s4713_s21 = scalar_lea.vmem [#allocation5], %s4015_s18  ;;  %1903 = sbr.rel (!%p1899_p4) target bundleno = 164 (0xa4), region = 81 }
  0x9e   : > { %s3608_s30 = sshll.u32 %s1894_s3, 3 }
  0x9f   : > { %s4711_s29 = scalar_lea.vmem %s6290_s5, %s3608_s30 }
  0xa4 PF: > { %s3610_s17 = sshll.u32 %s4182_s0, 7 }
  0xa5   : > { %s1915_s22 = sld [smem:[#allocation4 + %s3610_s17]] }
  0xab   : > { %p3611_p5 = scmp.le.s32.totalorder %s1915_s22, 0 }
  0xac   : > { %v1922_v1 = vld [vmem:[%s1874_s13 + $0x10] sm:$0xff] (!%p3611_p5)  ;;  %v1920_v2 = vld [vmem:[%s1874_s13] sm:$0xff] (!%p3611_p5)  ;;  %v4198_v3 = vmov (!%p3611_p5), 0   ;;  %v1923_v4 = vld [vmem:[%s1874_s13 + $0x18] sm:$0xff] (!%p3611_p5)  ;;  %v4199_v6 = vmov (!%p3611_p5), 1   ;;  %v4200_v7 = vmov (!%p3611_p5), 2   ;;  %v1945_v13 = vlaneseq (!%p3611_p5) }
  0xad   : > { %1919 = sbr.rel (%p3611_p5) target bundleno = 639 (0x27f), region = 85  ;;  %4087 = vset.pattern.permute.xlu1 (!%p3611_p5), %v4198_v3  ;;  %4086 = vset.pattern.permute.xlu0 (!%p3611_p5), %v4198_v3  ;;  %v1921_v5 = vld [vmem:[%s1874_s13 + $0x8] sm:$0xff] (!%p3611_p5)  ;;  %v4201_v8 = vmov (!%p3611_p5), 6   ;;  %v4202_v9 = vmov (!%p3611_p5), 3   ;;  %v4203_v10 = vmov (!%p3611_p5), 4   ;;  %v4204_v11 = vmov (!%p3611_p5), 5  }
  0xae   : > { %1937 = vperm.xlu1 (!%p3611_p5), %4087, %v1922_v1   ;;  %1927 = vperm.xlu0 (!%p3611_p5), %4086, %v1920_v2   ;;  %v4205_v12 = vmov (!%p3611_p5), 7   ;;  %v1946_v14 = vshrl.u32 (!%p3611_p5), %v1945_v13, 7  ;;  %v1924_v16 = vld [vmem:[%s4697_s9] sm:$0x7] (!%p3611_p5) }
  0xb0   : > { %v1947_v15 = vsub.s32 (!%p3611_p5), 0, %v1946_v14  ;;  %v1971_v21 = vsub.s32 (!%p3611_p5), 1, %v1946_v14  ;;  %v1999_v29 = vsub.s32 (!%p3611_p5), 2, %v1946_v14 }
  0xb2   : > { %1942 = vperm.xlu1 (!%p3611_p5), %4087, %v1923_v4   ;;  %1932 = vperm.xlu0 (!%p3611_p5), %4086, %v1921_v5   ;;  %v4719_v17 = vrot.slane (!%p3611_p5), %v1924_v16, %v1947_v15  ;;  %v4723_v25 = vrot.slane (!%p3611_p5), %v1924_v16, %v1971_v21  ;;  %v4727_v34 = vrot.slane (!%p3611_p5), %v1924_v16, %v1999_v29 }
  0xb6   : > { %4089 = vset.pattern.permute.xlu1 %v4199_v6  ;;  %4088 = vset.pattern.permute.xlu0 %v4199_v6 }
  0xb7   : > { %1958 = vperm.xlu1 %4089, %v1921_v5   ;;  %1954 = vperm.xlu0 %4088, %v1920_v2  }
  0xbb   : > { %1962 = vperm.xlu1 %4089, %v1922_v1   ;;  %1966 = vperm.xlu0 %4088, %v1923_v4  }
  0xbf   : > { %4090 = vset.pattern.permute.xlu1 %v4200_v7  ;;  %4091 = vset.pattern.permute.xlu0 %v4200_v7 }
  0xc0   : > { %1982 = vperm.xlu1 %4090, %v1920_v2   ;;  %1986 = vperm.xlu0 %4091, %v1921_v5  }
  0xc4   : > { %1990 = vperm.xlu1 %4090, %v1922_v1   ;;  %4092 = vset.pattern.permute.xlu0 %v4201_v8 }
  0xc5   : > { %2010 = vperm.xlu0 %4092, %v1920_v2  }
  0xc8   : > { %1994 = vperm.xlu1 %4090, %v1923_v4  }
  0xc9   : > { %2022 = vperm.xlu0 %4092, %v1923_v4  }
  0xcc   : > { %4093 = vset.pattern.permute.xlu1 %v4201_v8 }
  0xcd   : > { %2014 = vperm.xlu1 %4093, %v1921_v5   ;;  %4095 = vset.pattern.permute.xlu0 %v4202_v9 }
  0xce   : > { %2034 = vperm.xlu0 %4095, %v1921_v5  }
  0xd1   : > { %2018 = vperm.xlu1 %4093, %v1922_v1  }
  0xd2   : > { %4096 = vset.pattern.permute.xlu0 %v4203_v10 }
  0xd3   : > { %2050 = vperm.xlu0 %4096, %v1920_v2  }
  0xd5   : > { %4094 = vset.pattern.permute.xlu1 %v4202_v9 }
  0xd6   : > { %2030 = vperm.xlu1 %4094, %v1920_v2  }
  0xd7   : > { %2062 = vperm.xlu0 %4096, %v1923_v4  }
  0xda   : > { %2038 = vperm.xlu1 %4094, %v1922_v1  }
  0xdb   : > { %4099 = vset.pattern.permute.xlu0 %v4204_v11 }
  0xdc   : > { %2078 = vperm.xlu0 %4099, %v1921_v5  }
  0xde   : > { %2042 = vperm.xlu1 %4094, %v1923_v4  }
  0xe0   : > { %4100 = vset.pattern.permute.xlu0 %v4205_v12 }
  0xe1   : > { %2098 = vperm.xlu0 %4100, %v1920_v2  }
  0xe2   : > { %4097 = vset.pattern.permute.xlu1 %v4203_v10 }
  0xe3   : > { %2054 = vperm.xlu1 %4097, %v1921_v5  }
  0xe5   : > { %2110 = vperm.xlu0 %4100, %v1923_v4  }
  0xe7   : > { %2058 = vperm.xlu1 %4097, %v1922_v1  }
  0xeb   : > { %4098 = vset.pattern.permute.xlu1 %v4204_v11 }
  0xec   : > { %2074 = vperm.xlu1 %4098, %v1920_v2  }
  0xf0   : > { %2082 = vperm.xlu1 %4098, %v1922_v1  }
  0xf4   : > { %2086 = vperm.xlu1 %4098, %v1923_v4  }
  0xf8   : > { %4101 = vset.pattern.permute.xlu1 %v4205_v12 }
  0xf9   : > { %2102 = vperm.xlu1 %4101, %v1921_v5  }
  0xfd   : > { %2106 = vperm.xlu1 %4101, %v1922_v1  }
 0x12d   : > { %v1938_v18 = vpop.permute.xlu1 %1937  ;;  %v1928_v19 = vpop.permute.xlu0 %1927 }
 0x12e   : > { %v1951_v20 = vmul.f32 %v4719_v17, %v1938_v18  ;;  %v1949_v51 = vmul.f32 %v4719_v17, %v1928_v19 }
 0x131   : > { %v1943_v22 = vpop.permute.xlu1 %1942  ;;  %v1933_v23 = vpop.permute.xlu0 %1932 }
 0x132   : > { %v1950_v24 = vmul.f32 %v4719_v17, %v1933_v23  ;;  %v1952_v0 = vmul.f32 %v4719_v17, %v1943_v22 }
 0x136   : > { %v1959_v26 = vpop.permute.xlu1 %1958  ;;  %v1955_v27 = vpop.permute.xlu0 %1954 }
 0x137   : > { %v1974_v28 = vmul.f32 %v4723_v25, %v1959_v26  ;;  %v1973_v52 = vmul.f32 %v4723_v25, %v1955_v27 }
 0x139   : > { %v1978_v30 = vadd.f32 %v1974_v28, %v1950_v24  ;;  %v1977_v55 = vadd.f32 %v1973_v52, %v1949_v51 }
 0x13a   : > { %v1963_v31 = vpop.permute.xlu1 %1962  ;;  %v1967_v32 = vpop.permute.xlu0 %1966 }
 0x13b   : > { %v1975_v33 = vmul.f32 %v4723_v25, %v1963_v31  ;;  %v1976_v61 = vmul.f32 %v4723_v25, %v1967_v32 }
 0x13d   : > { %v1979_v35 = vadd.f32 %v1975_v33, %v1951_v20  ;;  %v1980_v5 = vadd.f32 %v1976_v61, %v1952_v0 }
 0x13f   : > { %v1983_v36 = vpop.permute.xlu1 %1982  ;;  %v1987_v37 = vpop.permute.xlu0 %1986 }
 0x140   : > { %v2002_v38 = vmul.f32 %v4727_v34, %v1987_v37  ;;  %v2001_v56 = vmul.f32 %v4727_v34, %v1983_v36 }
 0x142   : > { %v2006_v39 = vadd.f32 %v2002_v38, %v1978_v30  ;;  %v2005_v59 = vadd.f32 %v2001_v56, %v1977_v55 }
 0x143   : > { %v1991_v40 = vpop.permute.xlu1 %1990 }
 0x144   : > { %v2003_v41 = vmul.f32 %v4727_v34, %v1991_v40  ;;  %v2011_v42 = vpop.permute.xlu0 %2010 }
 0x145   : > { %v4744_v3 = vsub.f32 %v2005_v59, %v2011_v42 }
 0x146   : > { %v2007_v43 = vadd.f32 %v2003_v41, %v1979_v35 }
 0x147   : > { %v1995_v44 = vpop.permute.xlu1 %1994  ;;  %vm2117_vm0 = vcmp.eq.f32.partialorder %v4744_v3, 0.0  ;;  %vm2253_vm12 = vcmp.lt.f32.partialorder %v4744_v3, 0.0 }
 0x148   : > { %v2023_v45 = vpop.permute.xlu0 %2022  ;;  %v2004_v1 = vmul.f32 %v4727_v34, %v1995_v44  ;;  %v2121_v9 = vsel %vm2117_vm0, 1.0, %v4744_v3 }
 0x149   : > { %4102 = vrcp.f32 %v2121_v9 }
 0x14a   : > { %v2008_v6 = vadd.f32 %v2004_v1, %v1980_v5 }
 0x14c   : > { %v2015_v46 = vpop.permute.xlu1 %2014  ;;  %v4751_v10 = vsub.f32 %v2008_v6, %v2023_v45 }
 0x14d   : > { %v4731_v47 = vsub.f32 %v2006_v39, %v2015_v46  ;;  %v2035_v48 = vpop.permute.xlu0 %2034 }
 0x14e   : > { %v2046_v49 = vmul.f32 %v2035_v48, %v4719_v17  ;;  %vm2120_vm1 = vcmp.eq.f32.partialorder %v4751_v10, 0.0  ;;  %vm2256_vm14 = vcmp.lt.f32.partialorder %v4751_v10, 0.0 }
 0x14f   : > { %vm2118_vm2 = vcmp.eq.f32.partialorder %v4731_v47, 0.0  ;;  %v2124_v19 = vsel %vm2120_vm1, 1.0, %v4751_v10  ;;  %v2333_v10 = vld [vmem:[%s4713_s21] sm:$0xf] }
 0x150   : > { %v2019_v50 = vpop.permute.xlu1 %2018  ;;  %v2122_v21 = vsel %vm2118_vm2, 1.0, %v4731_v47  ;;  %4104 = vrcp.f32 %v2124_v19 }
 0x151   : > { %v4736_v53 = vsub.f32 %v2007_v43, %v2019_v50  ;;  %4106 = vrcp.f32 %v2122_v21 }
 0x152   : > { %v2051_v54 = vpop.permute.xlu0 %2050 }
 0x153   : > { %v2065_v16 = vmul.f32 %v2051_v54, %v4723_v25  ;;  %v4103_v32 = vpop.eup %4102  ;;  %vm2119_vm3 = vcmp.eq.f32.partialorder %v4736_v53, 0.0 }
 0x154   : > { %v2123_v36 = vsel %vm2119_vm3, 1.0, %v4736_v53 }
 0x155   : > { %v2031_v57 = vpop.permute.xlu1 %2030  ;;  %4108 = vrcp.f32 %v2123_v36 }
 0x156   : > { %v2063_v58 = vpop.permute.xlu0 %2062  ;;  %v2045_v15 = vmul.f32 %v2031_v57, %v4719_v17 }
 0x157   : > { %v2068_v29 = vmul.f32 %v2063_v58, %v4723_v25 }
 0x158   : > { %v2069_v22 = vadd.f32 %v2065_v16, %v2045_v15 }
 0x159   : > { %v2039_v60 = vpop.permute.xlu1 %2038 }
 0x15a   : > { %v2047_v62 = vmul.f32 %v2039_v60, %v4719_v17  ;;  %v4105_v43 = vpop.eup %4104 }
 0x15b   : > { %v2079_v63 = vpop.permute.xlu0 %2078  ;;  %v4107_v46 = vpop.eup %4106 }
 0x15c   : > { %v2090_v2 = vmul.f32 %v2079_v63, %v4727_v34 }
 0x15d   : > { %v2043_v4 = vpop.permute.xlu1 %2042 }
 0x15e   : > { %v2048_v28 = vmul.f32 %v2043_v4, %v4719_v17 }
 0x15f   : > { %v4109_v56 = vpop.eup %4108 }
 0x160   : > { %v2099_v24 = vpop.permute.xlu0 %2098  ;;  %v2072_v37 = vadd.f32 %v2068_v29, %v2048_v28 }
 0x162   : > { %v2055_v7 = vpop.permute.xlu1 %2054 }
 0x163   : > { %v2066_v8 = vmul.f32 %v2055_v7, %v4723_v25 }
 0x164   : > { %v2111_v38 = vpop.permute.xlu0 %2110 }
 0x165   : > { %v2070_v11 = vadd.f32 %v2066_v8, %v2046_v49 }
 0x166   : > { %v2059_v12 = vpop.permute.xlu1 %2058 }
 0x167   : > { %v2067_v13 = vmul.f32 %v2059_v12, %v4723_v25  ;;  %v2094_v14 = vadd.f32 %v2090_v2, %v2070_v11 }
 0x169   : > { %v2071_v18 = vadd.f32 %v2067_v13, %v2047_v62 }
 0x16b   : > { %v2075_v20 = vpop.permute.xlu1 %2074 }
 0x16c   : > { %v2089_v23 = vmul.f32 %v2075_v20, %v4727_v34 }
 0x16e   : > { %v2093_v26 = vadd.f32 %v2089_v23, %v2069_v22 }
 0x16f   : > { %v2083_v27 = vpop.permute.xlu1 %2082 }
 0x170   : > { %v2091_v30 = vmul.f32 %v2083_v27, %v4727_v34  ;;  %v4768_v31 = vsub.f32 %v2093_v26, %v2099_v24  ;;  %v4206_v24 = vmov 0.0  }
 0x172   : > { %v4772_v33 = vmul.f32 %v4103_v32, %v4768_v31  ;;  %v2095_v39 = vadd.f32 %v2091_v30, %v2071_v18  ;;  %vm2269_vm8 = vcmp.lt.f32.partialorder %v4768_v31, 0.0  ;;  %vm2245_vm9 = vcmp.ge.f32.partialorder %v4768_v31, 0.0 }
 0x173   : > { %v2087_v35 = vpop.permute.xlu1 %2086  ;;  %vm2265_vm11 = vcmp.gt.f32.partialorder %v4768_v31, 0.0 }
 0x174   : > { %v4778_v17 = vand.u32 2147483647, %v4772_v33  ;;  %v2092_v25 = vmul.f32 %v2087_v35, %v4727_v34  ;;  %vm2233_vm10 = vcmp.lt.f32.partialorder %v4772_v33, 0.0 }
 0x176   : > { %v2145_v40 = vmax.f32 %v4778_v17, 1e-30  ;;  %v2096_v41 = vadd.f32 %v2092_v25, %v2072_v37  ;;  %v2153_v42 = vadd.f32 1.0, %v4778_v17  ;;  %v3612_v58 = vadd.f32 -1.0, %v4778_v17 }
 0x177   : > { %vm2141_vm4 = vcmp.gt.f32.partialorder %v4778_v17, 0.41421357  ;;  %vm2137_vm5 = vcmp.gt.f32.partialorder %v4778_v17, 2.4142137  ;;  %v2273_v25 = vsel %vm2269_vm8, -1.5707964, %v4206_v24 }
 0x178   : > { %4110 = vrcp.f32 %v2145_v40  ;;  %v4783_v44 = vsub.f32 %v2096_v41, %v2111_v38  ;;  %v2103_v45 = vpop.permute.xlu1 %2102  ;;  %v2221_v26 = vsel %vm2141_vm4, 0.7853982, %v4206_v24  ;;  %v2277_v33 = vsel %vm2265_vm11, 1.5707964, %v2273_v25  ;;  %v3668_v25 = vld [vmem:[%s4713_s21 + $0xb0] sm:$0xf] }
 0x179   : > { %4112 = vrcp.f32 %v2153_v42  ;;  %v4785_v48 = vsub.f32 %v2094_v14, %v2103_v45  ;;  %v2225_v30 = vsel %vm2137_vm5, 1.5707964, %v2221_v26 }
 0x17a   : > { %v4788_v49 = vmul.f32 %v4105_v43, %v4783_v44  ;;  %vm2272_vm13 = vcmp.lt.f32.partialorder %v4783_v44, 0.0 }
 0x17b   : > { %v4791_v34 = vmul.f32 %v4107_v46, %v4785_v48  ;;  %vm2246_vm15 = vcmp.ge.f32.partialorder %v4785_v48, 0.0 }
 0x17c   : > { %v4794_v50 = vand.u32 2147483647, %v4788_v49  ;;  %v2107_v52 = vpop.permute.xlu1 %2106  ;;  %vm2236_vm8 = vcmp.lt.f32.partialorder %v4788_v49, 0.0 }
 0x17d   : > { %v4798_v55 = vsub.f32 %v2095_v39, %v2107_v52  ;;  %v4207_v39 = vmov -3.1415927   ;;  %v2276_v52 = vsel %vm2272_vm13, -1.5707964, %v4206_v24 }
 0x17e   : > { %v2148_v51 = vmax.f32 %v4794_v50, 1e-30  ;;  %v2156_v54 = vadd.f32 1.0, %v4794_v50  ;;  %v3615_v5 = vadd.f32 -1.0, %v4794_v50  ;;  %vm2144_vm6 = vcmp.gt.f32.partialorder %v4794_v50, 0.41421357 }
 0x17f   : > { %v4802_v59 = vmul.f32 %v4109_v56, %v4798_v55  ;;  %vm2140_vm7 = vcmp.gt.f32.partialorder %v4794_v50, 2.4142137  ;;  %v2249_v40 = vsel %vm2245_vm9, 3.1415927, %v4207_v39 }
 0x180   : > { %4114 = vrcp.f32 %v2148_v51 }
 0x181   : > { %4116 = vrcp.f32 %v2156_v54  ;;  %v4844_v54 = vand.u32 2147483647, %v4791_v34 }
 0x182   : > { %v4111_v57 = vpop.eup %4110 }
 0x183   : > { %v4113_v60 = vpop.eup %4112  ;;  %v2161_v61 = vsub.f32 0.0, %v4111_v57  ;;  %v4846_v57 = vsel %vm2246_vm15, 3.1415927, %v4207_v39  ;;  %vm2142_vm9 = vcmp.gt.f32.partialorder %v4844_v54, 0.41421357  ;;  %vm2271_vm15 = vcmp.lt.f32.partialorder %v4798_v55, 0.0 }
 0x184   : > { %v2169_v62 = vmul.f32 %v4113_v60, %v3612_v58  ;;  %v2222_v60 = vsel %vm2142_vm9, 0.7853982, %v4206_v24 }
 0x186   : > { %v2173_v63 = vsel %vm2141_vm4, %v2169_v62, %v4778_v17  ;;  %v2224_v17 = vsel %vm2144_vm6, 0.7853982, %v4206_v24  ;;  %vm2248_vm4 = vcmp.ge.f32.partialorder %v4783_v44, 0.0 }
 0x187   : > { %v2177_v0 = vsel %vm2137_vm5, %v2161_v61, %v2173_v63  ;;  %v2228_v45 = vsel %vm2140_vm7, 1.5707964, %v2224_v17  ;;  %vm2268_vm5 = vcmp.gt.f32.partialorder %v4783_v44, 0.0  ;;  %v2252_v3 = vsel %vm2248_vm4, 3.1415927, %v4207_v39 }
 0x188   : > { %v2181_v1 = vmul.f32 %v2177_v0, %v2177_v0  ;;  %v2280_v58 = vsel %vm2268_vm5, 1.5707964, %v2276_v52 }
 0x18a   : > { %v4115_v2 = vpop.eup %4114  ;;  %v2185_v4 = vmul.f32 0.080537446, %v2181_v1 }
 0x18b   : > { %v4117_v6 = vpop.eup %4116  ;;  %v2164_v7 = vsub.f32 0.0, %v4115_v2 }
 0x18c   : > { %v3616_v8 = vadd.f32 -0.13877685, %v2185_v4  ;;  %v2172_v9 = vmul.f32 %v4117_v6, %v3615_v5  ;;  %v2146_v4 = vmax.f32 %v4844_v54, 1e-30 }
 0x18e   : > { %v2193_v11 = vmul.f32 %v3616_v8, %v2181_v1  ;;  %v2176_v12 = vsel %vm2144_vm6, %v2172_v9, %v4794_v50 }
 0x18f   : > { %v2180_v13 = vsel %vm2140_vm7, %v2164_v7, %v2176_v12  ;;  %vm2138_vm7 = vcmp.gt.f32.partialorder %v4844_v54, 2.4142137 }
 0x190   : > { %v2197_v14 = vadd.f32 0.19977711, %v2193_v11  ;;  %v2184_v15 = vmul.f32 %v2180_v13, %v2180_v13  ;;  %v4859_v63 = vsel %vm2138_vm7, 1.5707964, %v2222_v60 }
 0x192   : > { %v2201_v16 = vmul.f32 %v2197_v14, %v2181_v1  ;;  %v2188_v18 = vmul.f32 0.080537446, %v2184_v15 }
 0x194   : > { %v3620_v19 = vadd.f32 -0.3333295, %v2201_v16  ;;  %v3619_v20 = vadd.f32 -0.13877685, %v2188_v18  ;;  %v3628_v16 = vld [vmem:[%s4713_s21 + $0x10] sm:$0xf] }
 0x195   : > { %v3632_v18 = vld [vmem:[%s4713_s21 + $0x20] sm:$0xf] }
 0x196   : > { %v2209_v21 = vmul.f32 %v3620_v19, %v2181_v1  ;;  %v2196_v22 = vmul.f32 %v3619_v20, %v2184_v15  ;;  %v4865_v1 = vand.u32 2147483647, %v4802_v59  ;;  %v3636_v20 = vld [vmem:[%s4713_s21 + $0x30] sm:$0xf] }
 0x198   : > { %v2213_v23 = vmul.f32 %v2209_v21, %v2177_v0  ;;  %v2200_v27 = vadd.f32 0.19977711, %v2196_v22  ;;  %vm2143_vm11 = vcmp.gt.f32.partialorder %v4865_v1, 0.41421357  ;;  %vm2139_vm13 = vcmp.gt.f32.partialorder %v4865_v1, 2.4142137 }
 0x199   : > { %v2147_v9 = vmax.f32 %v4865_v1, 1e-30  ;;  %v2155_v12 = vadd.f32 1.0, %v4865_v1  ;;  %v2223_v14 = vsel %vm2143_vm11, 0.7853982, %v4206_v24 }
 0x19a   : > { %v2217_v28 = vadd.f32 %v2213_v23, %v2177_v0  ;;  %v2204_v29 = vmul.f32 %v2200_v27, %v2184_v15  ;;  %v2154_v0 = vadd.f32 1.0, %v4844_v54  ;;  %v4891_v19 = vsel %vm2139_vm13, 1.5707964, %v2223_v14  ;;  %v3640_v21 = vld [vmem:[%s4713_s21 + $0x40] sm:$0xf] }
 0x19b   : > { %v3644_v22 = vld [vmem:[%s4713_s21 + $0x50] sm:$0xf]  ;;  %v3648_v23 = vld [vmem:[%s4713_s21 + $0x60] sm:$0xf] }
 0x19c   : > { %v2229_v32 = vadd.f32 %v2225_v30, %v2217_v28  ;;  %v3623_v35 = vadd.f32 -0.3333295, %v2204_v29  ;;  %4118 = vrcp.f32 %v2154_v0  ;;  %v2275_v28 = vsel %vm2271_vm15, -1.5707964, %v4206_v24  ;;  %v3652_v29 = vld [vmem:[%s4713_s21 + $0x70] sm:$0xf] }
 0x19d   : > { %4120 = vrcp.f32 %v2146_v4  ;;  %v3656_v30 = vld [vmem:[%s4713_s21 + $0x80] sm:$0xf]  ;;  %v5067_v14 = vld [vmem:[%s4713_s21 + $0x310] sm:$0xf] }
 0x19e   : > { %v2237_v36 = vsub.f32 0.0, %v2229_v32  ;;  %v2212_v37 = vmul.f32 %v3623_v35, %v2184_v15  ;;  %v4908_v35 = vadd.f32 -1.0, %v4844_v54  ;;  %4122 = vrcp.f32 %v2147_v9  ;;  %v4963_v0 = vld [vmem:[%s4713_s21 + $0x180] sm:$0xf] }
 0x19f   : > { %4124 = vrcp.f32 %v2155_v12 }
 0x1a0   : > { %v2241_v38 = vsel %vm2233_vm10, %v2237_v36, %v2229_v32  ;;  %v2216_v41 = vmul.f32 %v2212_v37, %v2180_v13  ;;  %vm2270_vm10 = vcmp.lt.f32.partialorder %v4785_v48, 0.0  ;;  %v3660_v32 = vld [vmem:[%s4713_s21 + $0x90] sm:$0xf]  ;;  %v3664_v37 = vld [vmem:[%s4713_s21 + $0xa0] sm:$0xf] }
 0x1a1   : > { %v2257_v42 = vadd.f32 %v2249_v40, %v2241_v38  ;;  %v2274_v5 = vsel %vm2270_vm10, -1.5707964, %v4206_v24  ;;  %v3676_v24 = vld [vmem:[%s4713_s21 + $0xd0] sm:$0xf] }
 0x1a2   : > { %v2220_v43 = vadd.f32 %v2216_v41, %v2180_v13  ;;  %v3684_v40 = vld [vmem:[%s4713_s21 + $0xf0] sm:$0xf] }
 0x1a3   : > { %v2261_v31 = vsel %vm2253_vm12, %v2257_v42, %v2241_v38  ;;  %vm2247_vm12 = vcmp.ge.f32.partialorder %v4798_v55, 0.0  ;;  %v3672_v38 = vld [vmem:[%s4713_s21 + $0xc0] sm:$0xf]  ;;  %v3692_v41 = vld [vmem:[%s4713_s21 + $0x110] sm:$0xf] }
 0x1a4   : > { %v2281_v46 = vsel %vm2117_vm0, %v2277_v33, %v2261_v31  ;;  %v2232_v51 = vadd.f32 %v2228_v45, %v2220_v43  ;;  %vm2266_vm0 = vcmp.gt.f32.partialorder %v4785_v48, 0.0  ;;  %v4883_v15 = vsel %vm2247_vm12, 3.1415927, %v4207_v39  ;;  %v3680_v39 = vld [vmem:[%s4713_s21 + $0xe0] sm:$0xf] }
 0x1a5   : > { %vm2285_vm6 = vcmp.lt.f32.partialorder %v2281_v46, -3.010693  ;;  %v2289_v56 = vadd.f32 6.2831855, %v2281_v46  ;;  %v4871_v7 = vsel %vm2266_vm0, 1.5707964, %v2274_v5 }
 0x1a6   : > { %v2240_v50 = vsub.f32 0.0, %v2232_v51  ;;  %v3696_v43 = vld [vmem:[%s4713_s21 + $0x120] sm:$0xf]  ;;  %v3700_v31 = vld [vmem:[%s4713_s21 + $0x130] sm:$0xf] }
 0x1a7   : > { %v4851_v44 = vsel %vm2285_vm6, %v2289_v56, %v2281_v46  ;;  %v3704_v45 = vld [vmem:[%s4713_s21 + $0x140] sm:$0xf]  ;;  %v3708_v46 = vld [vmem:[%s4713_s21 + $0x150] sm:$0xf] }
 0x1a8   : > { %v3624_v61 = vadd.f32 3.010693, %v4851_v44  ;;  %v2244_v62 = vsel %vm2236_vm8, %v2240_v50, %v2232_v51  ;;  %v3712_v50 = vld [vmem:[%s4713_s21 + $0x160] sm:$0xf] }
 0x1a9   : > { %v2260_v49 = vadd.f32 %v2252_v3, %v2244_v62  ;;  %v3716_v3 = vld [vmem:[%s4713_s21 + $0x170] sm:$0xf] }
 0x1aa   : > { %v2301_v2 = vmul.f32 3.8197186, %v3624_v61 }
 0x1ab   : > { %v2264_v6 = vsel %vm2256_vm14, %v2260_v49, %v2244_v62  ;;  %v3792_v49 = vld [vmem:[%s4713_s21 + $0x2a0] sm:$0xf] }
 0x1ac   : > { %v2305_v48 = vfloor.f32 %v2301_v2  ;;  %v2284_v8 = vsel %vm2120_vm1, %v2280_v58, %v2264_v6  ;;  %vm2267_vm1 = vcmp.gt.f32.partialorder %v4798_v55, 0.0  ;;  %v3688_v55 = vld [vmem:[%s4713_s21 + $0x100] sm:$0xf]  ;;  %v4966_v2 = vld [vmem:[%s4713_s21 + $0x190] sm:$0xf] }
 0x1ad   : > { %vm2288_vm14 = vcmp.lt.f32.partialorder %v2284_v8, -3.010693  ;;  %v2292_v11 = vadd.f32 6.2831855, %v2284_v8  ;;  %v4912_v36 = vsel %vm2267_vm1, 1.5707964, %v2275_v28 }
 0x1ae   : > { %v2309_v13 = vmax.f32 %v2305_v48, 0.0  ;;  %v3728_v48 = vld [vmem:[%s4713_s21 + $0x1a0] sm:$0xf] }
 0x1af   : > { %v4901_v27 = vsel %vm2288_vm14, %v2292_v11, %v2284_v8  ;;  %v3732_v8 = vld [vmem:[%s4713_s21 + $0x1b0] sm:$0xf] }
 0x1b0   : > { %v4898_v26 = vmin.f32 %v2309_v13, 23.0  ;;  %v4935_v33 = vadd.f32 3.010693, %v4901_v27 }
 0x1b2   : > { %vm2329_vm4 = vcmp.eq.f32.partialorder %v4898_v26, 0.0  ;;  %vm2372_vm5 = vcmp.eq.f32.partialorder %v4898_v26, 1.0  ;;  %vm2416_vm6 = vcmp.eq.f32.partialorder %v4898_v26, 2.0  ;;  %v4926_v17 = vmul.f32 0.2617994, %v4898_v26 }
 0x1b3   : > { %vm4928_vm8 = vmpackc.low %vm2329_vm4, %vm2329_vm4  ;;  %vm2460_vm0 = vcmp.eq.f32.partialorder %v4898_v26, 3.0  ;;  %vm2504_vm10 = vcmp.eq.f32.partialorder %v4898_v26, 4.0  ;;  %vm2548_vm14 = vcmp.eq.f32.partialorder %v4898_v26, 5.0  ;;  %vm2592_vm4 = vcmp.eq.f32.partialorder %v4898_v26, 6.0 }
 0x1b4   : > { %v2341_v51 = vsel %vm4928_vm8, %v2333_v10, 0  ;;  %v2350_v52 = vsel %vm4928_vm8, %v3628_v16, 0  ;;  %v2359_v56 = vsel %vm4928_vm8, %v3632_v18, 0  ;;  %vm2381_vm12 = vmpackc.low %vm2372_vm5, %vm2372_vm5  ;;  %v2368_v58 = vsel %vm4928_vm8, %v3636_v20, 0  ;;  %v3736_v10 = vld [vmem:[%s4713_s21 + $0x1c0] sm:$0xf] }
 0x1b5   : > { %v2385_v60 = vsel %vm2381_vm12, %v3640_v21, %v2341_v51  ;;  %v2394_v61 = vsel %vm2381_vm12, %v3644_v22, %v2350_v52  ;;  %v2403_v62 = vsel %vm2381_vm12, %v3648_v23, %v2359_v56  ;;  %vm4958_vm1 = vmpackc.low %vm2416_vm6, %vm2416_vm6  ;;  %v2412_v4 = vsel %vm2381_vm12, %v3652_v29, %v2368_v58  ;;  %v3740_v16 = vld [vmem:[%s4713_s21 + $0x1d0] sm:$0xf]  ;;  %v3744_v18 = vld [vmem:[%s4713_s21 + $0x1e0] sm:$0xf] }
 0x1b6   : > { %v2429_v5 = vsel %vm4958_vm1, %v3656_v30, %v2385_v60  ;;  %v2438_v6 = vsel %vm4958_vm1, %v3660_v32, %v2394_v61  ;;  %vm2469_vm15 = vmpackc.low %vm2460_vm0, %vm2460_vm0  ;;  %v2447_v9 = vsel %vm4958_vm1, %v3664_v37, %v2403_v62  ;;  %v2456_v11 = vsel %vm4958_vm1, %v3668_v25, %v2412_v4  ;;  %v3748_v20 = vld [vmem:[%s4713_s21 + $0x1f0] sm:$0xf]  ;;  %v5004_v30 = vpop.eup %4118  ;;  %v3752_v32 = vld [vmem:[%s4713_s21 + $0x200] sm:$0xf] }
 0x1b7   : > { %v2473_v12 = vsel %vm2469_vm15, %v3672_v38, %v2429_v5  ;;  %v2482_v13 = vsel %vm2469_vm15, %v3676_v24, %v2438_v6  ;;  %vm4985_vm5 = vmpackc.low %vm2504_vm10, %vm2504_vm10  ;;  %v2491_v21 = vsel %vm2469_vm15, %v3680_v39, %v2447_v9  ;;  %v2500_v22 = vsel %vm2469_vm15, %v3684_v40, %v2456_v11  ;;  %v3756_v37 = vld [vmem:[%s4713_s21 + $0x210] sm:$0xf]  ;;  %v3760_v25 = vld [vmem:[%s4713_s21 + $0x220] sm:$0xf]  ;;  %v5025_v42 = vpop.eup %4120 }
 0x1b8   : > { %v2517_v23 = vsel %vm4985_vm5, %v3688_v55, %v2473_v12  ;;  %v2526_v28 = vsel %vm4985_vm5, %v3692_v41, %v2482_v13  ;;  %vm5000_vm6 = vmpackc.low %vm2548_vm14, %vm2548_vm14  ;;  %v3764_v38 = vld [vmem:[%s4713_s21 + $0x230] sm:$0xf]  ;;  %v2535_v24 = vsel %vm4985_vm5, %v3696_v43, %v2491_v21  ;;  %v2544_v39 = vsel %vm4985_vm5, %v3700_v31, %v2500_v22  ;;  %v3768_v43 = vld [vmem:[%s4713_s21 + $0x240] sm:$0xf]  ;;  %v5041_v60 = vpop.eup %4122 }
 0x1b9   : > { %v2561_v40 = vsel %vm5000_vm6, %v3704_v45, %v2517_v23  ;;  %v2570_v55 = vsel %vm5000_vm6, %v3708_v46, %v2526_v28  ;;  %vm5021_vm8 = vmpackc.low %vm2592_vm4, %vm2592_vm4  ;;  %v3772_v51 = vld [vmem:[%s4713_s21 + $0x250] sm:$0xf]  ;;  %v3776_v31 = vld [vmem:[%s4713_s21 + $0x260] sm:$0xf]  ;;  %v2579_v45 = vsel %vm5000_vm6, %v3712_v50, %v2535_v24  ;;  %v2588_v46 = vsel %vm5000_vm6, %v3716_v3, %v2544_v39 }
 0x1ba   : > { %v3780_v52 = vld [vmem:[%s4713_s21 + $0x270] sm:$0xf]  ;;  %v2605_v56 = vsel %vm5021_vm8, %v4963_v0, %v2561_v40  ;;  %v2614_v58 = vsel %vm5021_vm8, %v4966_v2, %v2570_v55  ;;  %v3784_v61 = vld [vmem:[%s4713_s21 + $0x280] sm:$0xf]  ;;  %v2623_v50 = vsel %vm5021_vm8, %v3728_v48, %v2579_v45  ;;  %v2632_v3 = vsel %vm5021_vm8, %v3732_v8, %v2588_v46  ;;  %v5053_v0 = vpop.eup %4124 }
 0x1bb   : > { %v3788_v62 = vld [vmem:[%s4713_s21 + $0x290] sm:$0xf]  ;;  %vm2636_vm0 = vcmp.eq.f32.partialorder %v4898_v26, 7.0  ;;  %vm2680_vm10 = vcmp.eq.f32.partialorder %v4898_v26, 8.0  ;;  %v3800_v2 = vld [vmem:[%s4713_s21 + $0x2c0] sm:$0xf] }
 0x1bc   : > { %v3796_v4 = vld [vmem:[%s4713_s21 + $0x2b0] sm:$0xf]  ;;  %vm2645_vm12 = vmpackc.low %vm2636_vm0, %vm2636_vm0  ;;  %vm2724_vm14 = vcmp.eq.f32.partialorder %v4898_v26, 9.0  ;;  %vm2768_vm1 = vcmp.eq.f32.partialorder %v4898_v26, 10.0  ;;  %vm2812_vm15 = vcmp.eq.f32.partialorder %v4898_v26, 11.0  ;;  %vm2856_vm4 = vcmp.eq.f32.partialorder %v4898_v26, 12.0 }
 0x1bd   : > { %v3804_v5 = vld [vmem:[%s4713_s21 + $0x2d0] sm:$0xf]  ;;  %v3808_v6 = vld [vmem:[%s4713_s21 + $0x2e0] sm:$0xf]  ;;  %v2649_v8 = vsel %vm2645_vm12, %v3736_v10, %v2605_v56  ;;  %v2658_v9 = vsel %vm2645_vm12, %v3740_v16, %v2614_v58  ;;  %v2667_v11 = vsel %vm2645_vm12, %v3744_v18, %v2623_v50  ;;  %v2676_v12 = vsel %vm2645_vm12, %v3748_v20, %v2632_v3  ;;  %vm2689_vm5 = vmpackc.low %vm2680_vm10, %vm2680_vm10 }
 0x1be   : > { %v3812_v48 = vld [vmem:[%s4713_s21 + $0x2f0] sm:$0xf]  ;;  %v5064_v13 = vld [vmem:[%s4713_s21 + $0x300] sm:$0xf]  ;;  %v2693_v21 = vsel %vm2689_vm5, %v3752_v32, %v2649_v8  ;;  %v2702_v22 = vsel %vm2689_vm5, %v3756_v37, %v2658_v9  ;;  %v2711_v23 = vsel %vm2689_vm5, %v3760_v25, %v2667_v11  ;;  %v2720_v28 = vsel %vm2689_vm5, %v3764_v38, %v2676_v12  ;;  %vm2733_vm6 = vmpackc.low %vm2724_vm14, %vm2724_vm14 }
 0x1bf   : > { %v3824_v10 = vld [vmem:[%s4713_s21 + $0x320] sm:$0xf]  ;;  %v3828_v16 = vld [vmem:[%s4713_s21 + $0x330] sm:$0xf]  ;;  %v2737_v18 = vsel %vm2733_vm6, %v3768_v43, %v2693_v21  ;;  %v2746_v20 = vsel %vm2733_vm6, %v3772_v51, %v2702_v22  ;;  %v2755_v29 = vsel %vm2733_vm6, %v3776_v31, %v2711_v23  ;;  %v2764_v24 = vsel %vm2733_vm6, %v3780_v52, %v2720_v28  ;;  %vm5077_vm8 = vmpackc.low %vm2768_vm1, %vm2768_vm1 }
 0x1c0   : > { %v3832_v37 = vld [vmem:[%s4713_s21 + $0x340] sm:$0xf]  ;;  %v3836_v25 = vld [vmem:[%s4713_s21 + $0x350] sm:$0xf]  ;;  %v2781_v40 = vsel %vm5077_vm8, %v3784_v61, %v2737_v18  ;;  %v2790_v55 = vsel %vm5077_vm8, %v3788_v62, %v2746_v20  ;;  %v2799_v41 = vsel %vm5077_vm8, %v3792_v49, %v2755_v29  ;;  %v2808_v43 = vsel %vm5077_vm8, %v3796_v4, %v2764_v24  ;;  %vm2821_vm0 = vmpackc.low %vm2812_vm15, %vm2812_vm15 }
 0x1c1   : > { %v3840_v38 = vld [vmem:[%s4713_s21 + $0x360] sm:$0xf]  ;;  %v3844_v39 = vld [vmem:[%s4713_s21 + $0x370] sm:$0xf]  ;;  %v2825_v46 = vsel %vm2821_vm0, %v3800_v2, %v2781_v40  ;;  %v2834_v56 = vsel %vm2821_vm0, %v3804_v5, %v2790_v55  ;;  %v2843_v58 = vsel %vm2821_vm0, %v3808_v6, %v2799_v41  ;;  %v2852_v61 = vsel %vm2821_vm0, %v3812_v48, %v2808_v43  ;;  %vm5103_vm10 = vmpackc.low %vm2856_vm4, %vm2856_vm4 }
 0x1c2   : > { %v3848_v51 = vld [vmem:[%s4713_s21 + $0x380] sm:$0xf]  ;;  %v3852_v31 = vld [vmem:[%s4713_s21 + $0x390] sm:$0xf]  ;;  %v2869_v2 = vsel %vm5103_vm10, %v5064_v13, %v2825_v46  ;;  %v2878_v5 = vsel %vm5103_vm10, %v5067_v14, %v2834_v56  ;;  %v2887_v6 = vsel %vm5103_vm10, %v3824_v10, %v2843_v58  ;;  %v2896_v48 = vsel %vm5103_vm10, %v3828_v16, %v2852_v61 }
 0x1c3   : > { %v3856_v52 = vld [vmem:[%s4713_s21 + $0x3a0] sm:$0xf]  ;;  %v3860_v45 = vld [vmem:[%s4713_s21 + $0x3b0] sm:$0xf]  ;;  %vm2900_vm12 = vcmp.eq.f32.partialorder %v4898_v26, 13.0  ;;  %vm2944_vm14 = vcmp.eq.f32.partialorder %v4898_v26, 14.0 }
 0x1c4   : > { %v3864_v49 = vld [vmem:[%s4713_s21 + $0x3c0] sm:$0xf]  ;;  %v3868_v4 = vld [vmem:[%s4713_s21 + $0x3d0] sm:$0xf]  ;;  %vm2988_vm1 = vcmp.eq.f32.partialorder %v4898_v26, 15.0  ;;  %vm3032_vm15 = vcmp.eq.f32.partialorder %v4898_v26, 16.0  ;;  %vm2909_vm4 = vmpackc.low %vm2900_vm12, %vm2900_vm12 }
 0x1c5   : > { %v3872_v50 = vld [vmem:[%s4713_s21 + $0x3e0] sm:$0xf]  ;;  %v3876_v3 = vld [vmem:[%s4713_s21 + $0x3f0] sm:$0xf]  ;;  %vm3076_vm5 = vcmp.eq.f32.partialorder %v4898_v26, 17.0  ;;  %vm3120_vm6 = vcmp.eq.f32.partialorder %v4898_v26, 18.0  ;;  %v2913_v18 = vsel %vm2909_vm4, %v3832_v37, %v2869_v2  ;;  %v2922_v20 = vsel %vm2909_vm4, %v3836_v25, %v2878_v5  ;;  %vm2953_vm10 = vmpackc.low %vm2944_vm14, %vm2944_vm14 }
 0x1c6   : > { %v3880_v8 = vld [vmem:[%s4713_s21 + $0x400] sm:$0xf]  ;;  %v3884_v9 = vld [vmem:[%s4713_s21 + $0x410] sm:$0xf]  ;;  %vm3164_vm8 = vcmp.eq.f32.partialorder %v4898_v26, 19.0  ;;  %vm3208_vm0 = vcmp.eq.f32.partialorder %v4898_v26, 20.0  ;;  %v2931_v29 = vsel %vm2909_vm4, %v3840_v38, %v2887_v6  ;;  %v2940_v24 = vsel %vm2909_vm4, %v3844_v39, %v2896_v48  ;;  %vm2997_vm12 = vmpackc.low %vm2988_vm1, %vm2988_vm1 }
 0x1c7   : > { %v3888_v11 = vld [vmem:[%s4713_s21 + $0x420] sm:$0xf]  ;;  %v3892_v12 = vld [vmem:[%s4713_s21 + $0x430] sm:$0xf]  ;;  %v2957_v55 = vsel %vm2953_vm10, %v3848_v51, %v2913_v18  ;;  %v2966_v41 = vsel %vm2953_vm10, %v3852_v31, %v2922_v20  ;;  %v2975_v43 = vsel %vm2953_vm10, %v3856_v52, %v2931_v29  ;;  %v2984_v46 = vsel %vm2953_vm10, %v3860_v45, %v2940_v24  ;;  %vm3041_vm14 = vmpackc.low %vm3032_vm15, %vm3032_vm15 }
 0x1c8   : > { %v3896_v13 = vld [vmem:[%s4713_s21 + $0x440] sm:$0xf]  ;;  %v3900_v14 = vld [vmem:[%s4713_s21 + $0x450] sm:$0xf]  ;;  %v3001_v38 = vsel %vm2997_vm12, %v3864_v49, %v2957_v55  ;;  %v3010_v39 = vsel %vm2997_vm12, %v3868_v4, %v2966_v41  ;;  %v3019_v56 = vsel %vm2997_vm12, %v3872_v50, %v2975_v43  ;;  %v3028_v58 = vsel %vm2997_vm12, %v3876_v3, %v2984_v46  ;;  %vm3085_vm1 = vmpackc.low %vm3076_vm5, %vm3076_vm5 }
 0x1c9   : > { %v3904_v21 = vld [vmem:[%s4713_s21 + $0x460] sm:$0xf]  ;;  %v3908_v22 = vld [vmem:[%s4713_s21 + $0x470] sm:$0xf]  ;;  %v3045_v52 = vsel %vm3041_vm14, %v3880_v8, %v3001_v38  ;;  %v3054_v45 = vsel %vm3041_vm14, %v3884_v9, %v3010_v39  ;;  %v3063_v61 = vsel %vm3041_vm14, %v3888_v11, %v3019_v56  ;;  %v3072_v62 = vsel %vm3041_vm14, %v3892_v12, %v3028_v58  ;;  %vm3129_vm15 = vmpackc.low %vm3120_vm6, %vm3120_vm6 }
 0x1ca   : > { %v3912_v23 = vld [vmem:[%s4713_s21 + $0x480] sm:$0xf]  ;;  %v3916_v28 = vld [vmem:[%s4713_s21 + $0x490] sm:$0xf]  ;;  %v3089_v50 = vsel %vm3085_vm1, %v3896_v13, %v3045_v52  ;;  %v3098_v3 = vsel %vm3085_vm1, %v3900_v14, %v3054_v45  ;;  %v3107_v2 = vsel %vm3085_vm1, %v3904_v21, %v3063_v61  ;;  %v3116_v5 = vsel %vm3085_vm1, %v3908_v22, %v3072_v62  ;;  %vm3173_vm4 = vmpackc.low %vm3164_vm8, %vm3164_vm8 }
 0x1cb   : > { %v3920_v10 = vld [vmem:[%s4713_s21 + $0x4a0] sm:$0xf]  ;;  %v3924_v16 = vld [vmem:[%s4713_s21 + $0x4b0] sm:$0xf]  ;;  %v3133_v48 = vsel %vm3129_vm15, %v3912_v23, %v3089_v50  ;;  %v3142_v8 = vsel %vm3129_vm15, %v3916_v28, %v3098_v3  ;;  %vm5173_vm5 = vmpackc.low %vm3208_vm0, %vm3208_vm0  ;;  %vm3252_vm6 = vcmp.eq.f32.partialorder %v4898_v26, 21.0  ;;  %vm3296_vm8 = vcmp.eq.f32.partialorder %v4898_v26, 22.0 }
 0x1cc   : > { %v3928_v32 = vld [vmem:[%s4713_s21 + $0x4c0] sm:$0xf]  ;;  %v3932_v40 = vld [vmem:[%s4713_s21 + $0x4d0] sm:$0xf]  ;;  %v3151_v9 = vsel %vm3129_vm15, %v3920_v10, %v3107_v2  ;;  %v3160_v11 = vsel %vm3129_vm15, %v3924_v16, %v3116_v5  ;;  %vm3340_vm0 = vcmp.eq.f32.partialorder %v4898_v26, 23.0  ;;  %vm3261_vm10 = vmpackc.low %vm3252_vm6, %vm3252_vm6  ;;  %v2170_v46 = vmul.f32 %v5004_v30, %v4908_v35 }
 0x1cd   : > { %v3936_v37 = vld [vmem:[%s4713_s21 + $0x4e0] sm:$0xf]  ;;  %v3940_v25 = vld [vmem:[%s4713_s21 + $0x4f0] sm:$0xf]  ;;  %v3177_v14 = vsel %vm3173_vm4, %v3928_v32, %v3133_v48  ;;  %v3186_v21 = vsel %vm3173_vm4, %v3932_v40, %v3142_v8  ;;  %v2321_v40 = vadd.f32 -3.010693, %v4926_v17  ;;  %vm5199_vm12 = vmpackc.low %vm3296_vm8, %vm3296_vm8 }
 0x1ce   : > { %v3944_v51 = vld [vmem:[%s4713_s21 + $0x500] sm:$0xf]  ;;  %v3948_v31 = vld [vmem:[%s4713_s21 + $0x510] sm:$0xf]  ;;  %v3195_v22 = vsel %vm3173_vm4, %v3936_v37, %v3151_v9  ;;  %v3204_v18 = vsel %vm3173_vm4, %v3940_v25, %v3160_v11  ;;  %v2304_v43 = vmul.f32 3.8197186, %v4935_v33  ;;  %vm5207_vm14 = vmpackc.low %vm3340_vm0, %vm3340_vm0  ;;  %v2174_v3 = vsel %vm2142_vm9, %v2170_v46, %v4844_v54 }
 0x1cf   : > { %v3952_v49 = vld [vmem:[%s4713_s21 + $0x520] sm:$0xf]  ;;  %v3956_v4 = vld [vmem:[%s4713_s21 + $0x530] sm:$0xf]  ;;  %v3221_v20 = vsel %vm5173_vm5, %v3944_v51, %v3177_v14  ;;  %v3230_v29 = vsel %vm5173_vm5, %v3948_v31, %v3186_v21  ;;  %v2162_v30 = vsub.f32 0.0, %v5025_v42  ;;  %v3614_v51 = vadd.f32 -1.0, %v4865_v1 }
 0x1d0   : > { %v3960_v6 = vld [vmem:[%s4713_s21 + $0x540] sm:$0xf]  ;;  %v3964_v12 = vld [vmem:[%s4713_s21 + $0x550] sm:$0xf]  ;;  %v3239_v24 = vsel %vm5173_vm5, %v3952_v49, %v3195_v22  ;;  %v3248_v32 = vsel %vm5173_vm5, %v3956_v4, %v3204_v18  ;;  %v2325_v31 = vsub.f32 %v4851_v44, %v2321_v40  ;;  %v2308_v50 = vfloor.f32 %v2304_v43  ;;  %v3631_v14 = vld [vmem:[%s4713_s21 + $0x1c] sm:$0xf] }
 0x1d1   : > { %v3968_v13 = vld [vmem:[%s4713_s21 + $0x560] sm:$0xf]  ;;  %v3972_v28 = vld [vmem:[%s4713_s21 + $0x570] sm:$0xf]  ;;  %v3265_v38 = vsel %vm3261_vm10, %v3960_v6, %v3221_v20  ;;  %v3274_v17 = vsel %vm3261_vm10, %v3964_v12, %v3230_v29  ;;  %v2171_v44 = vmul.f32 %v5053_v0, %v3614_v51  ;;  %v5233_v48 = vsel %vm2138_vm7, %v2162_v30, %v2174_v3  ;;  %v3635_v54 = vld [vmem:[%s4713_s21 + $0x2c] sm:$0xf] }
 0x1d2   : > { %v3984_v10 = vld [vmem:[%s4713_s21 + $0x5a0] sm:$0xf]  ;;  %v3988_v16 = vld [vmem:[%s4713_s21 + $0x5b0] sm:$0xf]  ;;  %v3283_v39 = vsel %vm3261_vm10, %v3968_v13, %v3239_v24  ;;  %v3292_v56 = vsel %vm3261_vm10, %v3972_v28, %v3248_v32  ;;  %v2312_v9 = vmax.f32 %v2308_v50, 0.0  ;;  %v2163_v11 = vsub.f32 0.0, %v5041_v60 }
 0x1d3   : > { %v4000_v55 = vld [vmem:[%s4713_s21 + $0x5e0] sm:$0xf]  ;;  %v4004_v41 = vld [vmem:[%s4713_s21 + $0x5f0] sm:$0xf]  ;;  %v3327_v26 = vsel %vm5199_vm12, %v3984_v10, %v3283_v39  ;;  %v3336_v33 = vsel %vm5199_vm12, %v3988_v16, %v3292_v56  ;;  %v2336_v13 = vld [vmem:[%s4713_s21 + $0xc] sm:$0xf]  ;;  %v5245_v21 = vmul.f32 %v5233_v48, %v5233_v48  ;;  %v2175_v22 = vsel %vm2143_vm11, %v2171_v44, %v4865_v1 }
 0x1d4   : > { %v3976_v37 = vld [vmem:[%s4713_s21 + $0x580] sm:$0xf]  ;;  %v3980_v25 = vld [vmem:[%s4713_s21 + $0x590] sm:$0xf]  ;;  %v3371_v52 = vsel %vm5207_vm14, %v4000_v55, %v3327_v26  ;;  %v3380_v45 = vsel %vm5207_vm14, %v4004_v41, %v3336_v33  ;;  %v3639_v60 = vld [vmem:[%s4713_s21 + $0x3c] sm:$0xf]  ;;  %v5267_v43 = vsel %vm2139_vm13, %v2163_v11, %v2175_v22 }
 0x1d5   : > { %v3992_v61 = vld [vmem:[%s4713_s21 + $0x5c0] sm:$0xf]  ;;  %v3996_v62 = vld [vmem:[%s4713_s21 + $0x5d0] sm:$0xf]  ;;  %v3309_v49 = vsel %vm5199_vm12, %v3976_v37, %v3265_v38  ;;  %v3318_v42 = vsel %vm5199_vm12, %v3980_v25, %v3274_v17  ;;  %v3396_v4 = vunpack.c.l.bf16 %v3380_v45  ;;  %v3392_v5 = vunpack.c.l.bf16 %v3371_v52  ;;  %v3643_v18 = vld [vmem:[%s4713_s21 + $0x4c] sm:$0xf] }
 0x1d6   : > { %v5229_v2 = vld [vmem:[%s4705_s16] sm:$0xff]  ;;  %v3353_v8 = vsel %vm5207_vm14, %v3992_v61, %v3309_v49  ;;  %v3362_v0 = vsel %vm5207_vm14, %v3996_v62, %v3318_v42  ;;  %v3647_v23 = vld [vmem:[%s4713_s21 + $0x5c] sm:$0xf]  ;;  %v5254_v28 = vmin.f32 %v2312_v9, 23.0  ;;  %v3651_v29 = vld [vmem:[%s4713_s21 + $0x6c] sm:$0xf] }
 0x1d7   : > { %v3400_v6 = vmul.f32 %v3396_v4, %v2325_v31  ;;  %vm3428_vm7 = vcmp.ne.f32.partialorder %v5229_v2, 0.0  ;;  %v3384_v10 = vunpack.c.l.bf16 %v3353_v8  ;;  %v3388_v16 = vunpack.c.l.bf16 %v3362_v0  ;;  %v3655_v24 = vld [vmem:[%s4713_s21 + $0x7c] sm:$0xf]  ;;  %v3659_v32 = vld [vmem:[%s4713_s21 + $0x8c] sm:$0xf]  ;;  %v3436_v4 = vld [vmem:[#allocation2] sm:$0xff] }
 0x1d8   : > { %v3663_v40 = vld [vmem:[%s4713_s21 + $0x9c] sm:$0xf]  ;;  %v3667_v55 = vld [vmem:[%s4713_s21 + $0xac] sm:$0xf]  ;;  %vm2332_vm9 = vcmp.eq.f32.partialorder %v5254_v28, 0.0  ;;  %vm2375_vm11 = vcmp.eq.f32.partialorder %v5254_v28, 1.0 }
 0x1d9   : > { %v3404_v12 = vadd.f32 %v3400_v6, %v3392_v5  ;;  %v3671_v41 = vld [vmem:[%s4713_s21 + $0xbc] sm:$0xf]  ;;  %vm2419_vm1 = vcmp.eq.f32.partialorder %v5254_v28, 2.0  ;;  %v3675_v37 = vld [vmem:[%s4713_s21 + $0xcc] sm:$0xf]  ;;  %vm5276_vm15 = vmpackc.low %vm2332_vm9, %vm2332_vm9  ;;  %vm2463_vm4 = vcmp.eq.f32.partialorder %v5254_v28, 3.0 }
 0x1da   : > { %v3679_v25 = vld [vmem:[%s4713_s21 + $0xdc] sm:$0xf]  ;;  %v3683_v38 = vld [vmem:[%s4713_s21 + $0xec] sm:$0xf]  ;;  %v5274_v39 = vmul.f32 0.2617994, %v5254_v28  ;;  %vm2384_vm13 = vmpackc.low %vm2375_vm11, %vm2375_vm11 }
 0x1db   : > { %v3408_v20 = vmul.f32 %v3404_v12, %v2325_v31  ;;  %v3687_v17 = vld [vmem:[%s4713_s21 + $0xfc] sm:$0xf]  ;;  %v5282_v1 = vmul.f32 0.080537446, %v5245_v21  ;;  %v3691_v58 = vld [vmem:[%s4713_s21 + $0x10c] sm:$0xf]  ;;  %vm5303_vm6 = vmpackc.low %vm2419_vm1, %vm2419_vm1 }
 0x1dc   : > { %v3695_v26 = vld [vmem:[%s4713_s21 + $0x11c] sm:$0xf]  ;;  %v2344_v33 = vsel %vm5276_vm15, %v2336_v13, 0  ;;  %v2353_v35 = vsel %vm5276_vm15, %v3631_v14, 0  ;;  %v2362_v30 = vsel %vm5276_vm15, %v3635_v54, 0  ;;  %vm2507_vm5 = vcmp.eq.f32.partialorder %v5254_v28, 4.0  ;;  %vm2472_vm0 = vmpackc.low %vm2463_vm4, %vm2463_vm4 }
 0x1dd   : > { %v3412_v46 = vadd.f32 %v3408_v20, %v3388_v16  ;;  %v3699_v52 = vld [vmem:[%s4713_s21 + $0x12c] sm:$0xf]  ;;  %v3703_v45 = vld [vmem:[%s4713_s21 + $0x13c] sm:$0xf]  ;;  %v2371_v61 = vsel %vm5276_vm15, %v3639_v60, 0  ;;  %v2388_v62 = vsel %vm2384_vm13, %v3643_v18, %v2344_v33  ;;  %v2397_v49 = vsel %vm2384_vm13, %v3647_v23, %v2353_v35  ;;  %vm5330_vm10 = vmpackc.low %vm2507_vm5, %vm2507_vm5 }
 0x1de   : > { %v3711_v44 = vld [vmem:[%s4713_s21 + $0x15c] sm:$0xf]  ;;  %v2406_v50 = vsel %vm2384_vm13, %v3651_v29, %v2362_v30  ;;  %v2415_v3 = vsel %vm2384_vm13, %v3655_v24, %v2371_v61  ;;  %v2432_v5 = vsel %vm5303_vm6, %v3659_v32, %v2388_v62  ;;  %vm2551_vm8 = vcmp.eq.f32.partialorder %v5254_v28, 5.0  ;;  %v3715_v8 = vld [vmem:[%s4713_s21 + $0x16c] sm:$0xf] }
 0x1df   : > { %v3416_v51 = vmul.f32 %v3412_v46, %v2325_v31  ;;  %v3707_v31 = vld [vmem:[%s4713_s21 + $0x14c] sm:$0xf]  ;;  %v3719_v0 = vld [vmem:[%s4713_s21 + $0x17c] sm:$0xf]  ;;  %v2441_v9 = vsel %vm5303_vm6, %v3663_v40, %v2397_v49  ;;  %v2450_v11 = vsel %vm5303_vm6, %v3667_v55, %v2406_v50  ;;  %v2459_v12 = vsel %vm5303_vm6, %v3671_v41, %v2415_v3  ;;  %vm2560_vm12 = vmpackc.low %vm2551_vm8, %vm2551_vm8 }
 0x1e0   : > { %v3723_v13 = vld [vmem:[%s4713_s21 + $0x18c] sm:$0xf]  ;;  %v3727_v14 = vld [vmem:[%s4713_s21 + $0x19c] sm:$0xf]  ;;  %v2476_v60 = vsel %vm2472_vm0, %v3675_v37, %v2432_v5  ;;  %v2485_v18 = vsel %vm2472_vm0, %v3679_v25, %v2441_v9  ;;  %v2494_v23 = vsel %vm2472_vm0, %v3683_v38, %v2450_v11  ;;  %vm2595_vm14 = vcmp.eq.f32.partialorder %v5254_v28, 6.0 }
 0x1e1   : > { %v3420_v6 = vadd.f32 %v3416_v51, %v3384_v10  ;;  %v3731_v54 = vld [vmem:[%s4713_s21 + $0x1ac] sm:$0xf]  ;;  %v3735_v22 = vld [vmem:[%s4713_s21 + $0x1bc] sm:$0xf]  ;;  %v2503_v10 = vsel %vm2472_vm0, %v3687_v17, %v2459_v12  ;;  %v2520_v55 = vsel %vm5330_vm10, %v3691_v58, %v2476_v60  ;;  %v2529_v41 = vsel %vm5330_vm10, %v3695_v26, %v2485_v18  ;;  %vm5363_vm9 = vmpackc.low %vm2595_vm14, %vm2595_vm14 }
 0x1e2   : > { %v3739_v29 = vld [vmem:[%s4713_s21 + $0x1cc] sm:$0xf]  ;;  %v3743_v24 = vld [vmem:[%s4713_s21 + $0x1dc] sm:$0xf]  ;;  %v2538_v46 = vsel %vm5330_vm10, %v3699_v52, %v2494_v23  ;;  %v2547_v56 = vsel %vm5330_vm10, %v3703_v45, %v2503_v10  ;;  %v2564_v58 = vsel %vm2560_vm12, %v3707_v31, %v2520_v55  ;;  %v2573_v33 = vsel %vm2560_vm12, %v3711_v44, %v2529_v41 }
 0x1e3   : > { %v3432_v20 = vsel %vm3428_vm7, %v3420_v6, 0.0  ;;  %v3747_v32 = vld [vmem:[%s4713_s21 + $0x1ec] sm:$0xf]  ;;  %v3751_v40 = vld [vmem:[%s4713_s21 + $0x1fc] sm:$0xf]  ;;  %v2582_v52 = vsel %vm2560_vm12, %v3715_v8, %v2538_v46  ;;  %v2591_v61 = vsel %vm2560_vm12, %v3719_v0, %v2547_v56  ;;  %vm2639_vm7 = vcmp.eq.f32.partialorder %v5254_v28, 7.0 }
 0x1e4   : > { %v3440_v2 = vadd.f32 %v3436_v4, %v3432_v20  ;;  %v3755_v37 = vld [vmem:[%s4713_s21 + $0x20c] sm:$0xf]  ;;  %v3759_v25 = vld [vmem:[%s4713_s21 + $0x21c] sm:$0xf]  ;;  %vm2683_vm11 = vcmp.eq.f32.partialorder %v5254_v28, 8.0  ;;  %vm2727_vm1 = vcmp.eq.f32.partialorder %v5254_v28, 9.0  ;;  %v2608_v31 = vsel %vm5363_vm9, %v3723_v13, %v2564_v58  ;;  %vm2648_vm13 = vmpackc.low %vm2639_vm7, %vm2639_vm7 }
 0x1e5   : > { %v3763_v38 = vld [vmem:[%s4713_s21 + $0x22c] sm:$0xf]  ;;  %v3767_v17 = vld [vmem:[%s4713_s21 + $0x23c] sm:$0xf]  ;;  %vm2771_vm15 = vcmp.eq.f32.partialorder %v5254_v28, 10.0  ;;  %vm2815_vm4 = vcmp.eq.f32.partialorder %v5254_v28, 11.0  ;;  %v2617_v44 = vsel %vm5363_vm9, %v3727_v14, %v2573_v33  ;;  %v2626_v50 = vsel %vm5363_vm9, %v3731_v54, %v2582_v52  ;;  %vm5386_vm5 = vmpackc.low %vm2683_vm11, %vm2683_vm11 }
 0x1e6   : > { %v3771_v26 = vld [vmem:[%s4713_s21 + $0x24c] sm:$0xf]  ;;  %v3775_v35 = vld [vmem:[%s4713_s21 + $0x25c] sm:$0xf]  ;;  %3444 = vst [vmem:[#allocation2] sm:$0xff] %v3440_v2  ;;  %v2635_v3 = vsel %vm5363_vm9, %v3735_v22, %v2591_v61  ;;  %v2652_v8 = vsel %vm2648_vm13, %v3739_v29, %v2608_v31  ;;  %v2661_v0 = vsel %vm2648_vm13, %v3743_v24, %v2617_v44  ;;  %v2670_v9 = vsel %vm2648_vm13, %v3747_v32, %v2626_v50  ;;  %vm2736_vm6 = vmpackc.low %vm2727_vm1, %vm2727_vm1 }
 0x1e7   : > { %v3779_v30 = vld [vmem:[%s4713_s21 + $0x26c] sm:$0xf]  ;;  %v3783_v51 = vld [vmem:[%s4713_s21 + $0x27c] sm:$0xf]  ;;  %v2679_v11 = vsel %vm2648_vm13, %v3751_v40, %v2635_v3  ;;  %v2696_v54 = vsel %vm5386_vm5, %v3755_v37, %v2652_v8  ;;  %v2705_v22 = vsel %vm5386_vm5, %v3759_v25, %v2661_v0  ;;  %v2714_v60 = vsel %vm5386_vm5, %v3763_v38, %v2670_v9  ;;  %vm5410_vm8 = vmpackc.low %vm2771_vm15, %vm2771_vm15 }
 0x1e8   : > { %v3787_v62 = vld [vmem:[%s4713_s21 + $0x28c] sm:$0xf]  ;;  %v3791_v49 = vld [vmem:[%s4713_s21 + $0x29c] sm:$0xf]  ;;  %v2723_v18 = vsel %vm5386_vm5, %v3767_v17, %v2679_v11  ;;  %v2740_v29 = vsel %vm2736_vm6, %v3771_v26, %v2696_v54  ;;  %v2749_v24 = vsel %vm2736_vm6, %v3775_v35, %v2705_v22  ;;  %v2758_v32 = vsel %vm2736_vm6, %v3779_v30, %v2714_v60  ;;  %vm2824_vm0 = vmpackc.low %vm2815_vm4, %vm2815_vm4 }
 0x1e9   : > { %v3795_v42 = vld [vmem:[%s4713_s21 + $0x2ac] sm:$0xf]  ;;  %v3799_v4 = vld [vmem:[%s4713_s21 + $0x2bc] sm:$0xf]  ;;  %v2767_v40 = vsel %vm2736_vm6, %v3783_v51, %v2723_v18  ;;  %v2784_v25 = vsel %vm5410_vm8, %v3787_v62, %v2740_v29  ;;  %v2793_v38 = vsel %vm5410_vm8, %v3791_v49, %v2749_v24  ;;  %vm2859_vm10 = vcmp.eq.f32.partialorder %v5254_v28, 12.0 }
 0x1ea   : > { %v3803_v5 = vld [vmem:[%s4713_s21 + $0x2cc] sm:$0xf]  ;;  %v3807_v6 = vld [vmem:[%s4713_s21 + $0x2dc] sm:$0xf]  ;;  %v2802_v17 = vsel %vm5410_vm8, %v3795_v42, %v2758_v32  ;;  %v2811_v56 = vsel %vm5410_vm8, %v3799_v4, %v2767_v40  ;;  %vm2903_vm12 = vcmp.eq.f32.partialorder %v5254_v28, 13.0  ;;  %vm2947_vm14 = vcmp.eq.f32.partialorder %v5254_v28, 14.0  ;;  %vm5445_vm9 = vmpackc.low %vm2859_vm10, %vm2859_vm10 }
 0x1eb   : > { %v3811_v13 = vld [vmem:[%s4713_s21 + $0x2ec] sm:$0xf]  ;;  %v3815_v14 = vld [vmem:[%s4713_s21 + $0x2fc] sm:$0xf]  ;;  %v2828_v30 = vsel %vm2824_vm0, %v3803_v5, %v2784_v25  ;;  %v2837_v51 = vsel %vm2824_vm0, %v3807_v6, %v2793_v38  ;;  %vm2991_vm7 = vcmp.eq.f32.partialorder %v5254_v28, 15.0  ;;  %vm3035_vm11 = vcmp.eq.f32.partialorder %v5254_v28, 16.0  ;;  %vm2912_vm13 = vmpackc.low %vm2903_vm12, %vm2903_vm12 }
 0x1ec   : > { %v3819_v23 = vld [vmem:[%s4713_s21 + $0x30c] sm:$0xf]  ;;  %v3823_v10 = vld [vmem:[%s4713_s21 + $0x31c] sm:$0xf]  ;;  %v2846_v52 = vsel %vm2824_vm0, %v3811_v13, %v2802_v17  ;;  %v2855_v61 = vsel %vm2824_vm0, %v3815_v14, %v2811_v56  ;;  %vm3079_vm1 = vcmp.eq.f32.partialorder %v5254_v28, 17.0  ;;  %vm3123_vm15 = vcmp.eq.f32.partialorder %v5254_v28, 18.0  ;;  %vm2956_vm5 = vmpackc.low %vm2947_vm14, %vm2947_vm14 }
 0x1ed   : > { %v3827_v16 = vld [vmem:[%s4713_s21 + $0x32c] sm:$0xf]  ;;  %v3831_v20 = vld [vmem:[%s4713_s21 + $0x33c] sm:$0xf]  ;;  %vm3167_vm4 = vcmp.eq.f32.partialorder %v5254_v28, 19.0  ;;  %v2872_v0 = vsel %vm5445_vm9, %v3819_v23, %v2828_v30  ;;  %v2881_v9 = vsel %vm5445_vm9, %v3823_v10, %v2837_v51  ;;  %vm3000_vm6 = vmpackc.low %vm2991_vm7, %vm2991_vm7  ;;  %vm3211_vm14 = vcmp.eq.f32.partialorder %v5254_v28, 20.0 }
 0x1ee   : > { %v3835_v41 = vld [vmem:[%s4713_s21 + $0x34c] sm:$0xf]  ;;  %v3839_v46 = vld [vmem:[%s4713_s21 + $0x35c] sm:$0xf]  ;;  %v2890_v11 = vsel %vm5445_vm9, %v3827_v16, %v2846_v52  ;;  %v2899_v12 = vsel %vm5445_vm9, %v3831_v20, %v2855_v61  ;;  %vm3044_vm8 = vmpackc.low %vm3035_vm11, %vm3035_vm11  ;;  %vm3255_vm7 = vcmp.eq.f32.partialorder %v5254_v28, 21.0  ;;  %vm3299_vm9 = vcmp.eq.f32.partialorder %v5254_v28, 22.0 }
 0x1ef   : > { %v3843_v2 = vld [vmem:[%s4713_s21 + $0x36c] sm:$0xf]  ;;  %v3847_v37 = vld [vmem:[%s4713_s21 + $0x37c] sm:$0xf]  ;;  %v2916_v54 = vsel %vm2912_vm13, %v3835_v41, %v2872_v0  ;;  %v2925_v22 = vsel %vm2912_vm13, %v3839_v46, %v2881_v9  ;;  %vm3088_vm0 = vmpackc.low %vm3079_vm1, %vm3079_vm1  ;;  %v2183_v9 = vmul.f32 %v5267_v43, %v5267_v43  ;;  %vm3343_vm1 = vcmp.eq.f32.partialorder %v5254_v28, 23.0 }
 0x1f0   : > { %v3851_v58 = vld [vmem:[%s4713_s21 + $0x38c] sm:$0xf]  ;;  %v3855_v33 = vld [vmem:[%s4713_s21 + $0x39c] sm:$0xf]  ;;  %v2934_v60 = vsel %vm2912_vm13, %v3843_v2, %v2890_v11  ;;  %v2943_v18 = vsel %vm2912_vm13, %v3847_v37, %v2899_v12  ;;  %vm5492_vm10 = vmpackc.low %vm3123_vm15, %vm3123_vm15 }
 0x1f1   : > { %v3859_v26 = vld [vmem:[%s4713_s21 + $0x3ac] sm:$0xf]  ;;  %v3863_v35 = vld [vmem:[%s4713_s21 + $0x3bc] sm:$0xf]  ;;  %v2960_v16 = vsel %vm2956_vm5, %v3851_v58, %v2916_v54  ;;  %v2969_v20 = vsel %vm2956_vm5, %v3855_v33, %v2925_v22  ;;  %vm3176_vm12 = vmpackc.low %vm3167_vm4, %vm3167_vm4 }
 0x1f2   : > { %v3867_v62 = vld [vmem:[%s4713_s21 + $0x3cc] sm:$0xf]  ;;  %v3871_v49 = vld [vmem:[%s4713_s21 + $0x3dc] sm:$0xf]  ;;  %v2978_v29 = vsel %vm2956_vm5, %v3859_v26, %v2934_v60  ;;  %v2987_v24 = vsel %vm2956_vm5, %v3863_v35, %v2943_v18  ;;  %vm5521_vm11 = vmpackc.low %vm3211_vm14, %vm3211_vm14 }
 0x1f3   : > { %v3875_v45 = vld [vmem:[%s4713_s21 + $0x3ec] sm:$0xf]  ;;  %v3879_v42 = vld [vmem:[%s4713_s21 + $0x3fc] sm:$0xf]  ;;  %v3004_v55 = vsel %vm3000_vm6, %v3867_v62, %v2960_v16  ;;  %v3013_v41 = vsel %vm3000_vm6, %v3871_v49, %v2969_v20  ;;  %vm5534_vm15 = vmpackc.low %vm3255_vm7, %vm3255_vm7  ;;  %v3617_v16 = vadd.f32 -0.13877685, %v5282_v1 }
 0x1f4   : > { %v3883_v4 = vld [vmem:[%s4713_s21 + $0x40c] sm:$0xf]  ;;  %v3887_v31 = vld [vmem:[%s4713_s21 + $0x41c] sm:$0xf]  ;;  %v3022_v46 = vsel %vm3000_vm6, %v3875_v45, %v2978_v29  ;;  %v3031_v2 = vsel %vm3000_vm6, %v3879_v42, %v2987_v24  ;;  %vm5549_vm4 = vmpackc.low %vm3299_vm9, %vm3299_vm9  ;;  %vm2234_vm6 = vcmp.lt.f32.partialorder %v4791_v34, 0.0 }
 0x1f5   : > { %v3891_v44 = vld [vmem:[%s4713_s21 + $0x42c] sm:$0xf]  ;;  %v3895_v50 = vld [vmem:[%s4713_s21 + $0x43c] sm:$0xf]  ;;  %v3048_v38 = vsel %vm3044_vm8, %v3883_v4, %v3004_v55  ;;  %v3057_v17 = vsel %vm3044_vm8, %v3887_v31, %v3013_v41  ;;  %v2187_v55 = vmul.f32 0.080537446, %v2183_v9  ;;  %vm5563_vm13 = vmpackc.low %vm3343_vm1, %vm3343_vm1 }
 0x1f6   : > { %v3899_v5 = vld [vmem:[%s4713_s21 + $0x44c] sm:$0xf]  ;;  %v3903_v6 = vld [vmem:[%s4713_s21 + $0x45c] sm:$0xf]  ;;  %v3066_v56 = vsel %vm3044_vm8, %v3891_v44, %v3022_v46  ;;  %v3075_v58 = vsel %vm3044_vm8, %v3895_v50, %v3031_v2  ;;  %vm2235_vm8 = vcmp.lt.f32.partialorder %v4802_v59, 0.0 }
 0x1f7   : > { %v3907_v8 = vld [vmem:[%s4713_s21 + $0x46c] sm:$0xf]  ;;  %v3911_v13 = vld [vmem:[%s4713_s21 + $0x47c] sm:$0xf]  ;;  %v3092_v35 = vsel %vm3088_vm0, %v3899_v5, %v3048_v38  ;;  %v3101_v30 = vsel %vm3088_vm0, %v3903_v6, %v3057_v17 }
 0x1f8   : > { %v3915_v14 = vld [vmem:[%s4713_s21 + $0x48c] sm:$0xf]  ;;  %v3919_v23 = vld [vmem:[%s4713_s21 + $0x49c] sm:$0xf]  ;;  %v3110_v51 = vsel %vm3088_vm0, %v3907_v8, %v3066_v56  ;;  %v3119_v52 = vsel %vm3088_vm0, %v3911_v13, %v3075_v58  ;;  %v2324_v13 = vadd.f32 -3.010693, %v5274_v39 }
 0x1f9   : > { %v3923_v10 = vld [vmem:[%s4713_s21 + $0x4ac] sm:$0xf]  ;;  %v3927_v32 = vld [vmem:[%s4713_s21 + $0x4bc] sm:$0xf]  ;;  %v3136_v45 = vsel %vm5492_vm10, %v3915_v14, %v3092_v35  ;;  %v3145_v42 = vsel %vm5492_vm10, %v3919_v23, %v3101_v30  ;;  %v2194_v35 = vmul.f32 %v3617_v16, %v5245_v21  ;;  %v3618_v30 = vadd.f32 -0.13877685, %v2187_v55 }
 0x1fa   : > { %v3935_v40 = vld [vmem:[%s4713_s21 + $0x4dc] sm:$0xf]  ;;  %v3939_v37 = vld [vmem:[%s4713_s21 + $0x4ec] sm:$0xf]  ;;  %v3154_v4 = vsel %vm5492_vm10, %v3923_v10, %v3110_v51  ;;  %v3163_v31 = vsel %vm5492_vm10, %v3927_v32, %v3119_v52  ;;  %v2328_v56 = vsub.f32 %v4901_v27, %v2324_v13  ;;  %vm2254_vm0 = vcmp.lt.f32.partialorder %v4731_v47, 0.0 }
 0x1fb   : > { %v3943_v25 = vld [vmem:[%s4713_s21 + $0x4fc] sm:$0xf]  ;;  %v3931_v33 = vld [vmem:[%s4713_s21 + $0x4cc] sm:$0xf]  ;;  %v3189_v6 = vsel %vm3176_vm12, %v3935_v40, %v3145_v42  ;;  %v3198_v8 = vsel %vm3176_vm12, %v3939_v37, %v3154_v4  ;;  %vm2255_vm10 = vcmp.lt.f32.partialorder %v4736_v53, 0.0 }
 0x1fc   : > { %v3951_v26 = vld [vmem:[%s4713_s21 + $0x51c] sm:$0xf]  ;;  %v3955_v62 = vld [vmem:[%s4713_s21 + $0x52c] sm:$0xf]  ;;  %v3207_v0 = vsel %vm3176_vm12, %v3943_v25, %v3163_v31  ;;  %v3180_v14 = vsel %vm3176_vm12, %v3931_v33, %v3136_v45  ;;  %v3629_v37 = vld [vmem:[%s4713_s21 + $0x14] sm:$0xf] }
 0x1fd   : > { %v3959_v49 = vld [vmem:[%s4713_s21 + $0x53c] sm:$0xf]  ;;  %v3947_v44 = vld [vmem:[%s4713_s21 + $0x50c] sm:$0xf]  ;;  %v3233_v18 = vsel %vm5521_vm11, %v3951_v26, %v3189_v6  ;;  %v3242_v23 = vsel %vm5521_vm11, %v3955_v62, %v3198_v8  ;;  %v2198_v62 = vadd.f32 0.19977711, %v2194_v35 }
 0x1fe   : > { %v3967_v50 = vld [vmem:[%s4713_s21 + $0x55c] sm:$0xf]  ;;  %v3971_v3 = vld [vmem:[%s4713_s21 + $0x56c] sm:$0xf]  ;;  %v3251_v10 = vsel %vm5521_vm11, %v3959_v49, %v3207_v0  ;;  %v3224_v41 = vsel %vm5521_vm11, %v3947_v44, %v3180_v14  ;;  %v2195_v49 = vmul.f32 %v3618_v30, %v2183_v9  ;;  %v3657_v35 = vld [vmem:[%s4713_s21 + $0x84] sm:$0xf] }
 0x1ff   : > { %v3975_v5 = vld [vmem:[%s4713_s21 + $0x57c] sm:$0xf]  ;;  %v3987_v11 = vld [vmem:[%s4713_s21 + $0x5ac] sm:$0xf]  ;;  %v3277_v29 = vsel %vm5534_vm15, %v3967_v50, %v3233_v18  ;;  %v3286_v24 = vsel %vm5534_vm15, %v3971_v3, %v3242_v23  ;;  %v2202_v4 = vmul.f32 %v2198_v62, %v5245_v21  ;;  %v3661_v30 = vld [vmem:[%s4713_s21 + $0x94] sm:$0xf] }
 0x200   : > { %v3991_v12 = vld [vmem:[%s4713_s21 + $0x5bc] sm:$0xf]  ;;  %v4003_v22 = vld [vmem:[%s4713_s21 + $0x5ec] sm:$0xf]  ;;  %v3295_v32 = vsel %vm5534_vm15, %v3975_v5, %v3251_v10  ;;  %v3330_v46 = vsel %vm5549_vm4, %v3987_v11, %v3286_v24  ;;  %v2199_v31 = vadd.f32 0.19977711, %v2195_v49 }
 0x201   : > { %v4007_v60 = vld [vmem:[%s4713_s21 + $0x5fc] sm:$0xf]  ;;  %v3963_v1 = vld [vmem:[%s4713_s21 + $0x54c] sm:$0xf]  ;;  %v3339_v2 = vsel %vm5549_vm4, %v3991_v12, %v3295_v32  ;;  %v3374_v25 = vsel %vm5563_vm13, %v4003_v22, %v3330_v46  ;;  %v3621_v5 = vadd.f32 -0.3333295, %v2202_v4 }
 0x202   : > { %v3983_v20 = vld [vmem:[%s4713_s21 + $0x59c] sm:$0xf]  ;;  %v3383_v38 = vsel %vm5563_vm13, %v4007_v60, %v3339_v2  ;;  %v3979_v28 = vld [vmem:[%s4713_s21 + $0x58c] sm:$0xf]  ;;  %v3268_v26 = vsel %vm5534_vm15, %v3963_v1, %v3224_v41  ;;  %v3395_v51 = vunpack.c.l.bf16 %v3374_v25  ;;  %v2203_v6 = vmul.f32 %v2199_v31, %v2183_v9  ;;  %v2334_v2 = vld [vmem:[%s4713_s21 + $0x4] sm:$0xf] }
 0x203   : > { %v3999_v17 = vld [vmem:[%s4713_s21 + $0x5dc] sm:$0xf]  ;;  %v3321_v58 = vsel %vm5549_vm4, %v3983_v20, %v3277_v29  ;;  %v3399_v33 = vunpack.c.l.bf16 %v3383_v38  ;;  %v3995_v27 = vld [vmem:[%s4713_s21 + $0x5cc] sm:$0xf]  ;;  %v3312_v45 = vsel %vm5549_vm4, %v3979_v28, %v3268_v26  ;;  %v2210_v11 = vmul.f32 %v3621_v5, %v5245_v21  ;;  %v3633_v25 = vld [vmem:[%s4713_s21 + $0x24] sm:$0xf] }
 0x204   : > { %v3365_v61 = vsel %vm5563_vm13, %v3999_v17, %v3321_v58  ;;  %v3356_v3 = vsel %vm5563_vm13, %v3995_v27, %v3312_v45  ;;  %v3427_v8 = vld [vmem:[%s4705_s16 + $0x18] sm:$0xff]  ;;  %v3622_v12 = vadd.f32 -0.3333295, %v2203_v6  ;;  %v3637_v17 = vld [vmem:[%s4713_s21 + $0x34] sm:$0xf] }
 0x205   : > { %v3403_v52 = vmul.f32 %v3399_v33, %v2328_v56  ;;  %v3391_v44 = vunpack.c.l.bf16 %v3365_v61  ;;  %v3387_v13 = vunpack.c.l.bf16 %v3356_v3  ;;  %vm3431_vm5 = vcmp.ne.f32.partialorder %v3427_v8, 0.0  ;;  %v3439_v60 = vld [vmem:[#allocation2 + $0x18] sm:$0xff]  ;;  %v3645_v58 = vld [vmem:[%s4713_s21 + $0x54] sm:$0xf]  ;;  %v3649_v33 = vld [vmem:[%s4713_s21 + $0x64] sm:$0xf] }
 0x206   : > { %v2214_v54 = vmul.f32 %v2210_v11, %v5233_v48  ;;  %v2211_v22 = vmul.f32 %v3622_v12, %v2183_v9  ;;  %v3653_v26 = vld [vmem:[%s4713_s21 + $0x74] sm:$0xf]  ;;  %v3673_v61 = vld [vmem:[%s4713_s21 + $0xc4] sm:$0xf] }
 0x207   : > { %v3407_v42 = vadd.f32 %v3403_v52, %v3395_v51  ;;  %v3665_v51 = vld [vmem:[%s4713_s21 + $0xa4] sm:$0xf]  ;;  %v3669_v52 = vld [vmem:[%s4713_s21 + $0xb4] sm:$0xf] }
 0x208   : > { %v2218_v23 = vadd.f32 %v2214_v54, %v5233_v48  ;;  %v2215_v10 = vmul.f32 %v2211_v22, %v5267_v43  ;;  %v3677_v62 = vld [vmem:[%s4713_s21 + $0xd4] sm:$0xf]  ;;  %v3681_v49 = vld [vmem:[%s4713_s21 + $0xe4] sm:$0xf] }
 0x209   : > { %v3411_v50 = vmul.f32 %v3407_v42, %v2328_v56  ;;  %v3685_v27 = vld [vmem:[%s4713_s21 + $0xf4] sm:$0xf]  ;;  %v3689_v45 = vld [vmem:[%s4713_s21 + $0x104] sm:$0xf] }
 0x20a   : > { %v2230_v20 = vadd.f32 %v4859_v63, %v2218_v23  ;;  %v2219_v29 = vadd.f32 %v2215_v10, %v5267_v43  ;;  %v3693_v42 = vld [vmem:[%s4713_s21 + $0x114] sm:$0xf]  ;;  %v3705_v5 = vld [vmem:[%s4713_s21 + $0x144] sm:$0xf] }
 0x20b   : > { %v3415_v0 = vadd.f32 %v3411_v50, %v3391_v44  ;;  %v3697_v50 = vld [vmem:[%s4713_s21 + $0x124] sm:$0xf]  ;;  %v3701_v3 = vld [vmem:[%s4713_s21 + $0x134] sm:$0xf] }
 0x20c   : > { %v2238_v21 = vsub.f32 0.0, %v2230_v20  ;;  %v2231_v24 = vadd.f32 %v4891_v19, %v2219_v29  ;;  %v3709_v6 = vld [vmem:[%s4713_s21 + $0x154] sm:$0xf]  ;;  %v3713_v12 = vld [vmem:[%s4713_s21 + $0x164] sm:$0xf] }
 0x20d   : > { %v3419_v14 = vmul.f32 %v3415_v0, %v2328_v56  ;;  %v3641_v56 = vld [vmem:[%s4713_s21 + $0x44] sm:$0xf]  ;;  %v3725_v10 = vld [vmem:[%s4713_s21 + $0x194] sm:$0xf] }
 0x20e   : > { %v2242_v32 = vsel %vm2234_vm6, %v2238_v21, %v2230_v20  ;;  %v2239_v9 = vsub.f32 0.0, %v2231_v24  ;;  %v3721_v23 = vld [vmem:[%s4713_s21 + $0x184] sm:$0xf]  ;;  %v3733_v21 = vld [vmem:[%s4713_s21 + $0x1b4] sm:$0xf] }
 0x20f   : > { %v3423_v18 = vadd.f32 %v3419_v14, %v3387_v13  ;;  %v2258_v40 = vadd.f32 %v4846_v57, %v2242_v32  ;;  %v3717_v13 = vld [vmem:[%s4713_s21 + $0x174] sm:$0xf]  ;;  %v3729_v29 = vld [vmem:[%s4713_s21 + $0x1a4] sm:$0xf] }
 0x210   : > { %v2243_v48 = vsel %vm2235_vm8, %v2239_v9, %v2231_v24  ;;  %v3805_v31 = vld [vmem:[%s4713_s21 + $0x2d4] sm:$0xf] }
 0x211   : > { %v3435_v39 = vsel %vm3431_vm5, %v3423_v18, 0.0  ;;  %v2262_v55 = vsel %vm2254_vm0, %v2258_v40, %v2242_v32  ;;  %v2259_v63 = vadd.f32 %v4883_v15, %v2243_v48  ;;  %v3829_v18 = vld [vmem:[%s4713_s21 + $0x334] sm:$0xf] }
 0x212   : > { %v3443_v16 = vadd.f32 %v3439_v60, %v3435_v39  ;;  %v2282_v19 = vsel %vm2118_vm2, %v4871_v7, %v2262_v55  ;;  %v3737_v55 = vld [vmem:[%s4713_s21 + $0x1c4] sm:$0xf] }
 0x213   : > { %vm2286_vm12 = vcmp.lt.f32.partialorder %v2282_v19, -3.010693  ;;  %v2290_v34 = vadd.f32 6.2831855, %v2282_v19  ;;  %v2263_v57 = vsel %vm2255_vm10, %v2259_v63, %v2243_v48  ;;  %v3741_v63 = vld [vmem:[%s4713_s21 + $0x1d4] sm:$0xf] }
 0x214   : > { %3447 = vst [vmem:[#allocation2 + $0x18] sm:$0xff] %v3443_v16  ;;  %v2283_v59 = vsel %vm2119_vm3, %v4912_v36, %v2263_v57 }
 0x215   : > { %v5607_v43 = vsel %vm2286_vm12, %v2290_v34, %v2282_v19  ;;  %vm2287_vm14 = vcmp.lt.f32.partialorder %v2283_v59, -3.010693  ;;  %v2291_v15 = vadd.f32 6.2831855, %v2283_v59  ;;  %v3745_v19 = vld [vmem:[%s4713_s21 + $0x1e4] sm:$0xf] }
 0x216   : > { %v3625_v47 = vadd.f32 3.010693, %v5607_v43  ;;  %v3749_v34 = vld [vmem:[%s4713_s21 + $0x1f4] sm:$0xf] }
 0x217   : > { %v5610_v7 = vsel %vm2287_vm14, %v2291_v15, %v2283_v59 }
 0x218   : > { %v2302_v1 = vmul.f32 3.8197186, %v3625_v47  ;;  %v3626_v41 = vadd.f32 3.010693, %v5610_v7 }
 0x21a   : > { %v2306_v53 = vfloor.f32 %v2302_v1  ;;  %v2303_v36 = vmul.f32 3.8197186, %v3626_v41  ;;  %v3753_v1 = vld [vmem:[%s4713_s21 + $0x204] sm:$0xf]  ;;  %v3757_v41 = vld [vmem:[%s4713_s21 + $0x214] sm:$0xf] }
 0x21c   : > { %v2310_v46 = vmax.f32 %v2306_v53, 0.0  ;;  %v2307_v38 = vfloor.f32 %v2303_v36  ;;  %v3761_v53 = vld [vmem:[%s4713_s21 + $0x224] sm:$0xf]  ;;  %v3765_v36 = vld [vmem:[%s4713_s21 + $0x234] sm:$0xf] }
 0x21e   : > { %v5620_v28 = vmin.f32 %v2310_v46, 23.0  ;;  %v5645_v44 = vmax.f32 %v2307_v38, 0.0 }
 0x220   : > { %vm2330_vm2 = vcmp.eq.f32.partialorder %v5620_v28, 0.0  ;;  %vm2373_vm3 = vcmp.eq.f32.partialorder %v5620_v28, 1.0  ;;  %vm2417_vm7 = vcmp.eq.f32.partialorder %v5620_v28, 2.0  ;;  %v5637_v4 = vmul.f32 0.2617994, %v5620_v28 }
 0x221   : > { %vm5639_vm9 = vmpackc.low %vm2330_vm2, %vm2330_vm2  ;;  %vm2461_vm11 = vcmp.eq.f32.partialorder %v5620_v28, 3.0  ;;  %vm2505_vm1 = vcmp.eq.f32.partialorder %v5620_v28, 4.0  ;;  %vm2549_vm4 = vcmp.eq.f32.partialorder %v5620_v28, 5.0  ;;  %vm2593_vm6 = vcmp.eq.f32.partialorder %v5620_v28, 6.0 }
 0x222   : > { %v2342_v8 = vsel %vm5639_vm9, %v2334_v2, 0  ;;  %v2351_v0 = vsel %vm5639_vm9, %v3629_v37, 0  ;;  %v2360_v11 = vsel %vm5639_vm9, %v3633_v25, 0  ;;  %vm2382_vm15 = vmpackc.low %vm2373_vm3, %vm2373_vm3  ;;  %v2369_v14 = vsel %vm5639_vm9, %v3637_v17, 0  ;;  %v3769_v17 = vld [vmem:[%s4713_s21 + $0x244] sm:$0xf] }
 0x223   : > { %v2386_v54 = vsel %vm2382_vm15, %v3641_v56, %v2342_v8  ;;  %v2395_v22 = vsel %vm2382_vm15, %v3645_v58, %v2351_v0  ;;  %v2404_v60 = vsel %vm2382_vm15, %v3649_v33, %v2360_v11  ;;  %vm5668_vm13 = vmpackc.low %vm2417_vm7, %vm2417_vm7  ;;  %v2413_v39 = vsel %vm2382_vm15, %v3653_v26, %v2369_v14  ;;  %v3773_v56 = vld [vmem:[%s4713_s21 + $0x254] sm:$0xf]  ;;  %v3777_v58 = vld [vmem:[%s4713_s21 + $0x264] sm:$0xf] }
 0x224   : > { %v2430_v16 = vsel %vm5668_vm13, %v3657_v35, %v2386_v54  ;;  %v2439_v20 = vsel %vm5668_vm13, %v3661_v30, %v2395_v22  ;;  %vm2470_vm5 = vmpackc.low %vm2461_vm11, %vm2461_vm11  ;;  %v2448_v24 = vsel %vm5668_vm13, %v3665_v51, %v2404_v60  ;;  %v2457_v32 = vsel %vm5668_vm13, %v3669_v52, %v2413_v39  ;;  %v3781_v33 = vld [vmem:[%s4713_s21 + $0x274] sm:$0xf]  ;;  %v3785_v52 = vld [vmem:[%s4713_s21 + $0x284] sm:$0xf] }
 0x225   : > { %v2474_v9 = vsel %vm2470_vm5, %v3673_v61, %v2430_v16  ;;  %v2483_v40 = vsel %vm2470_vm5, %v3677_v62, %v2439_v20  ;;  %vm5691_vm8 = vmpackc.low %vm2505_vm1, %vm2505_vm1  ;;  %v2492_v57 = vsel %vm2470_vm5, %v3681_v49, %v2448_v24  ;;  %v2501_v59 = vsel %vm2470_vm5, %v3685_v27, %v2457_v32  ;;  %v3789_v61 = vld [vmem:[%s4713_s21 + $0x294] sm:$0xf]  ;;  %v3793_v62 = vld [vmem:[%s4713_s21 + $0x2a4] sm:$0xf] }
 0x226   : > { %v2518_v15 = vsel %vm5691_vm8, %v3689_v45, %v2474_v9  ;;  %v2527_v47 = vsel %vm5691_vm8, %v3693_v42, %v2483_v40  ;;  %vm2558_vm0 = vmpackc.low %vm2549_vm4, %vm2549_vm4  ;;  %v2536_v46 = vsel %vm5691_vm8, %v3697_v50, %v2492_v57  ;;  %v2545_v2 = vsel %vm5691_vm8, %v3701_v3, %v2501_v59  ;;  %v3797_v49 = vld [vmem:[%s4713_s21 + $0x2b4] sm:$0xf]  ;;  %v3801_v42 = vld [vmem:[%s4713_s21 + $0x2c4] sm:$0xf] }
 0x227   : > { %v2562_v37 = vsel %vm2558_vm0, %v3705_v5, %v2518_v15  ;;  %v2571_v25 = vsel %vm2558_vm0, %v3709_v6, %v2527_v47  ;;  %vm5717_vm10 = vmpackc.low %vm2593_vm6, %vm2593_vm6  ;;  %v2580_v26 = vsel %vm2558_vm0, %v3713_v12, %v2536_v46  ;;  %v2589_v35 = vsel %vm2558_vm0, %v3717_v13, %v2545_v2  ;;  %v3809_v50 = vld [vmem:[%s4713_s21 + $0x2e4] sm:$0xf]  ;;  %v3813_v3 = vld [vmem:[%s4713_s21 + $0x2f4] sm:$0xf] }
 0x228   : > { %v2606_v30 = vsel %vm5717_vm10, %v3721_v23, %v2562_v37  ;;  %v2615_v51 = vsel %vm5717_vm10, %v3725_v10, %v2571_v25  ;;  %v2624_v27 = vsel %vm5717_vm10, %v3729_v29, %v2580_v26  ;;  %v2633_v45 = vsel %vm5717_vm10, %v3733_v21, %v2589_v35  ;;  %v5748_v11 = vld [vmem:[%s4713_s21 + $0x304] sm:$0xf]  ;;  %v5751_v12 = vld [vmem:[%s4713_s21 + $0x314] sm:$0xf] }
 0x229   : > { %vm2637_vm12 = vcmp.eq.f32.partialorder %v5620_v28, 7.0  ;;  %vm2681_vm14 = vcmp.eq.f32.partialorder %v5620_v28, 8.0  ;;  %vm2725_vm3 = vcmp.eq.f32.partialorder %v5620_v28, 9.0  ;;  %vm2769_vm7 = vcmp.eq.f32.partialorder %v5620_v28, 10.0  ;;  %v3825_v60 = vld [vmem:[%s4713_s21 + $0x324] sm:$0xf] }
 0x22a   : > { %vm2646_vm2 = vmpackc.low %vm2637_vm12, %vm2637_vm12  ;;  %vm2813_vm9 = vcmp.eq.f32.partialorder %v5620_v28, 11.0  ;;  %vm2857_vm11 = vcmp.eq.f32.partialorder %v5620_v28, 12.0  ;;  %v3833_v29 = vld [vmem:[%s4713_s21 + $0x344] sm:$0xf]  ;;  %v3837_v21 = vld [vmem:[%s4713_s21 + $0x354] sm:$0xf] }
 0x22b   : > { %v2650_v5 = vsel %vm2646_vm2, %v3737_v55, %v2606_v30  ;;  %v2659_v6 = vsel %vm2646_vm2, %v3741_v63, %v2615_v51  ;;  %v2668_v8 = vsel %vm2646_vm2, %v3745_v19, %v2624_v27  ;;  %v2677_v0 = vsel %vm2646_vm2, %v3749_v34, %v2633_v45  ;;  %vm2690_vm1 = vmpackc.low %vm2681_vm14, %vm2681_vm14  ;;  %v3841_v24 = vld [vmem:[%s4713_s21 + $0x364] sm:$0xf]  ;;  %v3845_v32 = vld [vmem:[%s4713_s21 + $0x374] sm:$0xf] }
 0x22c   : > { %v2694_v13 = vsel %vm2690_vm1, %v3753_v1, %v2650_v5  ;;  %v2703_v14 = vsel %vm2690_vm1, %v3757_v41, %v2659_v6  ;;  %v2712_v54 = vsel %vm2690_vm1, %v3761_v53, %v2668_v8  ;;  %v2721_v22 = vsel %vm2690_vm1, %v3765_v36, %v2677_v0  ;;  %vm2734_vm15 = vmpackc.low %vm2725_vm3, %vm2725_vm3  ;;  %v3849_v63 = vld [vmem:[%s4713_s21 + $0x384] sm:$0xf]  ;;  %v3853_v19 = vld [vmem:[%s4713_s21 + $0x394] sm:$0xf] }
 0x22d   : > { %v2738_v23 = vsel %vm2734_vm15, %v3769_v17, %v2694_v13  ;;  %v2747_v10 = vsel %vm2734_vm15, %v3773_v56, %v2703_v14  ;;  %v2756_v39 = vsel %vm2734_vm15, %v3777_v58, %v2712_v54  ;;  %v2765_v16 = vsel %vm2734_vm15, %v3781_v33, %v2721_v22  ;;  %vm5761_vm4 = vmpackc.low %vm2769_vm7, %vm2769_vm7  ;;  %v3857_v34 = vld [vmem:[%s4713_s21 + $0x3a4] sm:$0xf]  ;;  %v3861_v57 = vld [vmem:[%s4713_s21 + $0x3b4] sm:$0xf] }
 0x22e   : > { %v2782_v9 = vsel %vm5761_vm4, %v3785_v52, %v2738_v23  ;;  %v2791_v40 = vsel %vm5761_vm4, %v3789_v61, %v2747_v10  ;;  %v2800_v48 = vsel %vm5761_vm4, %v3793_v62, %v2756_v39  ;;  %v2809_v55 = vsel %vm5761_vm4, %v3797_v49, %v2765_v16  ;;  %vm2822_vm13 = vmpackc.low %vm2813_vm9, %vm2813_vm9  ;;  %v3865_v53 = vld [vmem:[%s4713_s21 + $0x3c4] sm:$0xf]  ;;  %v3869_v36 = vld [vmem:[%s4713_s21 + $0x3d4] sm:$0xf] }
 0x22f   : > { %v2826_v59 = vsel %vm2822_vm13, %v3801_v42, %v2782_v9  ;;  %v2835_v15 = vsel %vm2822_vm13, %v3805_v31, %v2791_v40  ;;  %v2844_v47 = vsel %vm2822_vm13, %v3809_v50, %v2800_v48  ;;  %v2853_v1 = vsel %vm2822_vm13, %v3813_v3, %v2809_v55  ;;  %vm5787_vm5 = vmpackc.low %vm2857_vm11, %vm2857_vm11  ;;  %v3873_v46 = vld [vmem:[%s4713_s21 + $0x3e4] sm:$0xf]  ;;  %v3877_v2 = vld [vmem:[%s4713_s21 + $0x3f4] sm:$0xf] }
 0x230   : > { %v2870_v37 = vsel %vm5787_vm5, %v5748_v11, %v2826_v59  ;;  %v2879_v25 = vsel %vm5787_vm5, %v5751_v12, %v2835_v15  ;;  %v2888_v38 = vsel %vm5787_vm5, %v3825_v60, %v2844_v47  ;;  %v2897_v17 = vsel %vm5787_vm5, %v3829_v18, %v2853_v1  ;;  %v3881_v56 = vld [vmem:[%s4713_s21 + $0x404] sm:$0xf]  ;;  %v3885_v58 = vld [vmem:[%s4713_s21 + $0x414] sm:$0xf]  ;;  %v3790_v48 = vld [vmem:[%s4713_s21 + $0x298] sm:$0xf] }
 0x231   : > { %v3889_v33 = vld [vmem:[%s4713_s21 + $0x424] sm:$0xf]  ;;  %v3893_v26 = vld [vmem:[%s4713_s21 + $0x434] sm:$0xf]  ;;  %vm2901_vm6 = vcmp.eq.f32.partialorder %v5620_v28, 13.0  ;;  %vm2945_vm8 = vcmp.eq.f32.partialorder %v5620_v28, 14.0 }
 0x232   : > { %vm2989_vm0 = vcmp.eq.f32.partialorder %v5620_v28, 15.0  ;;  %vm3033_vm10 = vcmp.eq.f32.partialorder %v5620_v28, 16.0  ;;  %v3897_v35 = vld [vmem:[%s4713_s21 + $0x444] sm:$0xf]  ;;  %v3901_v30 = vld [vmem:[%s4713_s21 + $0x454] sm:$0xf]  ;;  %vm2910_vm12 = vmpackc.low %vm2901_vm6, %vm2901_vm6 }
 0x233   : > { %v3905_v51 = vld [vmem:[%s4713_s21 + $0x464] sm:$0xf]  ;;  %v3909_v52 = vld [vmem:[%s4713_s21 + $0x474] sm:$0xf]  ;;  %vm3077_vm14 = vcmp.eq.f32.partialorder %v5620_v28, 17.0  ;;  %vm3121_vm2 = vcmp.eq.f32.partialorder %v5620_v28, 18.0  ;;  %v2914_v45 = vsel %vm2910_vm12, %v3833_v29, %v2870_v37  ;;  %v2923_v42 = vsel %vm2910_vm12, %v3837_v21, %v2879_v25  ;;  %vm2954_vm9 = vmpackc.low %vm2945_vm8, %vm2945_vm8 }
 0x234   : > { %vm3165_vm3 = vcmp.eq.f32.partialorder %v5620_v28, 19.0  ;;  %vm3209_vm7 = vcmp.eq.f32.partialorder %v5620_v28, 20.0  ;;  %v3913_v61 = vld [vmem:[%s4713_s21 + $0x484] sm:$0xf]  ;;  %v3917_v62 = vld [vmem:[%s4713_s21 + $0x494] sm:$0xf]  ;;  %v2932_v31 = vsel %vm2910_vm12, %v3841_v24, %v2888_v38  ;;  %v2941_v50 = vsel %vm2910_vm12, %v3845_v32, %v2897_v17  ;;  %vm2998_vm11 = vmpackc.low %vm2989_vm0, %vm2989_vm0 }
 0x235   : > { %v3921_v49 = vld [vmem:[%s4713_s21 + $0x4a4] sm:$0xf]  ;;  %v3925_v27 = vld [vmem:[%s4713_s21 + $0x4b4] sm:$0xf]  ;;  %v2958_v6 = vsel %vm2954_vm9, %v3849_v63, %v2914_v45  ;;  %v2967_v8 = vsel %vm2954_vm9, %v3853_v19, %v2923_v42  ;;  %v2976_v0 = vsel %vm2954_vm9, %v3857_v34, %v2932_v31  ;;  %v2985_v11 = vsel %vm2954_vm9, %v3861_v57, %v2941_v50  ;;  %vm3042_vm1 = vmpackc.low %vm3033_vm10, %vm3033_vm10 }
 0x236   : > { %v3929_v3 = vld [vmem:[%s4713_s21 + $0x4c4] sm:$0xf]  ;;  %v3933_v5 = vld [vmem:[%s4713_s21 + $0x4d4] sm:$0xf]  ;;  %v3002_v14 = vsel %vm2998_vm11, %v3865_v53, %v2958_v6  ;;  %v3011_v54 = vsel %vm2998_vm11, %v3869_v36, %v2967_v8  ;;  %v3020_v22 = vsel %vm2998_vm11, %v3873_v46, %v2976_v0  ;;  %v3029_v60 = vsel %vm2998_vm11, %v3877_v2, %v2985_v11  ;;  %vm3086_vm15 = vmpackc.low %vm3077_vm14, %vm3077_vm14 }
 0x237   : > { %v3937_v12 = vld [vmem:[%s4713_s21 + $0x4e4] sm:$0xf]  ;;  %v3941_v13 = vld [vmem:[%s4713_s21 + $0x4f4] sm:$0xf]  ;;  %v3046_v10 = vsel %vm3042_vm1, %v3881_v56, %v3002_v14  ;;  %v3055_v39 = vsel %vm3042_vm1, %v3885_v58, %v3011_v54  ;;  %v3064_v16 = vsel %vm3042_vm1, %v3889_v33, %v3020_v22  ;;  %v3073_v20 = vsel %vm3042_vm1, %v3893_v26, %v3029_v60  ;;  %vm5848_vm4 = vmpackc.low %vm3121_vm2, %vm3121_vm2 }
 0x238   : > { %v3945_v18 = vld [vmem:[%s4713_s21 + $0x504] sm:$0xf]  ;;  %v3949_v23 = vld [vmem:[%s4713_s21 + $0x514] sm:$0xf]  ;;  %v3090_v24 = vsel %vm3086_vm15, %v3897_v35, %v3046_v10  ;;  %v3099_v32 = vsel %vm3086_vm15, %v3901_v30, %v3055_v39  ;;  %v3108_v9 = vsel %vm3086_vm15, %v3905_v51, %v3064_v16  ;;  %v3117_v40 = vsel %vm3086_vm15, %v3909_v52, %v3073_v20  ;;  %vm3174_vm13 = vmpackc.low %vm3165_vm3, %vm3165_vm3 }
 0x239   : > { %v3953_v29 = vld [vmem:[%s4713_s21 + $0x524] sm:$0xf]  ;;  %v3957_v21 = vld [vmem:[%s4713_s21 + $0x534] sm:$0xf]  ;;  %v3134_v57 = vsel %vm5848_vm4, %v3913_v61, %v3090_v24  ;;  %v3143_v59 = vsel %vm5848_vm4, %v3917_v62, %v3099_v32  ;;  %v3152_v15 = vsel %vm5848_vm4, %v3921_v49, %v3108_v9  ;;  %v3161_v47 = vsel %vm5848_vm4, %v3925_v27, %v3117_v40  ;;  %vm5873_vm5 = vmpackc.low %vm3209_vm7, %vm3209_vm7 }
 0x23a   : > { %v3961_v55 = vld [vmem:[%s4713_s21 + $0x544] sm:$0xf]  ;;  %v3965_v63 = vld [vmem:[%s4713_s21 + $0x554] sm:$0xf]  ;;  %v3178_v36 = vsel %vm3174_vm13, %v3929_v3, %v3134_v57  ;;  %v3187_v46 = vsel %vm3174_vm13, %v3933_v5, %v3143_v59  ;;  %v3196_v2 = vsel %vm3174_vm13, %v3937_v12, %v3152_v15  ;;  %v3205_v37 = vsel %vm3174_vm13, %v3941_v13, %v3161_v47  ;;  %v5898_v42 = vld [vmem:[%s4705_s16 + $0x8] sm:$0xff] }
 0x23b   : > { %v3969_v19 = vld [vmem:[%s4713_s21 + $0x564] sm:$0xf]  ;;  %v3973_v34 = vld [vmem:[%s4713_s21 + $0x574] sm:$0xf]  ;;  %v3222_v58 = vsel %vm5873_vm5, %v3945_v18, %v3178_v36  ;;  %v3231_v33 = vsel %vm5873_vm5, %v3949_v23, %v3187_v46  ;;  %v3240_v26 = vsel %vm5873_vm5, %v3953_v29, %v3196_v2  ;;  %v3249_v35 = vsel %vm5873_vm5, %v3957_v21, %v3205_v37  ;;  %v3630_v3 = vld [vmem:[%s4713_s21 + $0x18] sm:$0xf] }
 0x23c   : > { %v3977_v1 = vld [vmem:[%s4713_s21 + $0x584] sm:$0xf]  ;;  %v3981_v41 = vld [vmem:[%s4713_s21 + $0x594] sm:$0xf]  ;;  %vm3253_vm6 = vcmp.eq.f32.partialorder %v5620_v28, 21.0  ;;  %vm3297_vm8 = vcmp.eq.f32.partialorder %v5620_v28, 22.0 }
 0x23d   : > { %v3985_v53 = vld [vmem:[%s4713_s21 + $0x5a4] sm:$0xf]  ;;  %v3989_v38 = vld [vmem:[%s4713_s21 + $0x5b4] sm:$0xf]  ;;  %vm3341_vm0 = vcmp.eq.f32.partialorder %v5620_v28, 23.0  ;;  %vm3262_vm10 = vmpackc.low %vm3253_vm6, %vm3253_vm6  ;;  %v5895_v61 = vmin.f32 %v5645_v44, 23.0 }
 0x23e   : > { %v3993_v17 = vld [vmem:[%s4713_s21 + $0x5c4] sm:$0xf]  ;;  %v3997_v56 = vld [vmem:[%s4713_s21 + $0x5d4] sm:$0xf]  ;;  %v2322_v52 = vadd.f32 -3.010693, %v5637_v4  ;;  %v3266_v62 = vsel %vm3262_vm10, %v3961_v55, %v3222_v58  ;;  %v3275_v49 = vsel %vm3262_vm10, %v3965_v63, %v3231_v33  ;;  %v3284_v27 = vsel %vm3262_vm10, %v3969_v19, %v3240_v26  ;;  %vm3306_vm12 = vmpackc.low %vm3297_vm8, %vm3297_vm8 }
 0x23f   : > { %v4001_v30 = vld [vmem:[%s4713_s21 + $0x5e4] sm:$0xf]  ;;  %v4005_v51 = vld [vmem:[%s4713_s21 + $0x5f4] sm:$0xf]  ;;  %v3293_v45 = vsel %vm3262_vm10, %v3973_v34, %v3249_v35  ;;  %v3310_v28 = vsel %vm3306_vm12, %v3977_v1, %v3266_v62  ;;  %v3319_v31 = vsel %vm3306_vm12, %v3981_v41, %v3275_v49  ;;  %v3328_v50 = vsel %vm3306_vm12, %v3985_v53, %v3284_v27  ;;  %vm3350_vm14 = vmpackc.low %vm3341_vm0, %vm3341_vm0 }
 0x240   : > { %v3337_v4 = vsel %vm3306_vm12, %v3989_v38, %v3293_v45  ;;  %v2335_v44 = vld [vmem:[%s4713_s21 + $0x8] sm:$0xf]  ;;  %v5903_v6 = vsel %vm3350_vm14, %v3993_v17, %v3310_v28  ;;  %v5905_v8 = vsel %vm3350_vm14, %v3997_v56, %v3319_v31  ;;  %v3372_v0 = vsel %vm3350_vm14, %v4001_v30, %v3328_v50  ;;  %v3638_v12 = vld [vmem:[%s4713_s21 + $0x38] sm:$0xf] }
 0x241   : > { %v3634_v5 = vld [vmem:[%s4713_s21 + $0x28] sm:$0xf]  ;;  %v3381_v11 = vsel %vm3350_vm14, %v4005_v51, %v3337_v4  ;;  %v3646_v14 = vld [vmem:[%s4713_s21 + $0x58] sm:$0xf]  ;;  %v5911_v54 = vsub.f32 %v5607_v43, %v2322_v52  ;;  %v3385_v10 = vunpack.c.l.bf16 %v5903_v6  ;;  %vm2331_vm2 = vcmp.eq.f32.partialorder %v5895_v61, 0.0 }
 0x242   : > { %v3642_v13 = vld [vmem:[%s4713_s21 + $0x48] sm:$0xf]  ;;  %v3397_v22 = vunpack.c.l.bf16 %v3381_v11  ;;  %v3654_v18 = vld [vmem:[%s4713_s21 + $0x78] sm:$0xf]  ;;  %vm2374_vm3 = vcmp.eq.f32.partialorder %v5895_v61, 1.0  ;;  %vm2418_vm7 = vcmp.eq.f32.partialorder %v5895_v61, 2.0  ;;  %v3389_v43 = vunpack.c.l.bf16 %v5905_v8  ;;  %vm5929_vm9 = vmpackc.low %vm2331_vm2, %vm2331_vm2 }
 0x243   : > { %v3650_v60 = vld [vmem:[%s4713_s21 + $0x68] sm:$0xf]  ;;  %v3662_v39 = vld [vmem:[%s4713_s21 + $0x98] sm:$0xf]  ;;  %v3393_v29 = vunpack.c.l.bf16 %v3372_v0  ;;  %vm2462_vm11 = vcmp.eq.f32.partialorder %v5895_v61, 3.0  ;;  %vm3429_vm1 = vcmp.ne.f32.partialorder %v5898_v42, 0.0  ;;  %vm2383_vm15 = vmpackc.low %vm2374_vm3, %vm2374_vm3 }
 0x244   : > { %v3658_v23 = vld [vmem:[%s4713_s21 + $0x88] sm:$0xf]  ;;  %v3670_v20 = vld [vmem:[%s4713_s21 + $0xb8] sm:$0xf]  ;;  %v3401_v21 = vmul.f32 %v3397_v22, %v5911_v54  ;;  %v2343_v19 = vsel %vm5929_vm9, %v2335_v44, 0  ;;  %v2352_v34 = vsel %vm5929_vm9, %v3630_v3, 0  ;;  %vm5954_vm13 = vmpackc.low %vm2418_vm7, %vm2418_vm7 }
 0x245   : > { %v3666_v16 = vld [vmem:[%s4713_s21 + $0xa8] sm:$0xf]  ;;  %v3678_v32 = vld [vmem:[%s4713_s21 + $0xd8] sm:$0xf]  ;;  %v2361_v57 = vsel %vm5929_vm9, %v3634_v5, 0  ;;  %vm2506_vm4 = vcmp.eq.f32.partialorder %v5895_v61, 4.0  ;;  %v2387_v41 = vsel %vm2383_vm15, %v3642_v13, %v2343_v19  ;;  %v2396_v53 = vsel %vm2383_vm15, %v3646_v14, %v2352_v34  ;;  %vm2471_vm6 = vmpackc.low %vm2462_vm11, %vm2462_vm11 }
 0x246   : > { %v3674_v24 = vld [vmem:[%s4713_s21 + $0xc8] sm:$0xf]  ;;  %v3686_v40 = vld [vmem:[%s4713_s21 + $0xf8] sm:$0xf]  ;;  %v3405_v59 = vadd.f32 %v3401_v21, %v3393_v29  ;;  %v2370_v1 = vsel %vm5929_vm9, %v3638_v12, 0  ;;  %v2405_v37 = vsel %vm2383_vm15, %v3650_v60, %v2361_v57  ;;  %v2431_v38 = vsel %vm5954_vm13, %v3658_v23, %v2387_v41  ;;  %vm5981_vm8 = vmpackc.low %vm2506_vm4, %vm2506_vm4 }
 0x247   : > { %v3682_v9 = vld [vmem:[%s4713_s21 + $0xe8] sm:$0xf]  ;;  %v3694_v63 = vld [vmem:[%s4713_s21 + $0x118] sm:$0xf]  ;;  %v2414_v25 = vsel %vm2383_vm15, %v3654_v18, %v2370_v1  ;;  %vm2550_vm5 = vcmp.eq.f32.partialorder %v5895_v61, 5.0  ;;  %v2440_v33 = vsel %vm5954_vm13, %v3662_v39, %v2396_v53  ;;  %v2449_v26 = vsel %vm5954_vm13, %v3666_v16, %v2405_v37 }
 0x248   : > { %v3690_v55 = vld [vmem:[%s4713_s21 + $0x108] sm:$0xf]  ;;  %v3702_v47 = vld [vmem:[%s4713_s21 + $0x138] sm:$0xf]  ;;  %v3409_v17 = vmul.f32 %v3405_v59, %v5911_v54  ;;  %v2458_v35 = vsel %vm5954_vm13, %v3670_v20, %v2414_v25  ;;  %v2475_v62 = vsel %vm2471_vm6, %v3674_v24, %v2431_v38  ;;  %v2484_v49 = vsel %vm2471_vm6, %v3678_v32, %v2440_v33  ;;  %vm2559_vm0 = vmpackc.low %vm2550_vm5, %vm2550_vm5 }
 0x249   : > { %v3698_v15 = vld [vmem:[%s4713_s21 + $0x128] sm:$0xf]  ;;  %v3710_v2 = vld [vmem:[%s4713_s21 + $0x158] sm:$0xf]  ;;  %v2493_v27 = vsel %vm2471_vm6, %v3682_v9, %v2449_v26  ;;  %v2502_v45 = vsel %vm2471_vm6, %v3686_v40, %v2458_v35  ;;  %v2519_v5 = vsel %vm5981_vm8, %v3690_v55, %v2475_v62  ;;  %v2528_v8 = vsel %vm5981_vm8, %v3694_v63, %v2484_v49 }
 0x24a   : > { %v3706_v46 = vld [vmem:[%s4713_s21 + $0x148] sm:$0xf]  ;;  %v3718_v58 = vld [vmem:[%s4713_s21 + $0x178] sm:$0xf]  ;;  %v3413_v31 = vadd.f32 %v3409_v17, %v3389_v43  ;;  %v2537_v0 = vsel %vm5981_vm8, %v3698_v15, %v2493_v27  ;;  %v2546_v14 = vsel %vm5981_vm8, %v3702_v47, %v2502_v45  ;;  %v2572_v60 = vsel %vm2559_vm0, %v3710_v2, %v2528_v8 }
 0x24b   : > { %v3714_v56 = vld [vmem:[%s4713_s21 + $0x168] sm:$0xf]  ;;  %v3726_v51 = vld [vmem:[%s4713_s21 + $0x198] sm:$0xf]  ;;  %v2563_v22 = vsel %vm2559_vm0, %v3706_v46, %v2519_v5  ;;  %v2590_v29 = vsel %vm2559_vm0, %v3718_v58, %v2546_v14  ;;  %vm2594_vm10 = vcmp.eq.f32.partialorder %v5895_v61, 6.0  ;;  %vm2638_vm12 = vcmp.eq.f32.partialorder %v5895_v61, 7.0 }
 0x24c   : > { %v3722_v30 = vld [vmem:[%s4713_s21 + $0x188] sm:$0xf]  ;;  %v3734_v50 = vld [vmem:[%s4713_s21 + $0x1b8] sm:$0xf]  ;;  %v2581_v18 = vsel %vm2559_vm0, %v3714_v56, %v2537_v0  ;;  %v3417_v39 = vmul.f32 %v3413_v31, %v5911_v54  ;;  %vm6013_vm14 = vmpackc.low %vm2594_vm10, %vm2594_vm10  ;;  %vm2682_vm2 = vcmp.eq.f32.partialorder %v5895_v61, 8.0  ;;  %vm2726_vm3 = vcmp.eq.f32.partialorder %v5895_v61, 9.0 }
 0x24d   : > { %v3730_v52 = vld [vmem:[%s4713_s21 + $0x1a8] sm:$0xf]  ;;  %v3742_v44 = vld [vmem:[%s4713_s21 + $0x1d8] sm:$0xf]  ;;  %vm2770_vm7 = vcmp.eq.f32.partialorder %v5895_v61, 10.0  ;;  %vm2814_vm9 = vcmp.eq.f32.partialorder %v5895_v61, 11.0  ;;  %v2607_v19 = vsel %vm6013_vm14, %v3722_v30, %v2563_v22  ;;  %v2616_v34 = vsel %vm6013_vm14, %v3726_v51, %v2572_v60  ;;  %vm2647_vm11 = vmpackc.low %vm2638_vm12, %vm2638_vm12 }
 0x24e   : > { %v3738_v4 = vld [vmem:[%s4713_s21 + $0x1c8] sm:$0xf]  ;;  %v3750_v11 = vld [vmem:[%s4713_s21 + $0x1f8] sm:$0xf]  ;;  %v3421_v54 = vadd.f32 %v3417_v39, %v3385_v10  ;;  %v2625_v57 = vsel %vm6013_vm14, %v3730_v52, %v2581_v18  ;;  %v2634_v59 = vsel %vm6013_vm14, %v3734_v50, %v2590_v29  ;;  %v2660_v47 = vsel %vm2647_vm11, %v3742_v44, %v2616_v34  ;;  %vm6042_vm15 = vmpackc.low %vm2682_vm2, %vm2682_vm2 }
 0x24f   : > { %v3746_v3 = vld [vmem:[%s4713_s21 + $0x1e8] sm:$0xf]  ;;  %v3758_v13 = vld [vmem:[%s4713_s21 + $0x218] sm:$0xf]  ;;  %v2651_v15 = vsel %vm2647_vm11, %v3738_v4, %v2607_v19  ;;  %v2678_v2 = vsel %vm2647_vm11, %v3750_v11, %v2634_v59  ;;  %vm6057_vm4 = vmpackc.low %vm2726_vm3, %vm2726_vm3  ;;  %vm2858_vm5 = vcmp.eq.f32.partialorder %v5895_v61, 12.0  ;;  %vm2902_vm8 = vcmp.eq.f32.partialorder %v5895_v61, 13.0 }
 0x250   : > { %v3754_v12 = vld [vmem:[%s4713_s21 + $0x208] sm:$0xf]  ;;  %v3766_v20 = vld [vmem:[%s4713_s21 + $0x238] sm:$0xf]  ;;  %v2669_v1 = vsel %vm2647_vm11, %v3746_v3, %v2625_v57  ;;  %v3433_v53 = vsel %vm3429_vm1, %v3421_v54, 0.0  ;;  %v2704_v25 = vsel %vm6042_vm15, %v3758_v13, %v2660_v47  ;;  %vm6074_vm1 = vmpackc.low %vm2770_vm7, %vm2770_vm7  ;;  %vm2946_vm0 = vcmp.eq.f32.partialorder %v5895_v61, 14.0 }
 0x251   : > { %v3437_v23 = vld [vmem:[#allocation2 + $0x8] sm:$0xff]  ;;  %v3774_v21 = vld [vmem:[%s4713_s21 + $0x258] sm:$0xf]  ;;  %v2695_v37 = vsel %vm6042_vm15, %v3754_v12, %v2651_v15  ;;  %v2722_v35 = vsel %vm6042_vm15, %v3766_v20, %v2678_v2  ;;  %vm2823_vm13 = vmpackc.low %vm2814_vm9, %vm2814_vm9  ;;  %vm2990_vm10 = vcmp.eq.f32.partialorder %v5895_v61, 15.0  ;;  %vm3034_vm12 = vcmp.eq.f32.partialorder %v5895_v61, 16.0 }
 0x252   : > { %v3762_v16 = vld [vmem:[%s4713_s21 + $0x228] sm:$0xf]  ;;  %v3782_v32 = vld [vmem:[%s4713_s21 + $0x278] sm:$0xf]  ;;  %v3441_v42 = vadd.f32 %v3437_v23, %v3433_v53  ;;  %v2748_v45 = vsel %vm6057_vm4, %v3774_v21, %v2704_v25  ;;  %vm6108_vm6 = vmpackc.low %vm2858_vm5, %vm2858_vm5  ;;  %vm3078_vm9 = vcmp.eq.f32.partialorder %v5895_v61, 17.0  ;;  %vm3122_vm11 = vcmp.eq.f32.partialorder %v5895_v61, 18.0 }
 0x253   : > { %v3770_v43 = vld [vmem:[%s4713_s21 + $0x248] sm:$0xf]  ;;  %v3798_v63 = vld [vmem:[%s4713_s21 + $0x2b8] sm:$0xf]  ;;  %v2713_v26 = vsel %vm6042_vm15, %v3762_v16, %v2669_v1  ;;  %v2766_v31 = vsel %vm6057_vm4, %v3782_v32, %v2722_v35  ;;  %v2792_v8 = vsel %vm6074_vm1, %v3790_v48, %v2748_v45  ;;  %vm2911_vm14 = vmpackc.low %vm2902_vm8, %vm2902_vm8  ;;  %vm3166_vm15 = vcmp.eq.f32.partialorder %v5895_v61, 19.0 }
 0x254   : > { %v3778_v24 = vld [vmem:[%s4713_s21 + $0x268] sm:$0xf]  ;;  %v3806_v10 = vld [vmem:[%s4713_s21 + $0x2d8] sm:$0xf]  ;;  %v2739_v30 = vsel %vm6057_vm4, %v3770_v43, %v2695_v37  ;;  %3445 = vst [vmem:[#allocation2 + $0x8] sm:$0xff] %v3441_v42  ;;  %v2810_v11 = vsel %vm6074_vm1, %v3798_v63, %v2766_v31  ;;  %vm6131_vm2 = vmpackc.low %vm2946_vm0, %vm2946_vm0  ;;  %vm3298_vm5 = vcmp.eq.f32.partialorder %v5895_v61, 22.0 }
 0x255   : > { %v3786_v9 = vld [vmem:[%s4713_s21 + $0x288] sm:$0xf]  ;;  %v3814_v46 = vld [vmem:[%s4713_s21 + $0x2f8] sm:$0xf]  ;;  %v2757_v28 = vsel %vm6057_vm4, %v3778_v24, %v2713_v26  ;;  %v2836_v60 = vsel %vm2823_vm13, %v3806_v10, %v2792_v8  ;;  %vm2999_vm3 = vmpackc.low %vm2990_vm10, %vm2990_vm10 }
 0x256   : > { %v3794_v55 = vld [vmem:[%s4713_s21 + $0x2a8] sm:$0xf]  ;;  %v3822_v56 = vld [vmem:[%s4713_s21 + $0x318] sm:$0xf]  ;;  %v2783_v50 = vsel %vm6074_vm1, %v3786_v9, %v2739_v30  ;;  %v2854_v23 = vsel %vm2823_vm13, %v3814_v46, %v2810_v11  ;;  %vm6157_vm7 = vmpackc.low %vm3034_vm12, %vm3034_vm12 }
 0x257   : > { %v3802_v6 = vld [vmem:[%s4713_s21 + $0x2c8] sm:$0xf]  ;;  %v3830_v33 = vld [vmem:[%s4713_s21 + $0x338] sm:$0xf]  ;;  %v2801_v0 = vsel %vm6074_vm1, %v3794_v55, %v2757_v28  ;;  %v2880_v21 = vsel %vm6108_vm6, %v3822_v56, %v2836_v60  ;;  %vm3087_vm4 = vmpackc.low %vm3078_vm9, %vm3078_vm9  ;;  %vm3210_vm1 = vcmp.eq.f32.partialorder %v5895_v61, 20.0 }
 0x258   : > { %v3810_v36 = vld [vmem:[%s4713_s21 + $0x2e8] sm:$0xf]  ;;  %v3838_v62 = vld [vmem:[%s4713_s21 + $0x358] sm:$0xf]  ;;  %v2827_v12 = vsel %vm2823_vm13, %v3802_v6, %v2783_v50  ;;  %v2898_v32 = vsel %vm6108_vm6, %v3830_v33, %v2854_v23  ;;  %vm3131_vm8 = vmpackc.low %vm3122_vm11, %vm3122_vm11 }
 0x259   : > { %v3818_v17 = vld [vmem:[%s4713_s21 + $0x308] sm:$0xf]  ;;  %v3846_v27 = vld [vmem:[%s4713_s21 + $0x378] sm:$0xf]  ;;  %v2845_v18 = vsel %vm2823_vm13, %v3810_v36, %v2801_v0  ;;  %v2924_v48 = vsel %vm2911_vm14, %v3838_v62, %v2880_v21  ;;  %v2319_v62 = vmul.f32 0.2617994, %v5895_v61  ;;  %vm3175_vm0 = vmpackc.low %vm3166_vm15, %vm3166_vm15 }
 0x25a   : > { %v3826_v58 = vld [vmem:[%s4713_s21 + $0x328] sm:$0xf]  ;;  %v3854_v44 = vld [vmem:[%s4713_s21 + $0x398] sm:$0xf]  ;;  %v2871_v29 = vsel %vm6108_vm6, %v3818_v17, %v2827_v12  ;;  %v2942_v63 = vsel %vm2911_vm14, %v3846_v27, %v2898_v32  ;;  %vm3254_vm13 = vcmp.eq.f32.partialorder %v5895_v61, 21.0  ;;  %vm6196_vm10 = vmpackc.low %vm3210_vm1, %vm3210_vm1 }
 0x25b   : > { %v3834_v52 = vld [vmem:[%s4713_s21 + $0x348] sm:$0xf]  ;;  %v3862_v5 = vld [vmem:[%s4713_s21 + $0x3b8] sm:$0xf]  ;;  %v2889_v24 = vsel %vm6108_vm6, %v3826_v58, %v2845_v18  ;;  %v2968_v15 = vsel %vm6131_vm2, %v3854_v44, %v2924_v48  ;;  %vm3342_vm6 = vcmp.eq.f32.partialorder %v5895_v61, 23.0  ;;  %vm6211_vm12 = vmpackc.low %vm3254_vm13, %vm3254_vm13 }
 0x25c   : > { %v3842_v49 = vld [vmem:[%s4713_s21 + $0x368] sm:$0xf]  ;;  %v3870_v14 = vld [vmem:[%s4713_s21 + $0x3d8] sm:$0xf]  ;;  %v2915_v54 = vsel %vm2911_vm14, %v3834_v52, %v2871_v29  ;;  %v2986_v1 = vsel %vm6131_vm2, %v3862_v5, %v2942_v63 }
 0x25d   : > { %v3850_v4 = vld [vmem:[%s4713_s21 + $0x388] sm:$0xf]  ;;  %v3878_v39 = vld [vmem:[%s4713_s21 + $0x3f8] sm:$0xf]  ;;  %v2933_v55 = vsel %vm2911_vm14, %v3842_v49, %v2889_v24  ;;  %v3012_v37 = vsel %vm2999_vm3, %v3870_v14, %v2968_v15  ;;  %vm6225_vm14 = vmpackc.low %vm3298_vm5, %vm3298_vm5 }
 0x25e   : > { %v3858_v3 = vld [vmem:[%s4713_s21 + $0x3a8] sm:$0xf]  ;;  %v3886_v43 = vld [vmem:[%s4713_s21 + $0x418] sm:$0xf]  ;;  %v2959_v59 = vsel %vm6131_vm2, %v3850_v4, %v2915_v54  ;;  %v3030_v38 = vsel %vm2999_vm3, %v3878_v39, %v2986_v1 }
 0x25f   : > { %v3866_v13 = vld [vmem:[%s4713_s21 + $0x3c8] sm:$0xf]  ;;  %v3894_v40 = vld [vmem:[%s4713_s21 + $0x438] sm:$0xf]  ;;  %v2977_v47 = vsel %vm6131_vm2, %v3858_v3, %v2933_v55  ;;  %v3056_v35 = vsel %vm6157_vm7, %v3886_v43, %v3012_v37  ;;  %v2323_v43 = vadd.f32 -3.010693, %v2319_v62  ;;  %vm6239_vm2 = vmpackc.low %vm3342_vm6, %vm3342_vm6 }
 0x260   : > { %v3874_v22 = vld [vmem:[%s4713_s21 + $0x3e8] sm:$0xf]  ;;  %v3902_v57 = vld [vmem:[%s4713_s21 + $0x458] sm:$0xf]  ;;  %v3003_v2 = vsel %vm2999_vm3, %v3866_v13, %v2959_v59  ;;  %v3074_v51 = vsel %vm6157_vm7, %v3894_v40, %v3030_v38 }
 0x261   : > { %v3882_v20 = vld [vmem:[%s4713_s21 + $0x408] sm:$0xf]  ;;  %v3910_v10 = vld [vmem:[%s4713_s21 + $0x478] sm:$0xf]  ;;  %v3021_v25 = vsel %vm2999_vm3, %v3874_v22, %v2977_v47  ;;  %v3100_v50 = vsel %vm3087_vm4, %v3902_v57, %v3056_v35  ;;  %v2327_v47 = vsub.f32 %v5610_v7, %v2323_v43  ;;  %v3438_v35 = vld [vmem:[#allocation2 + $0x10] sm:$0xff] }
 0x262   : > { %v3890_v9 = vld [vmem:[%s4713_s21 + $0x428] sm:$0xf]  ;;  %v3918_v53 = vld [vmem:[%s4713_s21 + $0x498] sm:$0xf]  ;;  %v3047_v26 = vsel %vm6157_vm7, %v3882_v20, %v3003_v2  ;;  %v3118_v44 = vsel %vm3087_vm4, %v3910_v10, %v3074_v51 }
 0x263   : > { %v3898_v34 = vld [vmem:[%s4713_s21 + $0x448] sm:$0xf]  ;;  %v3926_v46 = vld [vmem:[%s4713_s21 + $0x4b8] sm:$0xf]  ;;  %v3065_v30 = vsel %vm6157_vm7, %v3890_v9, %v3021_v25  ;;  %v3144_v0 = vsel %vm3131_vm8, %v3918_v53, %v3100_v50 }
 0x264   : > { %v3906_v6 = vld [vmem:[%s4713_s21 + $0x468] sm:$0xf]  ;;  %v3934_v56 = vld [vmem:[%s4713_s21 + $0x4d8] sm:$0xf]  ;;  %v3091_v31 = vsel %vm3087_vm4, %v3898_v34, %v3047_v26  ;;  %v3162_v12 = vsel %vm3131_vm8, %v3926_v46, %v3118_v44 }
 0x265   : > { %v3914_v41 = vld [vmem:[%s4713_s21 + $0x488] sm:$0xf]  ;;  %v3942_v33 = vld [vmem:[%s4713_s21 + $0x4f8] sm:$0xf]  ;;  %v3109_v4 = vsel %vm3087_vm4, %v3906_v6, %v3065_v30  ;;  %v3188_v60 = vsel %vm3175_vm0, %v3934_v56, %v3144_v0  ;;  %v3426_v56 = vld [vmem:[%s4705_s16 + $0x10] sm:$0xff] }
 0x266   : > { %v3922_v36 = vld [vmem:[%s4713_s21 + $0x4a8] sm:$0xf]  ;;  %v3950_v52 = vld [vmem:[%s4713_s21 + $0x518] sm:$0xf]  ;;  %v3135_v8 = vsel %vm3131_vm8, %v3914_v41, %v3091_v31  ;;  %v3206_v23 = vsel %vm3175_vm0, %v3942_v33, %v3162_v12  ;;  %vm3430_vm3 = vcmp.ne.f32.partialorder %v3426_v56, 0.0 }
 0x267   : > { %v3930_v17 = vld [vmem:[%s4713_s21 + $0x4c8] sm:$0xf]  ;;  %v3958_v45 = vld [vmem:[%s4713_s21 + $0x538] sm:$0xf]  ;;  %v3153_v11 = vsel %vm3131_vm8, %v3922_v36, %v3109_v4  ;;  %v3232_v29 = vsel %vm6196_vm10, %v3950_v52, %v3188_v60 }
 0x268   : > { %v3938_v58 = vld [vmem:[%s4713_s21 + $0x4e8] sm:$0xf]  ;;  %v3966_v28 = vld [vmem:[%s4713_s21 + $0x558] sm:$0xf]  ;;  %v3179_v22 = vsel %vm3175_vm0, %v3930_v17, %v3135_v8  ;;  %v3250_v24 = vsel %vm6196_vm10, %v3958_v45, %v3206_v23 }
 0x269   : > { %v3954_v49 = vld [vmem:[%s4713_s21 + $0x528] sm:$0xf]  ;;  %v3974_v5 = vld [vmem:[%s4713_s21 + $0x578] sm:$0xf]  ;;  %v3197_v18 = vsel %vm3175_vm0, %v3938_v58, %v3153_v11  ;;  %v3276_v40 = vsel %vm6211_vm12, %v3966_v28, %v3232_v29 }
 0x26a   : > { %v3946_v27 = vld [vmem:[%s4713_s21 + $0x508] sm:$0xf]  ;;  %v3990_v14 = vld [vmem:[%s4713_s21 + $0x5b8] sm:$0xf]  ;;  %v3241_v21 = vsel %vm6196_vm10, %v3954_v49, %v3197_v18  ;;  %v3294_v48 = vsel %vm6211_vm12, %v3974_v5, %v3250_v24 }
 0x26b   : > { %v3970_v3 = vld [vmem:[%s4713_s21 + $0x568] sm:$0xf]  ;;  %v4006_v20 = vld [vmem:[%s4713_s21 + $0x5f8] sm:$0xf]  ;;  %v3223_v19 = vsel %vm6196_vm10, %v3946_v27, %v3179_v22  ;;  %v3338_v57 = vsel %vm6225_vm14, %v3990_v14, %v3294_v48 }
 0x26c   : > { %v3986_v13 = vld [vmem:[%s4713_s21 + $0x5a8] sm:$0xf]  ;;  %v3982_v9 = vld [vmem:[%s4713_s21 + $0x598] sm:$0xf]  ;;  %v3285_v54 = vsel %vm6211_vm12, %v3970_v3, %v3241_v21  ;;  %v3382_v59 = vsel %vm6239_vm2, %v4006_v20, %v3338_v57 }
 0x26d   : > { %v4002_v16 = vld [vmem:[%s4713_s21 + $0x5e8] sm:$0xf]  ;;  %v3329_v34 = vsel %vm6225_vm14, %v3986_v13, %v3285_v54  ;;  %v3998_v15 = vld [vmem:[%s4713_s21 + $0x5d8] sm:$0xf]  ;;  %v3320_v1 = vsel %vm6225_vm14, %v3982_v9, %v3276_v40  ;;  %v3398_v41 = vunpack.c.l.bf16 %v3382_v59 }
 0x26e   : > { %v3962_v63 = vld [vmem:[%s4713_s21 + $0x548] sm:$0xf]  ;;  %v3373_v10 = vsel %vm6239_vm2, %v4002_v16, %v3329_v34  ;;  %v3364_v2 = vsel %vm6239_vm2, %v3998_v15, %v3320_v1 }
 0x26f   : > { %v3978_v61 = vld [vmem:[%s4713_s21 + $0x588] sm:$0xf]  ;;  %v3267_v53 = vsel %vm6211_vm12, %v3962_v63, %v3223_v19  ;;  %v3394_v36 = vunpack.c.l.bf16 %v3373_v10  ;;  %v3402_v46 = vmul.f32 %v3398_v41, %v2327_v47  ;;  %v3390_v42 = vunpack.c.l.bf16 %v3364_v2 }
 0x270   : > { %v3994_v37 = vld [vmem:[%s4713_s21 + $0x5c8] sm:$0xf]  ;;  %v3311_v25 = vsel %vm6225_vm14, %v3978_v61, %v3267_v53 }
 0x271   : > { %v3406_v38 = vadd.f32 %v3402_v46, %v3394_v36  ;;  %v3355_v17 = vsel %vm6239_vm2, %v3994_v37, %v3311_v25 }
 0x272   : > { %v3386_v33 = vunpack.c.l.bf16 %v3355_v17 }
 0x273   : > { %v3410_v7 = vmul.f32 %v3406_v38, %v2327_v47 }
 0x275   : > { %v3414_v58 = vadd.f32 %v3410_v7, %v3390_v42 }
 0x277   : > { %v3418_v26 = vmul.f32 %v3414_v58, %v2327_v47 }
 0x279   : > { %v3422_v30 = vadd.f32 %v3418_v26, %v3386_v33 }
 0x27b   : > { %v3434_v51 = vsel %vm3430_vm3, %v3422_v30, 0.0 }
 0x27c   : > { %v3442_v52 = vadd.f32 %v3438_v35, %v3434_v51 }
 0x27e   : > { %3446 = vst [vmem:[#allocation2 + $0x10] sm:$0xff] %v3442_v52 }
 0x27f PF: > { %p3448_p6 = scmp.eq.s32.totalorder %s4178_s25, 1 }
 0x280   : > { %v3453_v62 = vld [vmem:[#allocation2] sm:$0xff] (%p3448_p6)  ;;  %v3454_v49 = vld [vmem:[#allocation2 + $0x8] sm:$0xff] (%p3448_p6)  ;;  %v3456_v28 = vld [vmem:[#allocation2 + $0x18] sm:$0xff] (%p3448_p6) }
 0x281   : > { %3452 = sbr.rel (!%p3448_p6) target bundleno = 856 (0x358), region = 89  ;;  %v3457_v45 = vadd.f32 (%p3448_p6), %v3454_v49, %v3453_v62 }
 0x285   : > { %v3455_v27 = vld [vmem:[#allocation2 + $0x10] sm:$0xff] (%p3448_p6) }
 0x286   : > { %v3458_v31 = vadd.f32 (%p3448_p6), %v3457_v45, %v3455_v27 }
 0x288   : > { %v3459_v50 = vadd.f32 %v3458_v31, %v3456_v28 }
 0x28a   : > { %3460 = vadd.xlane.f32.xlu0 %v3459_v50 }
 0x317   : > { %v3461_v4 = vpop.xlane.xlu0 %3460 }
 0x318   : > { %v3462_v44 = vrot.slane %v3461_v4, 4 }
 0x31a   : > { %v3463_v3 = vadd.f32 %v3462_v44, %v3461_v4 }
 0x31c   : > { %v3464_v5 = vrot.slane %v3463_v3, 2 }
 0x31e   : > { %v3465_v8 = vadd.f32 %v3464_v5, %v3463_v3 }
 0x320   : > { %v3466_v0 = vrot.slane %v3465_v8, 1 }
 0x322   : > { %v3467_v11 = vadd.f32 %v3466_v0, %v3465_v8 }
 0x324   : > { %4016 = vpush %v3467_v11 }
 0x355   : > { %s4017_s3 = spop %4016 }
 0x356   : > { %v3469_v12 = vstv %s4017_s3 }
 0x357   : > { %3471 = vst [vmem:[%s4711_s29] sm:$0xff] %v3469_v12 }
 0x358 PF: > { %s21_s28 = sadd.s32 1, %s4194_s28   ;;  %s6384_s30 = sld [smem:[#allocation7_spill]] }
 0x359   : > { %p18_p7 = scmp.ge.s32.totalorder %s21_s28, 10   ;;  %s6385_s18 = sld [smem:[#allocation8_spill]] }
 0x35a   : > { %s6386_s23 = smov %s4174_s24  ;;  %s6387_s24 = smov %s4290_s8 }
 0x35b   : > { %s6388_s25 = smov %s4186_s26  ;;  %s6389_s0 = smov %s4190_s27 }
 0x35c   :  { %20 = sbr.rel (!%p18_p7) target bundleno = 19 (0x13), region = 228 }
 0x35e   : > { %s6390_s26 = smov %s6384_s30 }
 0x35f   : > { %s6391_s27 = smov %s6385_s18 }

</bundles_post_ra>
